<compile_context>
chip_gen: v7x
topology: tpu7x:2x2x1
jax: 0.10.0
libtpu: 0.0.40
codegen_flags: <defaults>
</compile_context>

<pallas_src>
import functools

import jax
import jax.numpy as jnp
from jax.experimental import pallas as pl
from jax.experimental.pallas import tpu as pltpu


def _round_up(x, m):
    return (x + m - 1) // m * m


def _layer_salt(layer_idx):
    return jnp.uint32((0x7F4A7C15 + layer_idx * 0x9E3779B9) & 0xFFFFFFFF)


def _rand_bits_u32(shape, seed_u32, salt_u32, row0_u32, col0_u32):
    """Counter-based uint32 hash keyed on (seed, layer, global row, global col)."""
    rows = jax.lax.broadcasted_iota(jnp.int32, shape, 0).astype(jnp.uint32) + row0_u32
    cols = jax.lax.broadcasted_iota(jnp.int32, shape, 1).astype(jnp.uint32) + col0_u32
    h = seed_u32 ^ salt_u32
    h = h + rows * jnp.uint32(0x9E3779B1)
    h = h + cols * jnp.uint32(0x85EBCA77)
    h = h ^ (h >> 15)
    h = h * jnp.uint32(0x2C1B3C6D)
    h = h ^ (h >> 12)
    h = h * jnp.uint32(0x297A2D39)
    h = h ^ (h >> 15)
    return h


def _fused_mlp_kernel(seed_ref, x_ref, w0_ref, *rest, n_mid, tm, tk,
                      threshold, scale):
    """rest = (*w_mid_refs, w_last_ref, o_ref, acc_ref)."""
    w_mid_refs = rest[:n_mid]
    w_last_ref = rest[n_mid]
    o_ref = rest[n_mid + 1]
    acc_ref = rest[n_mid + 2]

    i = pl.program_id(0)          # batch tile
    k = pl.program_id(1)          # layer-0 K tile (reduction axis, innermost)
    nk = pl.num_programs(1)

    use_dropout = threshold > 0   # static Python bool
    if use_dropout:
        seed = seed_ref[0].astype(jnp.uint32)
        row0 = (i * tm).astype(jnp.uint32)
        thr = jnp.uint32(threshold)
        scl = jnp.float32(scale)

    @pl.when(k == 0)
    def _():
        acc_ref[...] = jnp.zeros_like(acc_ref)

    # ----- layer 0: dropout(X) @ W0, accumulated over K tiles -----
    x = x_ref[...]
    if use_dropout:
        col0 = (k * tk).astype(jnp.uint32)
        bits = _rand_bits_u32(x.shape, seed, _layer_salt(0), row0, col0)
        x = jnp.where(bits >= thr, x * scl, jnp.float32(0.0))
    acc_ref[...] += jnp.dot(x, w0_ref[...], preferred_element_type=jnp.float32)

    # ----- remaining layers, fused, on the last K step only -----
    @pl.when(k == nk - 1)
    def _():
        h = acc_ref[...]
        all_w_refs = tuple(w_mid_refs) + (w_last_ref,)
        for li, w_ref in enumerate(all_w_refs, start=1):
            h = jnp.maximum(h, 0.0)
            if use_dropout:
                bits = _rand_bits_u32(h.shape, seed, _layer_salt(li), row0,
                                      jnp.uint32(0))
                h = jnp.where(bits >= thr, h * scl, jnp.float32(0.0))
            h = jnp.dot(h, w_ref[...], preferred_element_type=jnp.float32)
        o_ref[...] = h.astype(o_ref.dtype)


def pprgo_mlp_forward(X, weights, *, dropout=0.0, training=True, seed=0):
    """Forward pass of PPRGoMLP (dense path).

    X:       [batch, num_features] float32
    weights: list of [in, out] float32 arrays (bias-free linears, transposed
             w.r.t. PyTorch's [out, in] layout).
    """
    assert 0.0 <= dropout < 1.0, "dropout p must be in [0, 1)"
    M, K = X.shape
    H = weights[0].shape[1]
    C = weights[-1].shape[1]
    nlayers = len(weights)
    n_mid = nlayers - 2
    assert n_mid >= 0

    f32 = jnp.float32

    # ---- tiling / lane-dense padding ----
    TM = min(_round_up(max(M, 1), 8), 128)
    M_pad = _round_up(M, TM)
    K_pad = _round_up(K, 128)
    # TK: largest multiple of 128 that divides K_pad, capped at 512 (fits the
    # 16 MiB scoped-VMEM budget of v5e with double buffering, and well under
    # v7x's 32 MiB budget).
    nk128 = K_pad // 128
    tk_units = 1
    for d in range(1, nk128 + 1):
        if nk128 % d == 0 and d * 128 <= 512:
            tk_units = d
    TK = tk_units * 128
    H_pad = _round_up(H, 128)
    C_pad = _round_up(C, 128)

    def pad2(a, r, c):
        a = a.astype(f32)
        return jnp.pad(a, ((0, r - a.shape[0]), (0, c - a.shape[1])))

    X_pad = pad2(X, M_pad, K_pad)
    W0 = pad2(weights[0], K_pad, H_pad)
    mids = [pad2(w, H_pad, H_pad) for w in weights[1:-1]]
    WL = pad2(weights[-1], H_pad, C_pad)

    if training and dropout > 0.0:
        threshold = min(int(round(dropout * 4294967296.0)), 4294967295)
        scale = 1.0 / (1.0 - dropout)
    else:
        threshold = 0
        scale = 1.0

    grid = (M_pad // TM, K_pad // TK)

    kernel = functools.partial(
        _fused_mlp_kernel, n_mid=n_mid, tm=TM, tk=TK,
        threshold=threshold, scale=scale)

    in_specs = [
        pl.BlockSpec((TM, TK), lambda i, k, s: (i, k)),      # X tile
        pl.BlockSpec((TK, H_pad), lambda i, k, s: (k, 0)),   # W0 K-tile
    ]
    for _ in range(n_mid):                                   # resident hidden W
        in_specs.append(pl.BlockSpec((H_pad, H_pad), lambda i, k, s: (0, 0)))
    in_specs.append(pl.BlockSpec((H_pad, C_pad), lambda i, k, s: (0, 0)))

    out = pl.pallas_call(
        kernel,
        out_shape=jax.ShapeDtypeStruct((M_pad, C_pad), f32),
        grid_spec=pltpu.PrefetchScalarGridSpec(
            num_scalar_prefetch=1,
            grid=grid,
            in_specs=in_specs,
            out_specs=pl.BlockSpec((TM, C_pad), lambda i, k, s: (i, 0)),
            scratch_shapes=[pltpu.VMEM((TM, H_pad), jnp.float32)],
        ),
        compiler_params=pltpu.CompilerParams(
            dimension_semantics=("parallel", "arbitrary"),
            vmem_limit_bytes=32 * 1024 * 1024,
        ),
    )(jnp.asarray([seed], dtype=jnp.int32), X_pad, W0, *mids, WL)

    return out[:M, :C]


def init_pprgo_mlp_params(key, num_features, num_classes, hidden_size, nlayers):
    """Deterministic init. Weights stored as [in, out] (transposed vs PyTorch)."""
    dims = [num_features] + [hidden_size] * (nlayers - 1) + [num_classes]
    weights = []
    for i in range(nlayers):
        key, sub = jax.random.split(key)
        fan_in = dims[i]
        bound = 1.0 / jnp.sqrt(jnp.float32(fan_in))
        w = jax.random.uniform(
            sub, (dims[i], dims[i + 1]), dtype=jnp.float32,
            minval=-bound, maxval=bound)
        weights.append(w)
    return weights


if __name__ == "__main__":
    # Small shapes that still exercise M tiling, K accumulation and N padding.
    batch = 200          # -> 2 batch tiles of TM=128 (rows 200..255 padded)
    num_features = 1024  # -> 2 K tiles of TK=512
    hidden_size = 64     # padded to 128 lanes
    num_classes = 10     # padded to 128 lanes
    nlayers = 3
    dropout = 0.15

    key = jax.random.PRNGKey(0)
    kx, kw = jax.random.split(key)
    X = jax.random.normal(kx, (batch, num_features), dtype=jnp.float32)
    weights = init_pprgo_mlp_params(kw, num_features, num_classes,
                                    hidden_size, nlayers)

    # TODO(synk): training-time dropout cannot bit-match torch's RNG; it is
    # reproduced semantically (Bernoulli keep + 1/(1-p) scaling) with a
    # counter-based hash.  Set training=False for the exact eval-mode forward.
    out_train = jax.block_until_ready(
        pprgo_mlp_forward(X, weights, dropout=dropout, training=True, seed=1234))
    assert out_train.shape == (batch, num_classes)
    assert out_train.dtype == jnp.float32
    assert bool(jnp.all(jnp.isfinite(out_train)))

    # Deterministic eval path checked against a plain-JAX reference.
    out_eval = jax.block_until_ready(
        pprgo_mlp_forward(X, weights, dropout=dropout, training=False))
    h_ref = jnp.dot(X, weights[0], precision=jax.lax.Precision.HIGHEST)
    for w in weights[1:]:
        h_ref = jnp.dot(jnp.maximum(h_ref, 0.0), w,
                        precision=jax.lax.Precision.HIGHEST)
    assert jnp.allclose(out_eval, h_ref, atol=2e-3, rtol=2e-3), (
        float(jnp.max(jnp.abs(out_eval - h_ref))))

    print("KERNEL_OK")
</pallas_src>

<mosaic_0001>
module attributes {stable_mosaic.version = 11 : i64} {
  func.func @_fused_mlp_kernel(%arg0: i32, %arg1: i32, %arg2: memref<1xi32, #tpu.memory_space<smem>>, %arg3: memref<128x512xf32, #tpu.memory_space<vmem>>, %arg4: memref<512x128xf32, #tpu.memory_space<vmem>>, %arg5: memref<128x128xf32, #tpu.memory_space<vmem>>, %arg6: memref<128x128xf32, #tpu.memory_space<vmem>>, %arg7: memref<128x128xf32, #tpu.memory_space<vmem>>, %arg8: memref<128x128xf32, #tpu.memory_space<vmem>>) attributes {dimension_semantics = [#tpu.dimension_semantics<parallel>, #tpu.dimension_semantics<arbitrary>], iteration_bounds = array<i64: 2, 2>, scalar_prefetch = 1 : i64, scratch_operands = 1 : i64, tpu.core_type = #tpu.core_type<tc>, window_params = [{transform_indices = @transform_0, window_bounds = array<i64: 128, 512>}, {transform_indices = @transform_1, window_bounds = array<i64: 512, 128>}, {pipeline_mode = #tpu.pipeline_mode<synchronous>, transform_indices = @transform_2, window_bounds = array<i64: 128, 128>}, {pipeline_mode = #tpu.pipeline_mode<synchronous>, transform_indices = @transform_3, window_bounds = array<i64: 128, 128>}, {transform_indices = @transform_4, window_bounds = array<i64: 128, 128>}]} {
    %c0 = arith.constant 0 : index
    %0 = memref.load %arg2[%c0] : memref<1xi32, #tpu.memory_space<smem>>
    %c128_i32 = arith.constant 128 : i32
    %1 = arith.muli %arg0, %c128_i32 : i32
    %c0_i32 = arith.constant 0 : i32
    %2 = arith.cmpi eq, %arg1, %c0_i32 : i32
    %3 = arith.extui %2 : i1 to i32
    %c0_i32_0 = arith.constant 0 : i32
    %4 = arith.cmpi ne, %3, %c0_i32_0 : i32
    scf.if %4 {
      %cst_15 = arith.constant 0.000000e+00 : f32
      %48 = vector.broadcast %cst_15 : f32 to vector<128x128xf32>
      %c0_16 = arith.constant 0 : index
      %c0_17 = arith.constant 0 : index
      %49 = vector.load %arg8[%c0_16, %c0_17] : memref<128x128xf32, #tpu.memory_space<vmem>>, vector<128x128xf32>
      tpu.vector_store %arg8[%c0_16, %c0_17], %48 {strides = array<i32>} : memref<128x128xf32, #tpu.memory_space<vmem>>, vector<128x128xf32>,
    } else {
    }
    %c0_1 = arith.constant 0 : index
    %c0_2 = arith.constant 0 : index
    %5 = vector.load %arg3[%c0_1, %c0_2] : memref<128x512xf32, #tpu.memory_space<vmem>>, vector<128x512xf32>
    %c512_i32 = arith.constant 512 : i32
    %6 = arith.muli %arg1, %c512_i32 : i32
    %7 = tpu.iota {dimensions = array<i32: 0>} : vector<128x512xi32>
    %8 = vector.broadcast %1 : i32 to vector<128x512xi32>
    %9 = arith.addi %7, %8 : vector<128x512xi32>
    %10 = tpu.iota {dimensions = array<i32: 1>} : vector<128x512xi32>
    %11 = vector.broadcast %6 : i32 to vector<128x512xi32>
    %12 = arith.addi %10, %11 : vector<128x512xi32>
    %c2135587861_i32 = arith.constant 2135587861 : i32
    %13 = arith.xori %0, %c2135587861_i32 : i32
    %c-1640531535_i32 = arith.constant -1640531535 : i32
    %14 = vector.broadcast %c-1640531535_i32 : i32 to vector<128x512xi32>
    %15 = arith.muli %9, %14 : vector<128x512xi32>
    %16 = vector.broadcast %13 : i32 to vector<128x512xi32>
    %17 = arith.addi %16, %15 : vector<128x512xi32>
    %c-2048144777_i32 = arith.constant -2048144777 : i32
    %18 = vector.broadcast %c-2048144777_i32 : i32 to vector<128x512xi32>
    %19 = arith.muli %12, %18 : vector<128x512xi32>
    %20 = arith.addi %17, %19 : vector<128x512xi32>
    %c15_i32 = arith.constant 15 : i32
    %21 = vector.broadcast %c15_i32 : i32 to vector<128x512xi32>
    %22 = arith.shrui %20, %21 : vector<128x512xi32>
    %23 = arith.xori %20, %22 : vector<128x512xi32>
    %c739982445_i32 = arith.constant 739982445 : i32
    %24 = vector.broadcast %c739982445_i32 : i32 to vector<128x512xi32>
    %25 = arith.muli %23, %24 : vector<128x512xi32>
    %c12_i32 = arith.constant 12 : i32
    %26 = vector.broadcast %c12_i32 : i32 to vector<128x512xi32>
    %27 = arith.shrui %25, %26 : vector<128x512xi32>
    %28 = arith.xori %25, %27 : vector<128x512xi32>
    %c695872825_i32 = arith.constant 695872825 : i32
    %29 = vector.broadcast %c695872825_i32 : i32 to vector<128x512xi32>
    %30 = arith.muli %28, %29 : vector<128x512xi32>
    %c15_i32_3 = arith.constant 15 : i32
    %31 = vector.broadcast %c15_i32_3 : i32 to vector<128x512xi32>
    %32 = arith.shrui %30, %31 : vector<128x512xi32>
    %33 = arith.xori %30, %32 : vector<128x512xi32>
    %c644245094_i32 = arith.constant 644245094 : i32
    %34 = vector.broadcast %c644245094_i32 : i32 to vector<128x512xi32>
    %35 = arith.cmpi uge, %33, %34 : vector<128x512xi32>
    %cst = arith.constant 1.17647064 : f32
    %36 = vector.broadcast %cst : f32 to vector<128x512xf32>
    %37 = arith.mulf %5, %36 : vector<128x512xf32>
    %cst_4 = arith.constant 0.000000e+00 : f32
    %38 = vector.broadcast %cst_4 : f32 to vector<128x512xf32>
    %39 = arith.select %35, %37, %38 : vector<128x512xi1>, vector<128x512xf32>
    %c0_5 = arith.constant 0 : index
    %c0_6 = arith.constant 0 : index
    %40 = vector.load %arg8[%c0_5, %c0_6] : memref<128x128xf32, #tpu.memory_space<vmem>>, vector<128x128xf32>
    %c0_7 = arith.constant 0 : index
    %c0_8 = arith.constant 0 : index
    %41 = vector.load %arg4[%c0_7, %c0_8] : memref<512x128xf32, #tpu.memory_space<vmem>>, vector<512x128xf32>
    %cst_9 = arith.constant dense<0.000000e+00> : vector<128x128xf32>
    %42 = tpu.matmul %39, %41, %cst_9 {dimension_numbers = #tpu.dot_dimension_numbers<[1], [0], [0], [1], [0, 0, 1, 1], [], []>} : vector<128x512xf32>, vector<512x128xf32>, vector<128x128xf32> -> vector<128x128xf32>
    %43 = arith.addf %40, %42 : vector<128x128xf32>
    %c0_10 = arith.constant 0 : index
    %c0_11 = arith.constant 0 : index
    %44 = vector.load %arg8[%c0_10, %c0_11] : memref<128x128xf32, #tpu.memory_space<vmem>>, vector<128x128xf32>
    tpu.vector_store %arg8[%c0_10, %c0_11], %43 {strides = array<i32>} : memref<128x128xf32, #tpu.memory_space<vmem>>, vector<128x128xf32>,
    %c1_i32 = arith.constant 1 : i32
    %45 = arith.cmpi eq, %arg1, %c1_i32 : i32
    %46 = arith.extui %45 : i1 to i32
    %c644245094_i32_12 = arith.constant 644245094 : i32
    %cst_13 = arith.constant 1.17647064 : f32
    %c0_i32_14 = arith.constant 0 : i32
    %47 = arith.cmpi ne, %46, %c0_i32_14 : i32
    scf.if %47 {
      %c0_15 = arith.constant 0 : index
      %c0_16 = arith.constant 0 : index
      %48 = vector.load %arg8[%c0_15, %c0_16] : memref<128x128xf32, #tpu.memory_space<vmem>>, vector<128x128xf32>
      %cst_17 = arith.constant 0.000000e+00 : f32
      %49 = vector.broadcast %cst_17 : f32 to vector<128x128xf32>
      %50 = arith.maximumf %48, %49 : vector<128x128xf32>
      %51 = tpu.iota {dimensions = array<i32: 0>} : vector<128x128xi32>
      %52 = vector.broadcast %1 : i32 to vector<128x128xi32>
      %53 = arith.addi %51, %52 : vector<128x128xi32>
      %54 = tpu.iota {dimensions = array<i32: 1>} : vector<128x128xi32>
      %c0_i32_18 = arith.constant 0 : i32
      %55 = vector.broadcast %c0_i32_18 : i32 to vector<128x128xi32>
      %56 = arith.addi %54, %55 : vector<128x128xi32>
      %c495056334_i32 = arith.constant 495056334 : i32
      %57 = arith.xori %0, %c495056334_i32 : i32
      %c-1640531535_i32_19 = arith.constant -1640531535 : i32
      %58 = vector.broadcast %c-1640531535_i32_19 : i32 to vector<128x128xi32>
      %59 = arith.muli %53, %58 : vector<128x128xi32>
      %60 = vector.broadcast %57 : i32 to vector<128x128xi32>
      %61 = arith.addi %60, %59 : vector<128x128xi32>
      %c-2048144777_i32_20 = arith.constant -2048144777 : i32
      %62 = vector.broadcast %c-2048144777_i32_20 : i32 to vector<128x128xi32>
      %63 = arith.muli %56, %62 : vector<128x128xi32>
      %64 = arith.addi %61, %63 : vector<128x128xi32>
      %c15_i32_21 = arith.constant 15 : i32
      %65 = vector.broadcast %c15_i32_21 : i32 to vector<128x128xi32>
      %66 = arith.shrui %64, %65 : vector<128x128xi32>
      %67 = arith.xori %64, %66 : vector<128x128xi32>
      %c739982445_i32_22 = arith.constant 739982445 : i32
      %68 = vector.broadcast %c739982445_i32_22 : i32 to vector<128x128xi32>
      %69 = arith.muli %67, %68 : vector<128x128xi32>
      %c12_i32_23 = arith.constant 12 : i32
      %70 = vector.broadcast %c12_i32_23 : i32 to vector<128x128xi32>
      %71 = arith.shrui %69, %70 : vector<128x128xi32>
      %72 = arith.xori %69, %71 : vector<128x128xi32>
      %c695872825_i32_24 = arith.constant 695872825 : i32
      %73 = vector.broadcast %c695872825_i32_24 : i32 to vector<128x128xi32>
      %74 = arith.muli %72, %73 : vector<128x128xi32>
      %c15_i32_25 = arith.constant 15 : i32
      %75 = vector.broadcast %c15_i32_25 : i32 to vector<128x128xi32>
      %76 = arith.shrui %74, %75 : vector<128x128xi32>
      %77 = arith.xori %74, %76 : vector<128x128xi32>
      %78 = vector.broadcast %c644245094_i32_12 : i32 to vector<128x128xi32>
      %79 = arith.cmpi uge, %77, %78 : vector<128x128xi32>
      %80 = vector.broadcast %cst_13 : f32 to vector<128x128xf32>
      %81 = arith.mulf %50, %80 : vector<128x128xf32>
      %cst_26 = arith.constant 0.000000e+00 : f32
      %82 = vector.broadcast %cst_26 : f32 to vector<128x128xf32>
      %83 = arith.select %79, %81, %82 : vector<128x128xi1>, vector<128x128xf32>
      %c0_27 = arith.constant 0 : index
      %c0_28 = arith.constant 0 : index
      %84 = vector.load %arg5[%c0_27, %c0_28] : memref<128x128xf32, #tpu.memory_space<vmem>>, vector<128x128xf32>
      %cst_29 = arith.constant dense<0.000000e+00> : vector<128x128xf32>
      %85 = tpu.matmul %83, %84, %cst_29 {dimension_numbers = #tpu.dot_dimension_numbers<[1], [0], [0], [1], [0, 0, 1, 1], [], []>} : vector<128x128xf32>, vector<128x128xf32>, vector<128x128xf32> -> vector<128x128xf32>
      %cst_30 = arith.constant 0.000000e+00 : f32
      %86 = vector.broadcast %cst_30 : f32 to vector<128x128xf32>
      %87 = arith.maximumf %85, %86 : vector<128x128xf32>
      %88 = tpu.iota {dimensions = array<i32: 0>} : vector<128x128xi32>
      %89 = vector.broadcast %1 : i32 to vector<128x128xi32>
      %90 = arith.addi %88, %89 : vector<128x128xi32>
      %91 = tpu.iota {dimensions = array<i32: 1>} : vector<128x128xi32>
      %c0_i32_31 = arith.constant 0 : i32
      %92 = vector.broadcast %c0_i32_31 : i32 to vector<128x128xi32>
      %93 = arith.addi %91, %92 : vector<128x128xi32>
      %c-1145475193_i32 = arith.constant -1145475193 : i32
      %94 = arith.xori %0, %c-1145475193_i32 : i32
      %c-1640531535_i32_32 = arith.constant -1640531535 : i32
      %95 = vector.broadcast %c-1640531535_i32_32 : i32 to vector<128x128xi32>
      %96 = arith.muli %90, %95 : vector<128x128xi32>
      %97 = vector.broadcast %94 : i32 to vector<128x128xi32>
      %98 = arith.addi %97, %96 : vector<128x128xi32>
      %c-2048144777_i32_33 = arith.constant -2048144777 : i32
      %99 = vector.broadcast %c-2048144777_i32_33 : i32 to vector<128x128xi32>
      %100 = arith.muli %93, %99 : vector<128x128xi32>
      %101 = arith.addi %98, %100 : vector<128x128xi32>
      %c15_i32_34 = arith.constant 15 : i32
      %102 = vector.broadcast %c15_i32_34 : i32 to vector<128x128xi32>
      %103 = arith.shrui %101, %102 : vector<128x128xi32>
      %104 = arith.xori %101, %103 : vector<128x128xi32>
      %c739982445_i32_35 = arith.constant 739982445 : i32
      %105 = vector.broadcast %c739982445_i32_35 : i32 to vector<128x128xi32>
      %106 = arith.muli %104, %105 : vector<128x128xi32>
      %c12_i32_36 = arith.constant 12 : i32
      %107 = vector.broadcast %c12_i32_36 : i32 to vector<128x128xi32>
      %108 = arith.shrui %106, %107 : vector<128x128xi32>
      %109 = arith.xori %106, %108 : vector<128x128xi32>
      %c695872825_i32_37 = arith.constant 695872825 : i32
      %110 = vector.broadcast %c695872825_i32_37 : i32 to vector<128x128xi32>
      %111 = arith.muli %109, %110 : vector<128x128xi32>
      %c15_i32_38 = arith.constant 15 : i32
      %112 = vector.broadcast %c15_i32_38 : i32 to vector<128x128xi32>
      %113 = arith.shrui %111, %112 : vector<128x128xi32>
      %114 = arith.xori %111, %113 : vector<128x128xi32>
      %115 = vector.broadcast %c644245094_i32_12 : i32 to vector<128x128xi32>
      %116 = arith.cmpi uge, %114, %115 : vector<128x128xi32>
      %117 = vector.broadcast %cst_13 : f32 to vector<128x128xf32>
      %118 = arith.mulf %87, %117 : vector<128x128xf32>
      %cst_39 = arith.constant 0.000000e+00 : f32
      %119 = vector.broadcast %cst_39 : f32 to vector<128x128xf32>
      %120 = arith.select %116, %118, %119 : vector<128x128xi1>, vector<128x128xf32>
      %c0_40 = arith.constant 0 : index
      %c0_41 = arith.constant 0 : index
      %121 = vector.load %arg6[%c0_40, %c0_41] : memref<128x128xf32, #tpu.memory_space<vmem>>, vector<128x128xf32>
      %cst_42 = arith.constant dense<0.000000e+00> : vector<128x128xf32>
      %122 = tpu.matmul %120, %121, %cst_42 {dimension_numbers = #tpu.dot_dimension_numbers<[1], [0], [0], [1], [0, 0, 1, 1], [], []>} : vector<128x128xf32>, vector<128x128xf32>, vector<128x128xf32> -> vector<128x128xf32>
      %c0_43 = arith.constant 0 : index
      %c0_44 = arith.constant 0 : index
      %123 = vector.load %arg7[%c0_43, %c0_44] : memref<128x128xf32, #tpu.memory_space<vmem>>, vector<128x128xf32>
      tpu.vector_store %arg7[%c0_43, %c0_44], %122 {strides = array<i32>} : memref<128x128xf32, #tpu.memory_space<vmem>>, vector<128x128xf32>,
    } else {
    }
    return
  }
  func.func @transform_0(%arg0: i32, %arg1: i32, %arg2: memref<1xi32, #tpu.memory_space<smem>>) -> (i32, i32) {
    %c0_i32 = arith.constant 0 : i32
    return %arg0, %arg1 : i32, i32
  }
  func.func @transform_1(%arg0: i32, %arg1: i32, %arg2: memref<1xi32, #tpu.memory_space<smem>>) -> (i32, i32) {
    %c0_i32 = arith.constant 0 : i32
    %c0_i32_0 = arith.constant 0 : i32
    return %arg1, %c0_i32 : i32, i32
  }
  func.func @transform_2(%arg0: i32, %arg1: i32, %arg2: memref<1xi32, #tpu.memory_space<smem>>) -> (i32, i32) {
    %c0_i32 = arith.constant 0 : i32
    %c0_i32_0 = arith.constant 0 : i32
    %c0_i32_1 = arith.constant 0 : i32
    return %c0_i32, %c0_i32_0 : i32, i32
  }
  func.func @transform_3(%arg0: i32, %arg1: i32, %arg2: memref<1xi32, #tpu.memory_space<smem>>) -> (i32, i32) {
    %c0_i32 = arith.constant 0 : i32
    %c0_i32_0 = arith.constant 0 : i32
    %c0_i32_1 = arith.constant 0 : i32
    return %c0_i32, %c0_i32_0 : i32, i32
  }
  func.func @transform_4(%arg0: i32, %arg1: i32, %arg2: memref<1xi32, #tpu.memory_space<smem>>) -> (i32, i32) {
    %c0_i32 = arith.constant 0 : i32
    %c0_i32_0 = arith.constant 0 : i32
    return %arg0, %c0_i32 : i32, i32
  }
}

</mosaic_0001>

<bundles_post_ra>
// kernel: tpu_custom_call.1
= control target key start
LH: loop header
LB: loop body
LE: loop exit
PB: predicated region body
PF: predicated region fallthrough
CT: control target
= control target key end

     0   :  { %s4829_s0 = inlined_call_operand.<no memory space> [shape: s32[1], index: 0, kind: input, shape index: {}]   ;;  %s4830_s1 = inlined_call_operand.hbm [shape: f32[256,1024], index: 1, kind: input, shape index: {}]   ;;  %s4831_s2 = inlined_call_operand.hbm [shape: f32[1024,128], index: 2, kind: input, shape index: {}]   ;;  %s4832_s3 = inlined_call_operand.hbm [shape: f32[128,128], index: 3, kind: input, shape index: {}]   ;;  %s4833_s4 = inlined_call_operand.hbm [shape: f32[128,128], index: 4, kind: input, shape index: {}]   ;;  %s4834_s5 = inlined_call_operand.hbm [shape: f32[256,128], index: 5, kind: output, shape index: {}]  }
   0x1   :  { %4867 = sst [smem:[#allocation34_spill]] %s4830_s1 }
   0x2   :  { %4868 = sst [smem:[#allocation35_spill]] %s4832_s3 }
   0x3   :  { %4869 = sst [smem:[#allocation36_spill]] %s4833_s4 }
   0x4   :  { %4870 = sst [smem:[#allocation37_spill]] %s4834_s5 }
   0x5   :  { %10 = sst [smem:[#allocation4]] %s4829_s0 }
   0x6   :  { %11 = vsyncpa [#allocation6], 0 }
   0x7   :  { %13 = vsyncpa [#allocation6 + $0x1], 0 }
   0x8   :  { %14 = vsyncpa [#allocation9], 0 }
   0x9   :  { %16 = vsyncpa [#allocation9 + $0x1], 0 }
   0xa   :  { %17 = vsyncpa [#allocation12], 0 }
   0xb   :  { %18 = vsyncpa [#allocation7], 0 }
   0xc   :  { %20 = vsyncpa [#allocation7 + $0x1], 0  ;;  %s3675_s20 = smov 0   ;;  %s3677_s21 = smov 0  }
   0xd   :  { %s3679_s22 = smov 0   ;;  %s3681_s23 = smov 0  }
   0xe   :  { %s3683_s24 = smov 0   ;;  %s3685_s25 = smov 0  }
   0xf   :  { %s3687_s0 = smov 0   ;;  %s3689_s26 = smov 0  }
  0x10   :  { %s3691_s27 = smov 0   ;;  %s3693_s28 = smov 0  }
  0x11   :  { %s3695_s29 = smov 0   ;;  %s3697_s30 = smov 0  }
  0x12   :  { %s3699_s6 = smov 0   ;;  %s3701_s7 = smov 0  }
  0x13 LB: > { %4871 = sst [smem:[#allocation19_spill]] %s3575_s20  ;;  %s3742_s8 = sadd.s32 4294967295, %s3627_s7   ;;  %s3627_s7 = sphi %s3701_s7, %s26_s7   ;;  %s3623_s6 = sphi %s3699_s6, %s4932_s6   ;;  %s3619_s30 = sphi %s3697_s30, %s4943_s30   ;;  %s3615_s29 = sphi %s3695_s29, %s4942_s29   ;;  %s3611_s28 = sphi %s3693_s28, %s4941_s28   ;;  %s3607_s27 = sphi %s3691_s27, %s4940_s27   ;;  %s3603_s26 = sphi %s3689_s26, %s4939_s26   ;;  %s3599_s0 = sphi %s3687_s0, %s4938_s0   ;;  %s3595_s25 = sphi %s3685_s25, %s4937_s25   ;;  %s3591_s24 = sphi %s3683_s24, %s4936_s24   ;;  %s3587_s23 = sphi %s3681_s23, %s4935_s23   ;;  %s3583_s22 = sphi %s3679_s22, %s4934_s22   ;;  %s3579_s21 = sphi %s3677_s21, %s4933_s21   ;;  %s3575_s20 = sphi %s3675_s20, %s4929_s20  }
  0x14   : > { %4872 = sst [smem:[#allocation20_spill]] %s3579_s21  ;;  %s2602_s9 = sadd.s32 4294967294, %s3627_s7  }
  0x15   : > { %4873 = sst [smem:[#allocation21_spill]] %s3611_s28  ;;  %p60_p0 = scmp.ne.s32.totalorder %s3603_s26, %s3599_s0 }
  0x16   : > { %4874 = sst [smem:[#allocation22_spill]] %s3615_s29  ;;  %p4838_p1 = scmp.eq.s32.totalorder %s3742_s8, 0 }
  0x17   : > { %4875 = sst [smem:[#allocation23_spill]] %s3623_s6  ;;  %p86_p2 = scmp.ne.s32.totalorder %s3591_s24, %s3587_s23 }
  0x18   : > { %p3751_p3 = por %p4838_p1, %p60_p0  ;;  %p151_p4 = scmp.ne.s32.totalorder %s3583_s22, %s3579_s21 }
  0x19   : > { %p3759_p5 = por %p86_p2, %p4838_p1  ;;  %p152_p6 = scmp.eq.s32.totalorder %s3742_s8, 3 }
  0x1a   : > { %s4876_s11 = scalar_select %p3751_p3, 1, 0 }
  0x1b   : > { %s4877_s12 = scalar_select %p3759_p5, 1, 0 }
  0x1c   : > { %p157_p7 = scmp.ne.s32.totalorder %s3579_s21, %s3575_s20  ;;  %p158_p8 = scmp.eq.s32.totalorder %s2602_s9, 3 }
  0x1d   : > { %p3766_p9 = por %p152_p6, %p151_p4  ;;  %p2603_p10 = scmp.ge.s32.totalorder %s3627_s7, 1 }
  0x1e   : > { %p3771_p11 = por %p158_p8, %p157_p7  ;;  %p165_p12 = scmp.lt.s32.totalorder %s3627_s7, 5 }
  0x1f   : > { %s4878_s13 = scalar_select %p3766_p9, 1, 0 }
  0x20   : > { %s4880_s14 = scalar_select %p3771_p11, 1, 0 }
  0x21   : > { %4879 = sst [smem:[#allocation24_spill]] %s4878_s13  ;;  %p3776_p13 = pnand %p2603_p10, %p165_p12 }
  0x22   : > { %4881 = sst [smem:[#allocation25_spill]] %s4880_s14  ;;  %s3629_s16 = smov [#allocation10]  }
  0x23   : > { %s4882_s15 = scalar_select %p3776_p13, 1, 0 }
  0x24   : > { %s177_s17 = sshll.u32 %s3629_s16, 4  ;;  %p3207_p0 = pneg %p3776_p13  ;;  %s178_s17 = int_to_ptr.vmem [resolvable:$true] %s177_s17 }
  0x25   : > { %s3630_s19 = smov [#allocation11]   ;;  %s4884_s3 = sld [smem:[#allocation35_spill]] }
  0x26   : > { %p3784_p2 = pnand %p3207_p0, %p4838_p1  ;;  %s190_s23 = sshll.u32 %s3630_s19, 4  ;;  %s3788_s23 = int_to_ptr.vmem [resolvable:$true] %s190_s23 }
  0x28   : > { %p3355_p6 = pneg %p3784_p2 }
  0x2b   : > { %s3353_s10 = scalar_lea.hbm %s4884_s3, 2048 }
  0x2c   : > { %p3354_p4 = scmp.ne.s32.totalorder %s4884_s3, %s3353_s10  ;;  %p3360_p10 = scmp.lt.u32.totalorder %s3353_s10, %s4884_s3 }
  0x2e   : > { %p3356_p7 = pnand %p3355_p6, %p3354_p4 }
  0x30   : > { %p3357_p8 = pneg %p3356_p7 }
  0x32   : > { %p3362_p12 = pnand %p3360_p10, %p3357_p8 }
  0x34   : > { %3365 = shalt.err (!%p3362_p12)
}
  0x35   : > { %s3366_s19 = scalar_lea.vmem %s178_s17, 2048  ;;  %p3374_p9 = scmp.lt.s32.totalorder %s178_s17, %s178_s17 }
  0x36   : > { %p3367_p0 = scmp.ne.s32.totalorder %s178_s17, %s3366_s19  ;;  %p3375_p5 = scmp.lt.s32.totalorder %s3366_s19, %s3366_s19 }
  0x38   : > { %p3369_p1 = pnand %p3367_p0, %p3355_p6  ;;  %p3376_p3 = por %p3375_p5, %p3374_p9 }
  0x3a   : > { %p3370_p11 = pneg %p3369_p1 }
  0x3c   : > { %p3377_p13 = pnand %p3376_p3, %p3370_p11 }
  0x3e   : > { %3380 = shalt.err (!%p3377_p13)
}
  0x3f   : > { %s4846_s14 = smov 128   ;;  %s4847_s0 = smov 8  }
  0x40   : > { %3210 = dma.hbm_to_vmem [thread:$0]  (!%p3784_p2), %s4884_s3, 2048, %s178_s17, [#allocation9], %s4846_s14, %s4846_s14, %s4847_s0  }
  0x41   : > { %s4885_s4 = sld [smem:[#allocation36_spill]] }
  0x47   : > { %s3381_s16 = scalar_lea.hbm %s4885_s4, 2048 }
  0x48   : > { %p3382_p1 = scmp.ne.s32.totalorder %s4885_s4, %s3381_s16  ;;  %p3388_p9 = scmp.lt.u32.totalorder %s3381_s16, %s4885_s4 }
  0x4a   : > { %p3384_p3 = pnand %p3382_p1, %p3355_p6 }
  0x4c   : > { %p3385_p5 = pneg %p3384_p3 }
  0x4e   : > { %p3390_p11 = pnand %p3388_p9, %p3385_p5 }
  0x50   : > { %3393 = shalt.err (!%p3390_p11)
}
  0x51   : > { %s3394_s17 = scalar_lea.vmem %s3788_s23, 2048  ;;  %p3402_p8 = scmp.lt.s32.totalorder %s3788_s23, %s3788_s23 }
  0x52   : > { %p3395_p13 = scmp.ne.s32.totalorder %s3788_s23, %s3394_s17  ;;  %p3403_p10 = scmp.lt.s32.totalorder %s3394_s17, %s3394_s17 }
  0x54   : > { %p3397_p4 = pnand %p3395_p13, %p3355_p6  ;;  %p3404_p12 = por %p3403_p10, %p3402_p8 }
  0x56   : > { %p3398_p7 = pneg %p3397_p4 }
  0x58   : > { %p3405_p0 = pnand %p3404_p12, %p3398_p7 }
  0x5a   : > { %3408 = shalt.err (!%p3405_p0)
}
  0x5b   : > { %3213 = dma.hbm_to_vmem [thread:$0]  (!%p3784_p2), %s4885_s4, 2048, %s3788_s23, [#allocation12], %s4846_s14, %s4846_s14, %s4847_s0  }
  0x5c   : > { %s35_s13 = sadd.s32 1, %s3619_s30  ;;  %s38_s18 = sadd.s32 1, %s3623_s6 }
  0x5d   : > { %p36_p6 = scmp.ge.s32.totalorder %s35_s13, 2  ;;  %s47_s5 = sadd.s32 1, %s3607_s27 }
  0x5e   : > { %p54_p1 = scmp.ne.s32.totalorder %s3607_s27, %s3603_s26  ;;  %p4853_p3 = scmp.eq.s32.totalorder %s3627_s7, 0 }
  0x5f   : > { %s4945_s13 = smov (%p36_p6, %s35_s13), 0  ;;  %s4947_s18 = smov (!%p36_p6, %s38_s18), %s3623_s6 }
  0x60   : > { %4886 = sst [smem:[#allocation26_spill]] %s4945_s13  ;;  %s3854_s20 = ssub.s32 %s3619_s30, %s4945_s13 }
  0x61   : > { %p3858_p2 = por %p4853_p3, %p54_p1  ;;  %p40_p5 = scmp.ge.s32.totalorder %s4947_s18, 2 }
  0x62   : > { %p71_p9 = scmp.eq.s32.totalorder %s3854_s20, 0  ;;  %p4852_p11 = scmp.lt.s32.totalorder %s3627_s7, 4 }
  0x63   : > { %s204_s10 = sand.u32 1, %s3607_s27   ;;  %s4949_s18 = smov (%p40_p5, %s4947_s18), 0 }
  0x64   : > { %4888 = sst [smem:[#allocation27_spill]] %s4949_s18  ;;  %s2607_s9 = sshll.u32 %s204_s10, 9 }
  0x65   : > { %s42_s16 = ssub.s32 %s3623_s6, %s4949_s18  ;;  %s2609_s17 = sshll.u32 %s3619_s30, 2 }
  0x66   : > { %s44_s19 = sor.u32 %s3854_s20, %s42_s16  ;;  %p139_p13 = scmp.eq.s32.totalorder %s42_s16, 0 }
  0x67   : > { %p45_p4 = scmp.eq.s32.totalorder %s44_s19, 0  ;;  %s4889_s28 = sadd.s32 1, %s3583_s22 }
  0x68   : > { %s3874_s29 = scalar_select %p139_p13, %s3583_s22, %s4889_s28  }
  0x69   : > { %s3877_s14 = scalar_select %p45_p4, %s3607_s27, %s47_s5  }
  0x6a   : > { %s2726_s0 = sshll.u32 %s3623_s6, 7  ;;  %s208_s3 = scalar_lea.vmem [#allocation5], %s2607_s9 }
  0x6b   : > { %s218_s4 = sshll.u32 %s208_s3, 4  ;;  %s215_s13 = sadd.s32 %s2726_s0, %s2609_s17  ;;  %s3880_s4 = int_to_ptr.vmem [resolvable:$true] %s218_s4 }
  0x6c   : > { %s2611_s21 = sshll.u32 %s215_s13, 7  ;;  %p3886_p7 = pnand %p4852_p11, %p3858_p2 }
  0x6d   : > { %s4891_s1 = sld [smem:[#allocation34_spill]]  ;;  %s3895_s3 = scalar_lea.sflag [#allocation6], %s204_s10 }
  0x6e   : > { %p3411_p10 = pneg %p3886_p7 }
  0x73   : > { %s3893_s5 = scalar_lea.hbm %s4891_s1, %s2611_s21  ;;  %s3414_s9 = scalar_lea.hbm %s4891_s1, 32768 }
  0x74   : > { %s3409_s0 = scalar_lea.hbm %s3893_s5, 8192  ;;  %p3415_p6 = scmp.lt.u32.totalorder %s3893_s5, %s4891_s1 }
  0x75   : > { %p3410_p8 = scmp.ne.s32.totalorder %s3893_s5, %s3409_s0  ;;  %p3416_p1 = scmp.lt.u32.totalorder %s3414_s9, %s3409_s0 }
  0x76   : > { %p3418_p5 = scmp.lt.u32.totalorder %s3409_s0, %s3893_s5 }
  0x77   : > { %p3412_p12 = pnand %p3411_p10, %p3410_p8  ;;  %p3417_p2 = por %p3416_p1, %p3415_p6 }
  0x79   : > { %p3413_p0 = pneg %p3412_p12  ;;  %p3419_p13 = por %p3418_p5, %p3417_p2 }
  0x7b   : > { %p3420_p4 = pnand %p3419_p13, %p3413_p0 }
  0x7d   : > { %3423 = shalt.err (!%p3420_p4)
}
  0x7e   : > { %s3424_s10 = scalar_lea.vmem %s3880_s4, 8192  ;;  %s3633_s28 = smov [#allocation5]  }
  0x7f   : > { %p3425_p8 = scmp.ne.s32.totalorder %s3880_s4, %s3424_s10  ;;  %s3429_s16 = sshll.u32 %s3633_s28, 4  ;;  %s3430_s16 = int_to_ptr.vmem [resolvable:$false] %s3429_s16 }
  0x80   : > { %s3431_s19 = scalar_lea.vmem %s3430_s16, 16384  ;;  %p3432_p3 = scmp.lt.s32.totalorder %s3880_s4, %s3430_s16 }
  0x81   : > { %p3427_p12 = pnand %p3425_p8, %p3411_p10  ;;  %p3433_p6 = scmp.lt.s32.totalorder %s3431_s19, %s3424_s10 }
  0x83   : > { %p3428_p11 = pneg %p3427_p12  ;;  %p3434_p1 = por %p3433_p6, %p3432_p3 }
  0x85   : > { %p3435_p2 = pnand %p3434_p1, %p3428_p11 }
  0x87   : > { %3438 = shalt.err (!%p3435_p2)
}
  0x88   : > { %s3634_s0 = smov 1024   ;;  %s3635_s13 = smov 512  }
  0x89   : > { %s3636_s23 = smov 32   ;;  %s228_s9 = sand.u32 1, %s3627_s7  }
  0x8a   : > { %3217 = dma.hbm_to_vmem [thread:$0]  (!%p3886_p7), %s3893_s5, 8192, %s3880_s4, %s3895_s3, %s3634_s0, %s3635_s13, %s3636_s23  }
  0x8b   : > { %s73_s21 = sadd.s32 1, %s3595_s25  ;;  %p80_p3 = scmp.ne.s32.totalorder %s3595_s25, %s3591_s24 }
  0x8c   : > { %s3930_s17 = scalar_select %p71_p9, %s3595_s25, %s73_s21  }
  0x8d   : > { %p4892_p11 = scmp.eq.s32.totalorder %s3627_s7, 0  ;;  %s230_s10 = sand.u32 1, %s3595_s25  }
  0x8e   : > { %s2727_s28 = sshll.u32 %s3619_s30, 13  ;;  %s2612_s16 = sshll.u32 %s230_s10, 9 }
  0x8f   : > { %p82_p10 = por %p80_p3, %p4892_p11  ;;  %s3939_s6 = scalar_lea.hbm %s4831_s2, %s2727_s28 }
  0x90   : > { %p4893_p0 = scmp.lt.s32.totalorder %s3627_s7, 4  ;;  %s232_s18 = scalar_lea.vmem [#allocation8], %s2612_s16 }
  0x91   : > { %s239_s20 = sshll.u32 %s232_s18, 4  ;;  %s3949_s5 = scalar_lea.sflag [#allocation9], %s228_s9  ;;  %s3947_s20 = int_to_ptr.vmem [resolvable:$true] %s239_s20 }
  0x92   : > { %p3943_p7 = pnand %p4893_p0, %p82_p10  ;;  %s3439_s1 = scalar_lea.hbm %s3939_s6, 8192 }
  0x93   : > { %p3440_p9 = scmp.ne.s32.totalorder %s3939_s6, %s3439_s1  ;;  %s3444_s13 = scalar_lea.hbm %s4831_s2, 16384 }
  0x94   : > { %p3441_p5 = pneg %p3943_p7  ;;  %p3445_p8 = scmp.lt.u32.totalorder %s3939_s6, %s4831_s2 }
  0x95   : > { %p3446_p12 = scmp.lt.u32.totalorder %s3444_s13, %s3439_s1  ;;  %p3448_p1 = scmp.lt.u32.totalorder %s3439_s1, %s3939_s6 }
  0x96   : > { %p3442_p13 = pnand %p3441_p5, %p3440_p9 }
  0x97   : > { %p3447_p6 = por %p3446_p12, %p3445_p8 }
  0x98   : > { %p3443_p4 = pneg %p3442_p13 }
  0x99   : > { %p3449_p2 = por %p3448_p1, %p3447_p6 }
  0x9b   : > { %p3450_p3 = pnand %p3449_p2, %p3443_p4 }
  0x9d   : > { %3453 = shalt.err (!%p3450_p3)
}
  0x9e   : > { %s3454_s9 = scalar_lea.vmem %s3947_s20, 8192  ;;  %s3637_s10 = smov [#allocation8]  }
  0x9f   : > { %p3455_p11 = scmp.ne.s32.totalorder %s3947_s20, %s3454_s9  ;;  %s3459_s28 = sshll.u32 %s3637_s10, 4  ;;  %s3460_s28 = int_to_ptr.vmem [resolvable:$false] %s3459_s28 }
  0xa0   : > { %s3461_s16 = scalar_lea.vmem %s3460_s28, 16384  ;;  %p3462_p9 = scmp.lt.s32.totalorder %s3947_s20, %s3460_s28 }
  0xa1   : > { %p3457_p10 = pnand %p3455_p11, %p3441_p5  ;;  %p3463_p13 = scmp.lt.s32.totalorder %s3461_s16, %s3454_s9 }
  0xa3   : > { %p3458_p0 = pneg %p3457_p10  ;;  %p3464_p8 = por %p3463_p13, %p3462_p9 }
  0xa5   : > { %p3465_p12 = pnand %p3464_p8, %p3458_p0 }
  0xa7   : > { %3468 = shalt.err (!%p3465_p12)
}
  0xa8   : > { %s4895_s19 = smov 8   ;;  %s4896_s18 = smov 128  }
  0xa9   : > { %3220 = dma.hbm_to_vmem [thread:$0]  (!%p3943_p7), %s3939_s6, 8192, %s3947_s20, %s3949_s5, %s4896_s18, %s4896_s18, %s4895_s19  }
  0xaa   : > { %p4897_p5 = scmp.ne.s32.totalorder %s4882_s15, 0 }
  0xac   : > { %251 = sbr.rel (%p4897_p5) target bundleno = 1158 (0x486), region = 36 }
  0xb3   : > { %s253_s1 = sand.u32 1, %s3603_s26   ;;  %p4898_p4 = scmp.ne.s32.totalorder %s4876_s11, 0 }
  0xb4   : > { %s2616_s3 = sshll.u32 %s253_s1, 9  ;;  %s254_s0 = scalar_lea.sflag [#allocation6], %s253_s1 }
  0xb5   : > { %s3983_s13 = scalar_lea.vmem [#allocation5], %s2616_s3 }
  0xb6   : > { %3554 = dma.done.wait (%p4898_p4), %s254_s0, 8192  }
  0xb7   : > { %3556 = vsyncadd (%p4898_p4), %s254_s0, 4294959104  ;;  %s262_s4 = sand.u32 1, %s3742_s8   ;;  %s264_s6 = sand.u32 1, %s3591_s24  }
  0xb8   : > { %s2617_s20 = sshll.u32 %s264_s6, 9  ;;  %s263_s15 = scalar_lea.sflag [#allocation9], %s262_s4 }
  0xb9   : > { %s3991_s5 = scalar_lea.vmem [#allocation8], %s2617_s20  ;;  %p4899_p7 = scmp.ne.s32.totalorder %s4877_s12, 0 }
  0xbb   : > { %3558 = dma.done.wait (%p4899_p7), %s263_s15, 8192  }
  0xbc   : > { %3560 = vsyncadd (%p4899_p7), %s263_s15, 4294959104  ;;  %p4900_p6 = scmp.eq.s32.totalorder %s3742_s8, 0 }
  0xbe   : > { %3562 = dma.done.wait (%p4900_p6), [#allocation9], 2048   ;;  %p4901_p1 = pmov %p4900_p6 }
  0xc0   : > { %3564 = vsyncadd (%p4901_p1), [#allocation9], 4294965248  ;;  %p4902_p2 = pmov %p4901_p1 }
  0xc1   : > { %p4903_p3 = pmov %p4901_p1 }
  0xc2   : > { %3566 = dma.done.wait (%p4902_p2), [#allocation12], 2048  }
  0xc3   : > { %3568 = vsyncadd (%p4903_p3), [#allocation12], 4294965248  ;;  %s4904_s11 = sld [smem:[#allocation20_spill]]  ;;  %s4905_s23 = sld [smem:[#allocation22_spill]] }
  0xc4   : > { %s4007_s10 = sld [smem:[#allocation4]]  ;;  %s4906_s16 = sld [smem:[#allocation21_spill]] }
  0xc9   : > { %s301_s21 = sand.u32 1, %s4904_s11   ;;  %s2621_s9 = sshll.u32 %s4905_s23, 7 }
  0xca   : > { %s2620_s12 = sshll.u32 %s301_s21, 7  ;;  %p2622_p11 = scmp.ne.s32.totalorder %s4906_s16, 0 }
  0xcb   : > { %s4011_s28 = scalar_lea.vmem [#allocation13], %s2620_s12  ;;  %v3638_v0 = vmov (!%p2622_p11), 0.0  }
  0xcc   : > { %313 = sbr.rel (%p2622_p11) target bundleno = 212 (0xd4), region = 56  ;;  %314 = vst [vmem:[#allocation2] sm:$0xff] (!%p2622_p11), %v3638_v0  ;;  %315 = vst [vmem:[#allocation2 + $0x8] sm:$0xff] (!%p2622_p11), %v3638_v0 }
  0xcd   : > { %316 = vst [vmem:[#allocation2 + $0x10] sm:$0xff] (!%p2622_p11), %v3638_v0  ;;  %317 = vst [vmem:[#allocation2 + $0x18] sm:$0xff] (!%p2622_p11), %v3638_v0 }
  0xce   : > { %318 = vst [vmem:[#allocation2 + $0x20] sm:$0xff] (!%p2622_p11), %v3638_v0  ;;  %319 = vst [vmem:[#allocation2 + $0x28] sm:$0xff] (!%p2622_p11), %v3638_v0 }
  0xcf   : > { %320 = vst [vmem:[#allocation2 + $0x30] sm:$0xff] (!%p2622_p11), %v3638_v0  ;;  %321 = vst [vmem:[#allocation2 + $0x38] sm:$0xff] (!%p2622_p11), %v3638_v0 }
  0xd0   : > { %322 = vst [vmem:[#allocation2 + $0x40] sm:$0xff] (!%p2622_p11), %v3638_v0  ;;  %323 = vst [vmem:[#allocation2 + $0x48] sm:$0xff] (!%p2622_p11), %v3638_v0 }
  0xd1   : > { %324 = vst [vmem:[#allocation2 + $0x50] sm:$0xff] (!%p2622_p11), %v3638_v0  ;;  %325 = vst [vmem:[#allocation2 + $0x58] sm:$0xff] (!%p2622_p11), %v3638_v0 }
  0xd2   : > { %326 = vst [vmem:[#allocation2 + $0x60] sm:$0xff] (!%p2622_p11), %v3638_v0  ;;  %327 = vst [vmem:[#allocation2 + $0x68] sm:$0xff] (!%p2622_p11), %v3638_v0 }
  0xd3   : > { %328 = vst [vmem:[#allocation2 + $0x70] sm:$0xff] %v3638_v0  ;;  %329 = vst [vmem:[#allocation2 + $0x78] sm:$0xff] %v3638_v0 }
  0xd4 PF: > { %s4907_s8 = sld [smem:[#allocation21_spill]]  ;;  %v1277_v1 = vld [vmem:[%s3991_s5 + $0x80] sm:$0xff]  ;;  %v1278_v2 = vld [vmem:[%s3991_s5 + $0x88] sm:$0xff]  ;;  %v395_v4 = vlaneseq  ;;  %v4018_v5 = vstv %s2621_s9  ;;  %s439_s18 = sxor.u32 2135587861, %s4007_s10  ;;  %v1279_v15 = vld [vmem:[%s3991_s5 + $0x90] sm:$0xff] }
  0xd5   : > { %v1309_v3 = vld [vmem:[%s3991_s5 + $0x180] sm:$0xff]  ;;  %v3065_v6 = vpack.c.bf16 %v1278_v2, %v1277_v1  ;;  %v1310_v7 = vld [vmem:[%s3991_s5 + $0x188] sm:$0xff]  ;;  %v1280_v19 = vld [vmem:[%s3991_s5 + $0x98] sm:$0xff]  ;;  %v4034_v22 = vstv %s439_s18 }
  0xd6   : > { %v1261_v8 = vld [vmem:[%s3991_s5] sm:$0xff]  ;;  %v1262_v9 = vld [vmem:[%s3991_s5 + $0x8] sm:$0xff]  ;;  %v3097_v11 = vpack.c.bf16 %v1310_v7, %v1309_v3  ;;  %v4027_v16 = vshrl.u32 %v395_v4, 7  ;;  %v4029_v17 = vand.u32 127, %v395_v4  ;;  %v1311_v20 = vld [vmem:[%s3991_s5 + $0x190] sm:$0xff]  ;;  %v3069_v23 = vpack.c.bf16 %v1280_v19, %v1279_v15 }
  0xd7   : > { %v3067_v12 = vpack.c.bf16 %v1262_v9, %v1261_v8  ;;  %v1293_v13 = vld [vmem:[%s3991_s5 + $0x100] sm:$0xff]  ;;  %v1294_v14 = vld [vmem:[%s3991_s5 + $0x108] sm:$0xff]  ;;  %3066 = vmatprep.subr.bf16.mxu0 %v3065_v6  ;;  %v1312_v21 = vld [vmem:[%s3991_s5 + $0x198] sm:$0xff] }
  0xd8   : > { %v3099_v18 = vpack.c.bf16 %v1294_v14, %v1293_v13  ;;  %3098 = vmatprep.subr.bf16.mxu1 %v3097_v11  ;;  %v3101_v24 = vpack.c.bf16 %v1312_v21, %v1311_v20  ;;  %v1263_v25 = vld [vmem:[%s3991_s5 + $0x10] sm:$0xff]  ;;  %v1264_v26 = vld [vmem:[%s3991_s5 + $0x18] sm:$0xff]  ;;  %v413_v28 = vadd.s32 %v4018_v5, %v4027_v16  ;;  %v431_v29 = vadd.s32 128, %v4029_v17  ;;  %v1281_v32 = vld [vmem:[%s3991_s5 + $0xa0] sm:$0xff] }
  0xd9   : > { %3068 = vmatpush3.bf16.msra.mxu0 %v3067_v12  ;;  %v1295_v27 = vld [vmem:[%s3991_s5 + $0x110] sm:$0xff]  ;;  %v3071_v30 = vpack.c.bf16 %v1264_v26, %v1263_v25  ;;  %v1296_v31 = vld [vmem:[%s3991_s5 + $0x118] sm:$0xff]  ;;  %v1282_v33 = vld [vmem:[%s3991_s5 + $0xa8] sm:$0xff]  ;;  %v433_v34 = vadd.s32 384, %v4029_v17  ;;  %v432_v36 = vadd.s32 256, %v4029_v17  ;;  %v397_v63 = vadd.s32 8, %v4027_v16 }
  0xda   : > { %s2623_s19 = sshll.u32 %s4907_s8, 9  ;;  %3100 = vmatpush3.bf16.msra.mxu1 %v3099_v18  ;;  %3070 = vmatprep.subr.bf16.mxu0 %v3069_v23  ;;  %v3103_v37 = vpack.c.bf16 %v1296_v31, %v1295_v27  ;;  %v3073_v38 = vpack.c.bf16 %v1282_v33, %v1281_v32  ;;  %v1313_v39 = vld [vmem:[%s3991_s5 + $0x1a0] sm:$0xff]  ;;  %v1314_v40 = vld [vmem:[%s3991_s5 + $0x1a8] sm:$0xff]  ;;  %v4051_v43 = vmul.u32 2654435761, %v413_v28  ;;  %v1283_v52 = vld [vmem:[%s3991_s5 + $0xb0] sm:$0xff] }
  0xdb   : > { %v434_v10 = vstv %s2623_s19  ;;  %3102 = vmatprep.subr.bf16.mxu1 %v3101_v24  ;;  %v1265_v41 = vld [vmem:[%s3991_s5 + $0x20] sm:$0xff]  ;;  %v3105_v44 = vpack.c.bf16 %v1314_v40, %v1313_v39  ;;  %v1266_v45 = vld [vmem:[%s3991_s5 + $0x28] sm:$0xff]  ;;  %v1284_v53 = vld [vmem:[%s3991_s5 + $0xb8] sm:$0xff]  ;;  %v414_v13 = vadd.s32 %v4018_v5, %v397_v63  ;;  %p2688_p10 = scmp.ne.s32.totalorder %s4907_s8, 1 }
  0xdc   : > { %v435_v35 = vadd.s32 %v434_v10, %v4029_v17  ;;  %v436_v42 = vadd.s32 %v434_v10, %v431_v29  ;;  %v1297_v46 = vld [vmem:[%s3991_s5 + $0x120] sm:$0xff]  ;;  %v1298_v47 = vld [vmem:[%s3991_s5 + $0x128] sm:$0xff]  ;;  %v438_v48 = vadd.s32 %v434_v10, %v433_v34  ;;  %v437_v50 = vadd.s32 %v434_v10, %v432_v36  ;;  %v1315_v54 = vld [vmem:[%s3991_s5 + $0x1b0] sm:$0xff]  ;;  %s1683_s1 = sxor.u32 (!%p2688_p10), 495056334, %s4007_s10 }
  0xdd   : > { %3072 = vmatpush3.bf16.msra.mxu0 %v3071_v30  ;;  %v3075_v51 = vpack.c.bf16 %v1266_v45, %v1265_v41  ;;  %v457_v55 = vadd.s32 %v4034_v22, %v4051_v43  ;;  %v3107_v57 = vpack.c.bf16 %v1298_v47, %v1297_v46  ;;  %v3077_v58 = vpack.c.bf16 %v1284_v53, %v1283_v52  ;;  %v1316_v59 = vld [vmem:[%s3991_s5 + $0x1b8] sm:$0xff]  ;;  %v1267_v60 = vld [vmem:[%s3991_s5 + $0x30] sm:$0xff]  ;;  %v1285_v3 = vld [vmem:[%s3991_s5 + $0xc0] sm:$0xff]  ;;  %s2071_s3 = sxor.u32 (!%p2688_p10), 3149492103, %s4007_s10 }
  0xde   : > { %v4056_v49 = vmul.u32 2246822519, %v435_v35  ;;  %v4063_v56 = vmul.u32 2246822519, %v436_v42  ;;  %3104 = vmatpush3.bf16.msra.mxu1 %v3103_v37  ;;  %3074 = vmatprep.subr.bf16.mxu0 %v3073_v38  ;;  %v1268_v61 = vld [vmem:[%s3991_s5 + $0x38] sm:$0xff]  ;;  %v3109_v0 = vpack.c.bf16 %v1316_v59, %v1315_v54  ;;  %v1299_v1 = vld [vmem:[%s3991_s5 + $0x130] sm:$0xff] }
  0xdf   : > { %v4068_v62 = vmul.u32 2246822519, %v438_v48  ;;  %3106 = vmatprep.subr.bf16.mxu1 %v3105_v44  ;;  %v1300_v2 = vld [vmem:[%s3991_s5 + $0x138] sm:$0xff]  ;;  %v3079_v7 = vpack.c.bf16 %v1268_v61, %v1267_v60  ;;  %v1286_v8 = vld [vmem:[%s3991_s5 + $0xc8] sm:$0xff]  ;;  %v1317_v9 = vld [vmem:[%s3991_s5 + $0x1c0] sm:$0xff]  ;;  %v4140_v61 = vadd.s32 16, %v4027_v16 }
  0xe0   : > { %v478_v4 = vadd.s32 %v4063_v56, %v457_v55  ;;  %v477_v6 = vadd.s32 %v4056_v49, %v457_v55  ;;  %v1318_v10 = vld [vmem:[%s3991_s5 + $0x1c8] sm:$0xff]  ;;  %v4080_v12 = vmul.u32 2246822519, %v437_v50  ;;  %v3111_v14 = vpack.c.bf16 %v1300_v2, %v1299_v1  ;;  %v1269_v18 = vld [vmem:[%s3991_s5 + $0x40] sm:$0xff]  ;;  %v1287_v26 = vld [vmem:[%s3991_s5 + $0xd0] sm:$0xff] }
  0xe1   : > { %v480_v11 = vadd.s32 %v4068_v62, %v457_v55  ;;  %3076 = vmatpush3.bf16.msra.mxu0 %v3075_v51  ;;  %v3081_v15 = vpack.c.bf16 %v1286_v8, %v1285_v3  ;;  %v1270_v19 = vld [vmem:[%s3991_s5 + $0x48] sm:$0xff]  ;;  %v4086_v20 = vld [vmem:[%s3991_s5 + $0x140] sm:$0xff]  ;;  %v3113_v24 = vpack.c.bf16 %v1318_v10, %v1317_v9  ;;  %v1288_v27 = vld [vmem:[%s3991_s5 + $0xd8] sm:$0xff]  ;;  %v4092_v30 = vmul.u32 2654435761, %v414_v13 }
  0xe2   : > { %v542_v21 = vshrl.u32 %v478_v4, 15  ;;  %v541_v23 = vshrl.u32 %v477_v6, 15  ;;  %3108 = vmatpush3.bf16.msra.mxu1 %v3107_v57  ;;  %3078 = vmatprep.subr.bf16.mxu0 %v3077_v58  ;;  %v1302_v25 = vld [vmem:[%s3991_s5 + $0x148] sm:$0xff]  ;;  %v479_v29 = vadd.s32 %v4080_v12, %v457_v55  ;;  %v3083_v31 = vpack.c.bf16 %v1270_v19, %v1269_v18  ;;  %v1319_v33 = vld [vmem:[%s3991_s5 + $0x1d0] sm:$0xff]  ;;  %v1320_v34 = vld [vmem:[%s3991_s5 + $0x1d8] sm:$0xff] }
  0xe3   : > { %v544_v28 = vshrl.u32 %v480_v11, 15  ;;  %3110 = vmatprep.subr.bf16.mxu1 %v3109_v0  ;;  %v3115_v32 = vpack.c.bf16 %v1302_v25, %v4086_v20  ;;  %v4098_v35 = vld [vmem:[%s3991_s5 + $0x50] sm:$0xff]  ;;  %v3085_v38 = vpack.c.bf16 %v1288_v27, %v1287_v26  ;;  %v4103_v39 = vld [vmem:[%s3991_s5 + $0x58] sm:$0xff]  ;;  %v4113_v45 = vadd.s32 %v4034_v22, %v4092_v30  ;;  %v4120_v50 = vld [vmem:[%s3991_s5 + $0xe0] sm:$0xff] }
  0xe4   : > { %v606_v36 = vxor.u32 %v542_v21, %v478_v4  ;;  %v4100_v37 = vxor.u32 %v541_v23, %v477_v6  ;;  %v4106_v40 = vld [vmem:[%s3991_s5 + $0x150] sm:$0xff]  ;;  %v4109_v41 = vld [vmem:[%s3991_s5 + $0x158] sm:$0xff]  ;;  %v543_v44 = vshrl.u32 %v479_v29, 15  ;;  %v3117_v46 = vpack.c.bf16 %v1320_v34, %v1319_v33  ;;  %v4123_v51 = vld [vmem:[%s3991_s5 + $0xe8] sm:$0xff] }
  0xe5   : > { %v608_v42 = vxor.u32 %v544_v28, %v480_v11  ;;  %3080 = vmatpush3.bf16.msra.mxu0 %v3079_v7  ;;  %v3087_v47 = vpack.c.bf16 %v4103_v39, %v4098_v35  ;;  %v3119_v48 = vpack.c.bf16 %v4109_v41, %v4106_v40  ;;  %v4126_v52 = vld [vmem:[%s3991_s5 + $0x1e0] sm:$0xff]  ;;  %v4129_v54 = vld [vmem:[%s3991_s5 + $0x1e8] sm:$0xff]  ;;  %v482_v60 = vadd.s32 %v4063_v56, %v4113_v45  ;;  %v4153_v3 = vld [vmem:[%s3991_s5 + $0xf0] sm:$0xff] }
  0xe6   : > { %v670_v53 = vmul.u32 739982445, %v606_v36  ;;  %3112 = vmatpush3.bf16.msra.mxu1 %v3111_v14  ;;  %3082 = vmatprep.subr.bf16.mxu0 %v3081_v15  ;;  %v4132_v55 = vld [vmem:[%s3991_s5 + $0x60] sm:$0xff]  ;;  %v4135_v57 = vld [vmem:[%s3991_s5 + $0x68] sm:$0xff]  ;;  %v607_v59 = vxor.u32 %v543_v44, %v479_v29  ;;  %v3089_v63 = vpack.c.bf16 %v4123_v51, %v4120_v50  ;;  %v3121_v0 = vpack.c.bf16 %v4129_v54, %v4126_v52  ;;  %v1292_v9 = vld [vmem:[%s3991_s5 + $0xf8] sm:$0xff] }
  0xe7   : > { %v672_v58 = vmul.u32 739982445, %v608_v42  ;;  %3114 = vmatprep.subr.bf16.mxu1 %v3113_v24  ;;  %v4147_v1 = vld [vmem:[%s3991_s5 + $0x160] sm:$0xff]  ;;  %v4150_v2 = vld [vmem:[%s3991_s5 + $0x168] sm:$0xff]  ;;  %v669_v6 = vmul.u32 739982445, %v4100_v37  ;;  %v3091_v7 = vpack.c.bf16 %v4135_v57, %v4132_v55  ;;  %v3093_v15 = vpack.c.bf16 %v1292_v9, %v4153_v3 }
  0xe8   : > { %v734_v4 = vshrl.u32 %v670_v53, 12  ;;  %v3123_v8 = vpack.c.bf16 %v4150_v2, %v4147_v1  ;;  %v4162_v10 = vld [vmem:[%s3991_s5 + $0x1f0] sm:$0xff]  ;;  %v4165_v11 = vld [vmem:[%s3991_s5 + $0x1f8] sm:$0xff]  ;;  %v671_v14 = vmul.u32 739982445, %v607_v59  ;;  %v484_v24 = vadd.s32 %v4068_v62, %v4113_v45  ;;  %v331_v27 = vld [vmem:[%s3983_s13 + $0x8] sm:$0xff] }
  0xe9   : > { %v736_v13 = vshrl.u32 %v672_v58, 12  ;;  %3084 = vmatpush3.bf16.msra.mxu0 %v3083_v31  ;;  %v4169_v18 = vld [vmem:[%s3991_s5 + $0x70] sm:$0xff]  ;;  %v4172_v19 = vld [vmem:[%s3991_s5 + $0x78] sm:$0xff]  ;;  %v733_v23 = vshrl.u32 %v669_v6, 12  ;;  %v3125_v25 = vpack.c.bf16 %v4165_v11, %v4162_v10  ;;  %v546_v33 = vshrl.u32 %v482_v60, 15  ;;  %v335_v50 = vld [vmem:[%s3983_s13 + $0x28] sm:$0xff] }
  0xea   : > { %v4175_v20 = vld [vmem:[%s3991_s5 + $0x170] sm:$0xff]  ;;  %v798_v21 = vxor.u32 %v734_v4, %v670_v53  ;;  %3116 = vmatpush3.bf16.msra.mxu1 %v3115_v32  ;;  %3086 = vmatprep.subr.bf16.mxu0 %v3085_v38  ;;  %v4182_v26 = vld [vmem:[%s3991_s5 + $0x178] sm:$0xff]  ;;  %v735_v31 = vshrl.u32 %v671_v14, 12  ;;  %v3095_v34 = vpack.c.bf16 %v4172_v19, %v4169_v18  ;;  %v1118_v36 = vmul.f32 1.1764706, %v331_v27  ;;  %v330_v38 = vld [vmem:[%s3983_s13] sm:$0xff] }
  0xeb   : > { %v333_v28 = vld [vmem:[%s3983_s13 + $0x18] sm:$0xff]  ;;  %v800_v29 = vxor.u32 %v736_v13, %v672_v58  ;;  %3118 = vmatprep.subr.bf16.mxu1 %v3117_v46  ;;  %v3127_v32 = vpack.c.bf16 %v4182_v26, %v4175_v20  ;;  %v797_v39 = vxor.u32 %v733_v23, %v669_v6  ;;  %v332_v42 = vld [vmem:[%s3983_s13 + $0x10] sm:$0xff]  ;;  %v610_v51 = vxor.u32 %v546_v33, %v482_v60  ;;  %v334_v11 = vld [vmem:[%s3983_s13 + $0x20] sm:$0xff] }
  0xec   : > { %v862_v35 = vmul.u32 695872825, %v798_v21  ;;  %v799_v44 = vxor.u32 %v735_v31, %v671_v14  ;;  %v1120_v53 = vmul.f32 1.1764706, %v333_v28  ;;  %v1117_v46 = vmul.f32 1.1764706, %v330_v38 }
  0xed   : > { %v864_v37 = vmul.u32 695872825, %v800_v29  ;;  %3088 = vmatpush3.bf16.msra.mxu0 %v3087_v47  ;;  %v337_v54 = vld [vmem:[%s3983_s13 + $0x38] sm:$0xff]  ;;  %v481_v55 = vadd.s32 %v4056_v49, %v4113_v45  ;;  %v861_v58 = vmul.u32 695872825, %v797_v39  ;;  %v548_v1 = vshrl.u32 %v484_v24, 15 }
  0xee   : > { %v926_v52 = vshrl.u32 %v862_v35, 15  ;;  %3120 = vmatpush3.bf16.msra.mxu1 %v3119_v48  ;;  %3090 = vmatprep.subr.bf16.mxu0 %v3089_v63  ;;  %v863_v59 = vmul.u32 695872825, %v799_v44  ;;  %v1119_v47 = vmul.f32 1.1764706, %v332_v42  ;;  %v336_v19 = vld [vmem:[%s3983_s13 + $0x30] sm:$0xff]  ;;  %v483_v20 = vadd.s32 %v4080_v12, %v4113_v45 }
  0xef   : > { %v928_v57 = vshrl.u32 %v864_v37, 15  ;;  %3122 = vmatprep.subr.bf16.mxu1 %v3121_v0  ;;  %v674_v2 = vmul.u32 739982445, %v610_v51  ;;  %v4199_v3 = vmul.f32 1.1764706, %v335_v50  ;;  %v925_v6 = vshrl.u32 %v861_v58, 15 }
  0xf0   : > { %v990_v60 = vxor.u32 %v926_v52, %v862_v35  ;;  %v927_v9 = vshrl.u32 %v863_v59, 15  ;;  %v612_v10 = vxor.u32 %v548_v1, %v484_v24  ;;  %v4202_v41 = vmul.f32 1.1764706, %v337_v54  ;;  %v341_v23 = vld [vmem:[%s3983_s13 + $0x58] sm:$0xff]  ;;  %v338_v24 = vld [vmem:[%s3983_s13 + $0x40] sm:$0xff] }
  0xf1   : > { %v992_v4 = vxor.u32 %v928_v57, %v864_v37  ;;  %3092 = vmatpush3.bf16.msra.mxu0 %v3091_v7  ;;  %v738_v40 = vshrl.u32 %v674_v2, 12  ;;  %v545_v48 = vshrl.u32 %v481_v55, 15  ;;  %v989_v63 = vxor.u32 %v925_v6, %v861_v58 }
  0xf2   : > { %vm1054_vm0 = vcmp.ge.u32.totalorder %v990_v60, 644245094  ;;  %3124 = vmatpush3.bf16.msra.mxu1 %v3123_v8  ;;  %3094 = vmatprep.subr.bf16.mxu0 %v3093_v15  ;;  %v991_v0 = vxor.u32 %v927_v9, %v863_v59  ;;  %v676_v13 = vmul.u32 739982445, %v612_v10  ;;  %v4204_v7 = vmul.f32 1.1764706, %v334_v11 }
  0xf3   : > { %vm1056_vm1 = vcmp.ge.u32.totalorder %v992_v4, 644245094  ;;  %3126 = vmatprep.subr.bf16.mxu1 %v3125_v25  ;;  %2624 = vmatprep.mubr.msk.f32.mxu0 %vm1054_vm0, %v1118_v36  ;;  %v802_v14 = vxor.u32 %v738_v40, %v674_v2  ;;  %v609_v18 = vxor.u32 %v545_v48, %v481_v55  ;;  %vm1053_vm2 = vcmp.ge.u32.totalorder %v989_v63, 644245094  ;;  %v339_v15 = vld [vmem:[%s3983_s13 + $0x48] sm:$0xff]  ;;  %v340_v4 = vld [vmem:[%s3983_s13 + $0x50] sm:$0xff] }
  0xf4   : > { %2656 = vmatprep.mubr.msk.f32.mxu1 %vm1056_vm1, %v1120_v53  ;;  %v740_v8 = vshrl.u32 %v676_v13, 12  ;;  %v415_v21 = vadd.s32 %v4018_v5, %v4140_v61  ;;  %v547_v27 = vshrl.u32 %v483_v20, 15  ;;  %v399_v28 = vadd.s32 24, %v4027_v16 }
  0xf5   : > { %3096 = vmatpush3.bf16.msra.mxu0 %v3095_v34  ;;  %v866_v25 = vmul.u32 695872825, %v802_v14  ;;  %v673_v26 = vmul.u32 739982445, %v609_v18  ;;  %vm1055_vm3 = vcmp.ge.u32.totalorder %v991_v0, 644245094 }
  0xf6   : > { %3128 = vmatpush3.bf16.msra.mxu1 %v3127_v32  ;;  %v804_v29 = vxor.u32 %v740_v8, %v676_v13  ;;  %v4215_v31 = vmul.f32 1.1764706, %v336_v19  ;;  %v4217_v45 = vmul.u32 2654435761, %v415_v21  ;;  %v611_v36 = vxor.u32 %v547_v27, %v483_v20 }
  0xf7   : > { %v930_v33 = vshrl.u32 %v866_v25, 15  ;;  %v737_v35 = vshrl.u32 %v673_v26, 12  ;;  %v4219_v37 = vmul.f32 1.1764706, %v339_v15  ;;  %v4224_v38 = vmul.f32 1.1764706, %v341_v23 }
  0xf8   : > { %2625 = vmatmul.mubr.msk.f32.vlgmr.msra.gmra.mrb[0].mxu0 %vm1053_vm2, %v1117_v46  ;;  %v868_v61 = vmul.u32 695872825, %v804_v29  ;;  %v459_v34 = vadd.s32 %v4034_v22, %v4217_v45  ;;  %v4226_v32 = vmul.f32 1.1764706, %v338_v24  ;;  %v675_v44 = vmul.u32 739982445, %v611_v36 }
  0xf9   : > { %2657 = vmatmul.mubr.msk.f32.vlgmr.msra.gmra.mrb[0].mxu1 %vm1055_vm3, %v1119_v47  ;;  %v994_v39 = vxor.u32 %v930_v33, %v866_v25  ;;  %v801_v42 = vxor.u32 %v737_v35, %v673_v26  ;;  %v416_v50 = vadd.s32 %v4018_v5, %v399_v28  ;;  %v4240_v18 = vmul.f32 1.1764706, %v340_v4  ;;  %v343_v35 = vld [vmem:[%s3983_s13 + $0x68] sm:$0xff] }
  0xfa   : > { %v932_v51 = vshrl.u32 %v868_v61, 15  ;;  %v486_v52 = vadd.s32 %v4063_v56, %v459_v34  ;;  %v488_v53 = vadd.s32 %v4068_v62, %v459_v34  ;;  %v485_v46 = vadd.s32 %v4056_v49, %v459_v34 }
  0xfb   : > { %vm1058_vm4 = vcmp.ge.u32.totalorder %v994_v39, 644245094  ;;  %v865_v54 = vmul.u32 695872825, %v801_v42  ;;  %v739_v55 = vshrl.u32 %v675_v44, 12  ;;  %v487_v57 = vadd.s32 %v4080_v12, %v459_v34 }
  0xfc   : > { %2626 = vmatprep.mubr.msk.f32.mxu0 %vm1058_vm4, %v4199_v3  ;;  %v996_v58 = vxor.u32 %v932_v51, %v868_v61  ;;  %v550_v59 = vshrl.u32 %v486_v52, 15  ;;  %v552_v1 = vshrl.u32 %v488_v53, 15  ;;  %v549_v60 = vshrl.u32 %v485_v46, 15 }
  0xfd   : > { %v929_v47 = vshrl.u32 %v865_v54, 15  ;;  %v803_v2 = vxor.u32 %v739_v55, %v675_v44  ;;  %v551_v6 = vshrl.u32 %v487_v57, 15  ;;  %v4235_v9 = vmul.u32 2654435761, %v416_v50 }
  0xfe   : > { %vm1060_vm5 = vcmp.ge.u32.totalorder %v996_v58, 644245094  ;;  %v614_v10 = vxor.u32 %v550_v59, %v486_v52  ;;  %v616_v11 = vxor.u32 %v552_v1, %v488_v53  ;;  %v613_v40 = vxor.u32 %v549_v60, %v485_v46 }
  0xff   : > { %2658 = vmatprep.mubr.msk.f32.mxu1 %vm1060_vm5, %v4202_v41  ;;  %v993_v48 = vxor.u32 %v929_v47, %v865_v54  ;;  %v867_v63 = vmul.u32 695872825, %v803_v2  ;;  %v615_v0 = vxor.u32 %v551_v6, %v487_v57  ;;  %v460_v3 = vadd.s32 %v4034_v22, %v4235_v9 }
 0x100   : > { %v678_v13 = vmul.u32 739982445, %v614_v10  ;;  %v680_v14 = vmul.u32 739982445, %v616_v11  ;;  %v4248_v53 = vmul.f32 1.1764706, %v343_v35 }
 0x101   : > { %vm1057_vm6 = vcmp.ge.u32.totalorder %v993_v48, 644245094  ;;  %v931_v19 = vshrl.u32 %v867_v63, 15  ;;  %v677_v20 = vmul.u32 739982445, %v613_v40  ;;  %v490_v8 = vadd.s32 %v4063_v56, %v460_v3  ;;  %v345_v40 = vld [vmem:[%s3983_s13 + $0x78] sm:$0xff] }
 0x102   : > { %2627 = vmatmul.mubr.msk.f32.gmra.mrb[2].mxu0 %vm1057_vm6, %v4204_v7  ;;  %v742_v15 = vshrl.u32 %v678_v13, 12  ;;  %v744_v41 = vshrl.u32 %v680_v14, 12  ;;  %v679_v21 = vmul.u32 739982445, %v615_v0  ;;  %v492_v23 = vadd.s32 %v4068_v62, %v460_v3 }
 0x103   : > { %v995_v24 = vxor.u32 %v931_v19, %v867_v63  ;;  %v741_v25 = vshrl.u32 %v677_v20, 12  ;;  %v554_v26 = vshrl.u32 %v490_v8, 15  ;;  %v489_v27 = vadd.s32 %v4056_v49, %v460_v3  ;;  %v344_v19 = vld [vmem:[%s3983_s13 + $0x70] sm:$0xff] }
 0x104   : > { %v806_v28 = vxor.u32 %v742_v15, %v678_v13  ;;  %v808_v29 = vxor.u32 %v744_v41, %v680_v14  ;;  %v743_v33 = vshrl.u32 %v679_v21, 12  ;;  %v556_v36 = vshrl.u32 %v492_v23, 15  ;;  %v342_v14 = vld [vmem:[%s3983_s13 + $0x60] sm:$0xff]  ;;  %v347_v15 = vld [vmem:[%s3983_s13 + $0x88] sm:$0xff]  ;;  %v349_v41 = vld [vmem:[%s3983_s13 + $0x98] sm:$0xff] }
 0x105   : > { %vm1059_vm7 = vcmp.ge.u32.totalorder %v995_v24, 644245094  ;;  %v805_v61 = vxor.u32 %v741_v25, %v677_v20  ;;  %v618_v34 = vxor.u32 %v554_v26, %v490_v8  ;;  %v553_v39 = vshrl.u32 %v489_v27, 15 }
 0x106   : > { %2659 = vmatmul.mubr.msk.f32.gmra.mrb[2].mxu1 %vm1059_vm7, %v4215_v31  ;;  %v870_v7 = vmul.u32 695872825, %v806_v28  ;;  %v872_v42 = vmul.u32 695872825, %v808_v29  ;;  %v807_v44 = vxor.u32 %v743_v33, %v679_v21  ;;  %v620_v50 = vxor.u32 %v556_v36, %v492_v23 }
 0x107   : > { %v869_v51 = vmul.u32 695872825, %v805_v61  ;;  %v682_v52 = vmul.u32 739982445, %v618_v34  ;;  %v617_v46 = vxor.u32 %v553_v39, %v489_v27  ;;  %v491_v31 = vadd.s32 %v4080_v12, %v460_v3 }
 0x108   : > { %v934_v54 = vshrl.u32 %v870_v7, 15  ;;  %v936_v55 = vshrl.u32 %v872_v42, 15  ;;  %v871_v57 = vmul.u32 695872825, %v807_v44  ;;  %v684_v58 = vmul.u32 739982445, %v620_v50 }
 0x109   : > { %v933_v59 = vshrl.u32 %v869_v51, 15  ;;  %v746_v1 = vshrl.u32 %v682_v52, 12  ;;  %v681_v60 = vmul.u32 739982445, %v617_v46  ;;  %v555_v63 = vshrl.u32 %v491_v31, 15  ;;  %v353_v46 = vld [vmem:[%s3983_s13 + $0xb8] sm:$0xff] }
 0x10a   : > { %v998_v47 = vxor.u32 %v934_v54, %v870_v7  ;;  %v1000_v2 = vxor.u32 %v936_v55, %v872_v42  ;;  %v935_v4 = vshrl.u32 %v871_v57, 15  ;;  %v748_v6 = vshrl.u32 %v684_v58, 12  ;;  %v348_v7 = vld [vmem:[%s3983_s13 + $0x90] sm:$0xff]  ;;  %v351_v42 = vld [vmem:[%s3983_s13 + $0xa8] sm:$0xff]  ;;  %v350_v54 = vld [vmem:[%s3983_s13 + $0xa0] sm:$0xff] }
 0x10b   : > { %v997_v10 = vxor.u32 %v933_v59, %v869_v51  ;;  %v810_v11 = vxor.u32 %v746_v1, %v682_v52  ;;  %v745_v48 = vshrl.u32 %v681_v60, 12  ;;  %v619_v8 = vxor.u32 %v555_v63, %v491_v31 }
 0x10c   : > { %vm1062_vm8 = vcmp.ge.u32.totalorder %v998_v47, 644245094  ;;  %vm1064_vm9 = vcmp.ge.u32.totalorder %v1000_v2, 644245094  ;;  %v999_v0 = vxor.u32 %v935_v4, %v871_v57  ;;  %v812_v13 = vxor.u32 %v748_v6, %v684_v58 }
 0x10d   : > { %2628 = vmatprep.mubr.msk.f32.mxu0 %vm1062_vm8, %v4219_v37  ;;  %2660 = vmatprep.mubr.msk.f32.mxu1 %vm1064_vm9, %v4224_v38  ;;  %vm1061_vm10 = vcmp.ge.u32.totalorder %v997_v10, 644245094  ;;  %v874_v3 = vmul.u32 695872825, %v810_v11  ;;  %v809_v20 = vxor.u32 %v745_v48, %v681_v60  ;;  %v1132_v23 = vmul.f32 1.1764706, %v345_v40 }
 0x10e   : > { %2629 = vmatmul.mubr.msk.f32.gmra.mrb[4].mxu0 %vm1061_vm10, %v4226_v32  ;;  %vm1063_vm11 = vcmp.ge.u32.totalorder %v999_v0, 644245094  ;;  %v876_v21 = vmul.u32 695872825, %v812_v13  ;;  %v683_v37 = vmul.u32 739982445, %v619_v8 }
 0x10f   : > { %2661 = vmatmul.mubr.msk.f32.gmra.mrb[4].mxu1 %vm1063_vm11, %v4240_v18  ;;  %v938_v24 = vshrl.u32 %v874_v3, 15  ;;  %v873_v25 = vmul.u32 695872825, %v809_v20  ;;  %v400_v38 = vadd.s32 32, %v4027_v16  ;;  %v1129_v27 = vmul.f32 1.1764706, %v342_v14 }
 0x110   : > { %v940_v26 = vshrl.u32 %v876_v21, 15  ;;  %v1131_v28 = vmul.f32 1.1764706, %v344_v19  ;;  %v401_v29 = vadd.s32 40, %v4027_v16  ;;  %v747_v35 = vshrl.u32 %v683_v37, 12  ;;  %v346_v18 = vld [vmem:[%s3983_s13 + $0x80] sm:$0xff] }
 0x111   : > { %v1002_v32 = vxor.u32 %v938_v24, %v874_v3  ;;  %v937_v33 = vshrl.u32 %v873_v25, 15  ;;  %v417_v36 = vadd.s32 %v4018_v5, %v400_v38  ;;  %v4264_v34 = vmul.f32 1.1764706, %v347_v15 }
 0x112   : > { %v1004_v61 = vxor.u32 %v940_v26, %v876_v21  ;;  %v4266_v39 = vmul.f32 1.1764706, %v349_v41  ;;  %v418_v44 = vadd.s32 %v4018_v5, %v401_v29  ;;  %v811_v51 = vxor.u32 %v747_v35, %v683_v37  ;;  %v352_v41 = vld [vmem:[%s3983_s13 + $0xb0] sm:$0xff] }
 0x113   : > { %vm1066_vm12 = vcmp.ge.u32.totalorder %v1002_v32, 644245094  ;;  %v1001_v50 = vxor.u32 %v937_v33, %v873_v25  ;;  %v4271_v52 = vmul.u32 2654435761, %v417_v36  ;;  %v4276_v55 = vmul.f32 1.1764706, %v346_v18 }
 0x114   : > { %2630 = vmatprep.mubr.msk.f32.mxu0 %vm1066_vm12, %v4248_v53  ;;  %vm1068_vm13 = vcmp.ge.u32.totalorder %v1004_v61, 644245094  ;;  %v4278_v57 = vmul.u32 2654435761, %v418_v44  ;;  %v875_v58 = vmul.u32 695872825, %v811_v51 }
 0x115   : > { %2662 = vmatprep.mubr.msk.f32.mxu1 %vm1068_vm13, %v1132_v23  ;;  %vm1065_vm14 = vcmp.ge.u32.totalorder %v1001_v50, 644245094  ;;  %v461_v59 = vadd.s32 %v4034_v22, %v4271_v52  ;;  %v4282_v1 = vmul.f32 1.1764706, %v348_v7  ;;  %v4286_v31 = vmul.f32 1.1764706, %v351_v42 }
 0x116   : > { %2631 = vmatmul.mubr.msk.f32.gmra.mrb[6].mxu0 %vm1065_vm14, %v1129_v27  ;;  %v462_v60 = vadd.s32 %v4034_v22, %v4278_v57  ;;  %v4288_v53 = vmul.f32 1.1764706, %v353_v46  ;;  %v4290_v47 = vmul.f32 1.1764706, %v350_v54  ;;  %v939_v2 = vshrl.u32 %v875_v58, 15 }
 0x117   : > { %v494_v4 = vadd.s32 %v4063_v56, %v461_v59  ;;  %v496_v6 = vadd.s32 %v4068_v62, %v461_v59  ;;  %v493_v10 = vadd.s32 %v4056_v49, %v461_v59  ;;  %v495_v11 = vadd.s32 %v4080_v12, %v461_v59 }
 0x118   : > { %v498_v40 = vadd.s32 %v4063_v56, %v462_v60  ;;  %v500_v48 = vadd.s32 %v4068_v62, %v462_v60  ;;  %v497_v63 = vadd.s32 %v4056_v49, %v462_v60  ;;  %v1003_v0 = vxor.u32 %v939_v2, %v875_v58 }
 0x119   : > { %v558_v13 = vshrl.u32 %v494_v4, 15  ;;  %v560_v14 = vshrl.u32 %v496_v6, 15  ;;  %v557_v19 = vshrl.u32 %v493_v10, 15  ;;  %v559_v3 = vshrl.u32 %v495_v11, 15 }
 0x11a   : > { %v562_v20 = vshrl.u32 %v498_v40, 15  ;;  %v564_v8 = vshrl.u32 %v500_v48, 15  ;;  %v561_v15 = vshrl.u32 %v497_v63, 15  ;;  %vm1067_vm15 = vcmp.ge.u32.totalorder %v1003_v0, 644245094 }
 0x11b   : > { %v622_v21 = vxor.u32 %v558_v13, %v494_v4  ;;  %v624_v23 = vxor.u32 %v560_v14, %v496_v6  ;;  %v621_v24 = vxor.u32 %v557_v19, %v493_v10  ;;  %2663 = vmatmul.mubr.msk.f32.gmra.mrb[6].mxu1 %vm1067_vm15, %v1131_v28  ;;  %v623_v25 = vxor.u32 %v559_v3, %v495_v11 }
 0x11c   : > { %v626_v37 = vxor.u32 %v562_v20, %v498_v40  ;;  %v628_v38 = vxor.u32 %v564_v8, %v500_v48  ;;  %v625_v26 = vxor.u32 %v561_v15, %v497_v63  ;;  %v499_v32 = vadd.s32 %v4080_v12, %v462_v60 }
 0x11d   : > { %v686_v27 = vmul.u32 739982445, %v622_v21  ;;  %v688_v29 = vmul.u32 739982445, %v624_v23  ;;  %v4301_v33 = vmul.f32 1.1764706, %v352_v41 }
 0x11e   : > { %v685_v35 = vmul.u32 739982445, %v621_v24  ;;  %v687_v36 = vmul.u32 739982445, %v623_v25  ;;  %v402_v18 = vadd.s32 48, %v4027_v16  ;;  %v563_v46 = vshrl.u32 %v499_v32, 15 }
 0x11f   : > { %v750_v61 = vshrl.u32 %v686_v27, 12  ;;  %v752_v7 = vshrl.u32 %v688_v29, 12  ;;  %v690_v42 = vmul.u32 739982445, %v626_v37  ;;  %v692_v44 = vmul.u32 739982445, %v628_v38 }
 0x120   : > { %v749_v50 = vshrl.u32 %v685_v35, 12  ;;  %v751_v28 = vshrl.u32 %v687_v36, 12  ;;  %v689_v51 = vmul.u32 739982445, %v625_v26  ;;  %v627_v10 = vxor.u32 %v563_v46, %v499_v32 }
 0x121   : > { %v814_v54 = vxor.u32 %v750_v61, %v686_v27  ;;  %v816_v58 = vxor.u32 %v752_v7, %v688_v29  ;;  %v754_v59 = vshrl.u32 %v690_v42, 12  ;;  %v756_v2 = vshrl.u32 %v692_v44, 12  ;;  %v357_v7 = vld [vmem:[%s3983_s13 + $0xd8] sm:$0xff] }
 0x122   : > { %v813_v4 = vxor.u32 %v749_v50, %v685_v35  ;;  %v815_v60 = vxor.u32 %v751_v28, %v687_v36  ;;  %v753_v6 = vshrl.u32 %v689_v51, 12  ;;  %v419_v19 = vadd.s32 %v4018_v5, %v402_v18  ;;  %v355_v36 = vld [vmem:[%s3983_s13 + $0xc8] sm:$0xff]  ;;  %v356_v28 = vld [vmem:[%s3983_s13 + $0xd0] sm:$0xff] }
 0x123   : > { %v878_v11 = vmul.u32 695872825, %v814_v54  ;;  %v880_v40 = vmul.u32 695872825, %v816_v58  ;;  %v818_v48 = vxor.u32 %v754_v59, %v690_v42  ;;  %v820_v63 = vxor.u32 %v756_v2, %v692_v44  ;;  %v354_v42 = vld [vmem:[%s3983_s13 + $0xc0] sm:$0xff]  ;;  %v361_v59 = vld [vmem:[%s3983_s13 + $0xf8] sm:$0xff] }
 0x124   : > { %v877_v0 = vmul.u32 695872825, %v813_v4  ;;  %v879_v13 = vmul.u32 695872825, %v815_v60  ;;  %v817_v14 = vxor.u32 %v753_v6, %v689_v51  ;;  %v359_v51 = vld [vmem:[%s3983_s13 + $0xe8] sm:$0xff]  ;;  %v404_v4 = vadd.s32 64, %v4027_v16 }
 0x125   : > { %v942_v3 = vshrl.u32 %v878_v11, 15  ;;  %v944_v20 = vshrl.u32 %v880_v40, 15  ;;  %v882_v8 = vmul.u32 695872825, %v818_v48  ;;  %v884_v15 = vmul.u32 695872825, %v820_v63 }
 0x126   : > { %v941_v41 = vshrl.u32 %v877_v0, 15  ;;  %v943_v21 = vshrl.u32 %v879_v13, 15  ;;  %v881_v23 = vmul.u32 695872825, %v817_v14  ;;  %v691_v24 = vmul.u32 739982445, %v627_v10 }
 0x127   : > { %v1006_v25 = vxor.u32 %v942_v3, %v878_v11  ;;  %v1008_v37 = vxor.u32 %v944_v20, %v880_v40  ;;  %v946_v38 = vshrl.u32 %v882_v8, 15  ;;  %v948_v26 = vshrl.u32 %v884_v15, 15 }
 0x128   : > { %v1005_v27 = vxor.u32 %v941_v41, %v877_v0  ;;  %v1007_v29 = vxor.u32 %v943_v21, %v879_v13  ;;  %v945_v32 = vshrl.u32 %v881_v23, 15  ;;  %v755_v35 = vshrl.u32 %v691_v24, 12  ;;  %v358_v0 = vld [vmem:[%s3983_s13 + $0xe0] sm:$0xff]  ;;  %v360_v13 = vld [vmem:[%s3983_s13 + $0xf0] sm:$0xff] }
 0x129   : > { %vm1070_vm0 = vcmp.ge.u32.totalorder %v1006_v25, 644245094  ;;  %vm1072_vm1 = vcmp.ge.u32.totalorder %v1008_v37, 644245094  ;;  %v1010_v18 = vxor.u32 %v946_v38, %v882_v8  ;;  %v1012_v61 = vxor.u32 %v948_v26, %v884_v15  ;;  %v363_v8 = vld [vmem:[%s3983_s13 + $0x108] sm:$0xff]  ;;  %v365_v15 = vld [vmem:[%s3983_s13 + $0x118] sm:$0xff] }
 0x12a   : > { %2632 = vmatprep.mubr.msk.f32.mxu0 %vm1070_vm0, %v4264_v34  ;;  %2664 = vmatprep.mubr.msk.f32.mxu1 %vm1072_vm1, %v4266_v39  ;;  %vm1069_vm2 = vcmp.ge.u32.totalorder %v1005_v27, 644245094  ;;  %vm1071_vm3 = vcmp.ge.u32.totalorder %v1007_v29, 644245094  ;;  %v1009_v44 = vxor.u32 %v945_v32, %v881_v23  ;;  %v819_v50 = vxor.u32 %v755_v35, %v691_v24 }
 0x12b   : > { %2633 = vmatmul.mubr.msk.f32.gmra.mrb[8].mxu0 %vm1069_vm2, %v4276_v55  ;;  %2665 = vmatmul.mubr.msk.f32.gmra.mrb[8].mxu1 %vm1071_vm3, %v4282_v1  ;;  %vm1074_vm4 = vcmp.ge.u32.totalorder %v1010_v18, 644245094  ;;  %vm1076_vm5 = vcmp.ge.u32.totalorder %v1012_v61, 644245094  ;;  %v4314_v46 = vmul.u32 2654435761, %v419_v19  ;;  %v421_v14 = vadd.s32 %v4018_v5, %v404_v4 }
 0x12c   : > { %2634 = vmatprep.mubr.msk.f32.mxu0 %vm1074_vm4, %v4286_v31  ;;  %2666 = vmatprep.mubr.msk.f32.mxu1 %vm1076_vm5, %v4288_v53  ;;  %vm1073_vm6 = vcmp.ge.u32.totalorder %v1009_v44, 644245094  ;;  %v883_v34 = vmul.u32 695872825, %v819_v50  ;;  %v4318_v39 = vmul.f32 1.1764706, %v355_v36 }
 0x12d   : > { %v463_v54 = vadd.s32 %v4034_v22, %v4314_v46  ;;  %v4322_v58 = vmul.f32 1.1764706, %v357_v7  ;;  %v4324_v55 = vmul.f32 1.1764706, %v354_v42  ;;  %v403_v1 = vadd.s32 56, %v4027_v16 }
 0x12e   : > { %v947_v2 = vshrl.u32 %v883_v34, 15  ;;  %v4328_v31 = vmul.f32 1.1764706, %v356_v28  ;;  %v4330_v53 = vmul.f32 1.1764706, %v359_v51 }
 0x12f   : > { %2635 = vmatmul.mubr.msk.f32.gmra.mrb[10].mxu0 %vm1073_vm6, %v4290_v47  ;;  %v502_v60 = vadd.s32 %v4063_v56, %v463_v54  ;;  %v504_v6 = vadd.s32 %v4068_v62, %v463_v54  ;;  %v501_v10 = vadd.s32 %v4056_v49, %v463_v54  ;;  %v503_v11 = vadd.s32 %v4080_v12, %v463_v54 }
 0x130   : > { %v1011_v40 = vxor.u32 %v947_v2, %v883_v34  ;;  %v420_v48 = vadd.s32 %v4018_v5, %v403_v1  ;;  %v4339_v63 = vmul.f32 1.1764706, %v361_v59  ;;  %v4348_v21 = vmul.u32 2654435761, %v421_v14 }
 0x131   : > { %v566_v19 = vshrl.u32 %v502_v60, 15  ;;  %v568_v47 = vshrl.u32 %v504_v6, 15  ;;  %v565_v3 = vshrl.u32 %v501_v10, 15  ;;  %v567_v20 = vshrl.u32 %v503_v11, 15 }
 0x132   : > { %vm1075_vm7 = vcmp.ge.u32.totalorder %v1011_v40, 644245094  ;;  %v4346_v41 = vmul.u32 2654435761, %v420_v48  ;;  %4908 = vst [vmem:[#allocation28_spill] sm:$0xff] %v4348_v21  ;;  %v4361_v36 = vadd.s32 %v4034_v22, %v4348_v21 }
 0x133   : > { %2667 = vmatmul.mubr.msk.f32.gmra.mrb[10].mxu1 %vm1075_vm7, %v4301_v33  ;;  %v630_v23 = vxor.u32 %v566_v19, %v502_v60  ;;  %v632_v24 = vxor.u32 %v568_v47, %v504_v6  ;;  %v629_v25 = vxor.u32 %v565_v3, %v501_v10  ;;  %v631_v37 = vxor.u32 %v567_v20, %v503_v11 }
 0x134   : > { %v464_v38 = vadd.s32 %v4034_v22, %v4346_v41  ;;  %v4353_v26 = vmul.f32 1.1764706, %v358_v0  ;;  %v4355_v27 = vmul.f32 1.1764706, %v360_v13  ;;  %v4357_v29 = vmul.f32 1.1764706, %v363_v8 }
 0x135   : > { %v694_v32 = vmul.u32 739982445, %v630_v23  ;;  %v696_v35 = vmul.u32 739982445, %v632_v24  ;;  %v4363_v33 = vmul.f32 1.1764706, %v365_v15  ;;  %v510_v20 = vadd.s32 %v4063_v56, %v4361_v36 }
 0x136   : > { %v693_v18 = vmul.u32 739982445, %v629_v25  ;;  %v695_v61 = vmul.u32 739982445, %v631_v37  ;;  %v506_v7 = vadd.s32 %v4063_v56, %v464_v38  ;;  %v508_v42 = vadd.s32 %v4068_v62, %v464_v38 }
 0x137   : > { %v758_v44 = vshrl.u32 %v694_v32, 12  ;;  %v760_v50 = vshrl.u32 %v696_v35, 12  ;;  %v505_v28 = vadd.s32 %v4056_v49, %v464_v38  ;;  %v507_v51 = vadd.s32 %v4080_v12, %v464_v38 }
 0x138   : > { %v757_v34 = vshrl.u32 %v693_v18, 12  ;;  %v759_v54 = vshrl.u32 %v695_v61, 12  ;;  %v570_v1 = vshrl.u32 %v506_v7, 15  ;;  %v572_v59 = vshrl.u32 %v508_v42, 15 }
 0x139   : > { %v822_v2 = vxor.u32 %v758_v44, %v694_v32  ;;  %v824_v4 = vxor.u32 %v760_v50, %v696_v35  ;;  %v569_v60 = vshrl.u32 %v505_v28, 15  ;;  %v571_v6 = vshrl.u32 %v507_v51, 15 }
 0x13a   : > { %v821_v10 = vxor.u32 %v757_v34, %v693_v18  ;;  %v823_v11 = vxor.u32 %v759_v54, %v695_v61  ;;  %v634_v40 = vxor.u32 %v570_v1, %v506_v7  ;;  %v636_v48 = vxor.u32 %v572_v59, %v508_v42 }
 0x13b   : > { %v886_v0 = vmul.u32 695872825, %v822_v2  ;;  %v888_v13 = vmul.u32 695872825, %v824_v4  ;;  %v633_v14 = vxor.u32 %v569_v60, %v505_v28  ;;  %v635_v19 = vxor.u32 %v571_v6, %v507_v51 }
 0x13c   : > { %v885_v47 = vmul.u32 695872825, %v821_v10  ;;  %v887_v3 = vmul.u32 695872825, %v823_v11  ;;  %v512_v8 = vadd.s32 %v4068_v62, %v4361_v36  ;;  %v574_v60 = vshrl.u32 %v510_v20, 15 }
 0x13d   : > { %v950_v15 = vshrl.u32 %v886_v0, 15  ;;  %v952_v23 = vshrl.u32 %v888_v13, 15  ;;  %v698_v24 = vmul.u32 739982445, %v634_v40  ;;  %v700_v25 = vmul.u32 739982445, %v636_v48 }
 0x13e   : > { %v949_v37 = vshrl.u32 %v885_v47, 15  ;;  %v951_v38 = vshrl.u32 %v887_v3, 15  ;;  %v697_v32 = vmul.u32 739982445, %v633_v14  ;;  %v699_v35 = vmul.u32 739982445, %v635_v19 }
 0x13f   : > { %v1014_v18 = vxor.u32 %v950_v15, %v886_v0  ;;  %v1016_v61 = vxor.u32 %v952_v23, %v888_v13  ;;  %v762_v7 = vshrl.u32 %v698_v24, 12  ;;  %v764_v42 = vshrl.u32 %v700_v25, 12 }
 0x140   : > { %v1013_v44 = vxor.u32 %v949_v37, %v885_v47  ;;  %v1015_v50 = vxor.u32 %v951_v38, %v887_v3  ;;  %v761_v28 = vshrl.u32 %v697_v32, 12  ;;  %v763_v51 = vshrl.u32 %v699_v35, 12  ;;  %v362_v37 = vld [vmem:[%s3983_s13 + $0x100] sm:$0xff] }
 0x141   : > { %vm1078_vm8 = vcmp.ge.u32.totalorder %v1014_v18, 644245094  ;;  %vm1080_vm9 = vcmp.ge.u32.totalorder %v1016_v61, 644245094  ;;  %v826_v34 = vxor.u32 %v762_v7, %v698_v24  ;;  %v828_v54 = vxor.u32 %v764_v42, %v700_v25  ;;  %v369_v18 = vld [vmem:[%s3983_s13 + $0x138] sm:$0xff] }
 0x142   : > { %2636 = vmatprep.mubr.msk.f32.mxu0 %vm1078_vm8, %v4318_v39  ;;  %2668 = vmatprep.mubr.msk.f32.mxu1 %vm1080_vm9, %v4322_v58  ;;  %vm1077_vm10 = vcmp.ge.u32.totalorder %v1013_v44, 644245094  ;;  %vm1079_vm11 = vcmp.ge.u32.totalorder %v1015_v50, 644245094  ;;  %v825_v1 = vxor.u32 %v761_v28, %v697_v32  ;;  %v827_v59 = vxor.u32 %v763_v51, %v699_v35  ;;  %v367_v35 = vld [vmem:[%s3983_s13 + $0x128] sm:$0xff]  ;;  %v366_v28 = vld [vmem:[%s3983_s13 + $0x120] sm:$0xff] }
 0x143   : > { %2637 = vmatmul.mubr.msk.f32.gmra.mrb[12].mxu0 %vm1077_vm10, %v4324_v55  ;;  %2669 = vmatmul.mubr.msk.f32.gmra.mrb[12].mxu1 %vm1079_vm11, %v4328_v31  ;;  %v890_v2 = vmul.u32 695872825, %v826_v34  ;;  %v892_v4 = vmul.u32 695872825, %v828_v54  ;;  %v576_v6 = vshrl.u32 %v512_v8, 15  ;;  %v509_v40 = vadd.s32 %v4056_v49, %v4361_v36  ;;  %v368_v51 = vld [vmem:[%s3983_s13 + $0x130] sm:$0xff] }
 0x144   : > { %v889_v10 = vmul.u32 695872825, %v825_v1  ;;  %v891_v11 = vmul.u32 695872825, %v827_v59  ;;  %v511_v39 = vadd.s32 %v4080_v12, %v4361_v36  ;;  %v638_v0 = vxor.u32 %v574_v60, %v510_v20  ;;  %v364_v36 = vld [vmem:[%s3983_s13 + $0x110] sm:$0xff] }
 0x145   : > { %v954_v58 = vshrl.u32 %v890_v2, 15  ;;  %v956_v48 = vshrl.u32 %v892_v4, 15  ;;  %v640_v55 = vxor.u32 %v576_v6, %v512_v8  ;;  %v573_v14 = vshrl.u32 %v509_v40, 15 }
 0x146   : > { %v953_v31 = vshrl.u32 %v889_v10, 15  ;;  %v955_v13 = vshrl.u32 %v891_v11, 15  ;;  %v575_v19 = vshrl.u32 %v511_v39, 15  ;;  %v702_v15 = vmul.u32 739982445, %v638_v0 }
 0x147   : > { %v1018_v47 = vxor.u32 %v954_v58, %v890_v2  ;;  %v1020_v3 = vxor.u32 %v956_v48, %v892_v4  ;;  %v704_v23 = vmul.u32 739982445, %v640_v55  ;;  %v637_v38 = vxor.u32 %v573_v14, %v509_v40  ;;  %v373_v48 = vld [vmem:[%s3983_s13 + $0x158] sm:$0xff] }
 0x148   : > { %v1017_v24 = vxor.u32 %v953_v31, %v889_v10  ;;  %v1019_v25 = vxor.u32 %v955_v13, %v891_v11  ;;  %v639_v32 = vxor.u32 %v575_v19, %v511_v39  ;;  %v766_v20 = vshrl.u32 %v702_v15, 12  ;;  %v371_v39 = vld [vmem:[%s3983_s13 + $0x148] sm:$0xff] }
 0x149   : > { %vm1082_vm12 = vcmp.ge.u32.totalorder %v1018_v47, 644245094  ;;  %vm1084_vm13 = vcmp.ge.u32.totalorder %v1020_v3, 644245094  ;;  %v768_v8 = vshrl.u32 %v704_v23, 12  ;;  %v370_v3 = vld [vmem:[%s3983_s13 + $0x140] sm:$0xff] }
 0x14a   : > { %2638 = vmatprep.mubr.msk.f32.mxu0 %vm1082_vm12, %v4330_v53  ;;  %2670 = vmatprep.mubr.msk.f32.mxu1 %vm1084_vm13, %v4339_v63  ;;  %vm1081_vm14 = vcmp.ge.u32.totalorder %v1017_v24, 644245094  ;;  %vm1083_vm15 = vcmp.ge.u32.totalorder %v1019_v25, 644245094  ;;  %v701_v61 = vmul.u32 739982445, %v637_v38  ;;  %v830_v7 = vxor.u32 %v766_v20, %v702_v15 }
 0x14b   : > { %2639 = vmatmul.mubr.msk.f32.gmra.mrb[14].mxu0 %vm1081_vm14, %v4353_v26  ;;  %2671 = vmatmul.mubr.msk.f32.gmra.mrb[14].mxu1 %vm1083_vm15, %v4355_v27  ;;  %v832_v42 = vxor.u32 %v768_v8, %v704_v23  ;;  %v1149_v44 = vmul.f32 1.1764706, %v362_v37  ;;  %v703_v50 = vmul.u32 739982445, %v639_v32  ;;  %v1151_v54 = vmul.f32 1.1764706, %v364_v36 }
 0x14c   : > { %v765_v34 = vshrl.u32 %v701_v61, 12  ;;  %v405_v53 = vadd.s32 72, %v4027_v16  ;;  %v4392_v63 = vmul.f32 1.1764706, %v367_v35  ;;  %v894_v1 = vmul.u32 695872825, %v830_v7 }
 0x14d   : > { %v896_v59 = vmul.u32 695872825, %v832_v42  ;;  %v767_v2 = vshrl.u32 %v703_v50, 12  ;;  %v406_v26 = vadd.s32 80, %v4027_v16  ;;  %v4396_v60 = vmul.f32 1.1764706, %v369_v18 }
 0x14e   : > { %v829_v27 = vxor.u32 %v765_v34, %v701_v61  ;;  %v422_v4 = vadd.s32 %v4018_v5, %v405_v53  ;;  %v4398_v6 = vmul.f32 1.1764706, %v366_v28  ;;  %v958_v10 = vshrl.u32 %v894_v1, 15 }
 0x14f   : > { %v960_v11 = vshrl.u32 %v896_v59, 15  ;;  %v831_v40 = vxor.u32 %v767_v2, %v703_v50  ;;  %v423_v58 = vadd.s32 %v4018_v5, %v406_v26  ;;  %v4405_v31 = vmul.f32 1.1764706, %v368_v51 }
 0x150   : > { %v893_v0 = vmul.u32 695872825, %v829_v27  ;;  %v4403_v55 = vmul.u32 2654435761, %v422_v4  ;;  %v1022_v13 = vxor.u32 %v958_v10, %v894_v1  ;;  %v4412_v24 = vmul.f32 1.1764706, %v371_v39 }
 0x151   : > { %v1024_v14 = vxor.u32 %v960_v11, %v896_v59  ;;  %v895_v19 = vmul.u32 695872825, %v831_v40  ;;  %v4407_v47 = vmul.u32 2654435761, %v423_v58  ;;  %v4414_v25 = vmul.f32 1.1764706, %v373_v48 }
 0x152   : > { %4909 = vst [vmem:[#allocation29_spill] sm:$0xff] %v4403_v55  ;;  %v957_v15 = vshrl.u32 %v893_v0, 15  ;;  %v466_v23 = vadd.s32 %v4034_v22, %v4403_v55  ;;  %vm1086_vm0 = vcmp.ge.u32.totalorder %v1022_v13, 644245094  ;;  %v4422_v20 = vmul.f32 1.1764706, %v370_v3 }
 0x153   : > { %4910 = vst [vmem:[#allocation30_spill] sm:$0xff] %v4407_v47  ;;  %vm1088_vm1 = vcmp.ge.u32.totalorder %v1024_v14, 644245094  ;;  %v959_v37 = vshrl.u32 %v895_v19, 15  ;;  %v467_v38 = vadd.s32 %v4034_v22, %v4407_v47  ;;  %2640 = vmatprep.mubr.msk.f32.mxu0 %vm1086_vm0, %v4357_v29 }
 0x154   : > { %2672 = vmatprep.mubr.msk.f32.mxu1 %vm1088_vm1, %v4363_v33  ;;  %v1021_v36 = vxor.u32 %v957_v15, %v893_v0  ;;  %v514_v32 = vadd.s32 %v4063_v56, %v466_v23  ;;  %v516_v35 = vadd.s32 %v4068_v62, %v466_v23  ;;  %v513_v18 = vadd.s32 %v4056_v49, %v466_v23 }
 0x155   : > { %v1023_v8 = vxor.u32 %v959_v37, %v895_v19  ;;  %v515_v61 = vadd.s32 %v4080_v12, %v466_v23  ;;  %v518_v7 = vadd.s32 %v4063_v56, %v467_v38  ;;  %v520_v29 = vadd.s32 %v4068_v62, %v467_v38 }
 0x156   : > { %vm1085_vm2 = vcmp.ge.u32.totalorder %v1021_v36, 644245094  ;;  %v578_v42 = vshrl.u32 %v514_v32, 15  ;;  %v580_v50 = vshrl.u32 %v516_v35, 15  ;;  %v577_v33 = vshrl.u32 %v513_v18, 15 }
 0x157   : > { %2641 = vmatmul.mubr.msk.f32.gmra.mrb[16].mxu0 %vm1085_vm2, %v1149_v44  ;;  %vm1087_vm3 = vcmp.ge.u32.totalorder %v1023_v8, 644245094  ;;  %v579_v28 = vshrl.u32 %v515_v61, 15  ;;  %v582_v51 = vshrl.u32 %v518_v7, 15  ;;  %v584_v1 = vshrl.u32 %v520_v29, 15 }
 0x158   : > { %2673 = vmatmul.mubr.msk.f32.gmra.mrb[16].mxu1 %vm1087_vm3, %v1151_v54  ;;  %v642_v34 = vxor.u32 %v578_v42, %v514_v32  ;;  %v644_v53 = vxor.u32 %v580_v50, %v516_v35  ;;  %v517_v59 = vadd.s32 %v4056_v49, %v467_v38  ;;  %v641_v2 = vxor.u32 %v577_v33, %v513_v18 }
 0x159   : > { %v643_v26 = vxor.u32 %v579_v28, %v515_v61  ;;  %v646_v27 = vxor.u32 %v582_v51, %v518_v7  ;;  %v519_v4 = vadd.s32 %v4080_v12, %v467_v38  ;;  %v648_v40 = vxor.u32 %v584_v1, %v520_v29 }
 0x15a   : > { %v706_v10 = vmul.u32 739982445, %v642_v34  ;;  %v708_v11 = vmul.u32 739982445, %v644_v53  ;;  %v581_v39 = vshrl.u32 %v517_v59, 15  ;;  %v407_v0 = vadd.s32 88, %v4027_v16 }
 0x15b   : > { %v705_v44 = vmul.u32 739982445, %v641_v2  ;;  %v707_v58 = vmul.u32 739982445, %v643_v26  ;;  %v583_v48 = vshrl.u32 %v519_v4, 15 }
 0x15c   : > { %v770_v54 = vshrl.u32 %v706_v10, 12  ;;  %v772_v13 = vshrl.u32 %v708_v11, 12  ;;  %v710_v14 = vmul.u32 739982445, %v646_v27  ;;  %v712_v19 = vmul.u32 739982445, %v648_v40 }
 0x15d   : > { %v769_v3 = vshrl.u32 %v705_v44, 12  ;;  %v771_v15 = vshrl.u32 %v707_v58, 12  ;;  %v645_v23 = vxor.u32 %v581_v39, %v517_v59  ;;  %v647_v37 = vxor.u32 %v583_v48, %v519_v4 }
 0x15e   : > { %v834_v36 = vxor.u32 %v770_v54, %v706_v10  ;;  %v836_v32 = vxor.u32 %v772_v13, %v708_v11  ;;  %v774_v38 = vshrl.u32 %v710_v14, 12  ;;  %v776_v35 = vshrl.u32 %v712_v19, 12 }
 0x15f   : > { %v833_v8 = vxor.u32 %v769_v3, %v705_v44  ;;  %v835_v18 = vxor.u32 %v771_v15, %v707_v58  ;;  %v709_v61 = vmul.u32 739982445, %v645_v23  ;;  %v711_v7 = vmul.u32 739982445, %v647_v37  ;;  %v375_v23 = vld [vmem:[%s3983_s13 + $0x168] sm:$0xff] }
 0x160   : > { %v898_v42 = vmul.u32 695872825, %v834_v36  ;;  %v900_v50 = vmul.u32 695872825, %v836_v32  ;;  %v838_v29 = vxor.u32 %v774_v38, %v710_v14  ;;  %v840_v33 = vxor.u32 %v776_v35, %v712_v19  ;;  %v372_v14 = vld [vmem:[%s3983_s13 + $0x150] sm:$0xff]  ;;  %v377_v35 = vld [vmem:[%s3983_s13 + $0x178] sm:$0xff] }
 0x161   : > { %v897_v28 = vmul.u32 695872825, %v833_v8  ;;  %v899_v51 = vmul.u32 695872825, %v835_v18  ;;  %v773_v34 = vshrl.u32 %v709_v61, 12  ;;  %v775_v53 = vshrl.u32 %v711_v7, 12 }
 0x162   : > { %v962_v1 = vshrl.u32 %v898_v42, 15  ;;  %v964_v59 = vshrl.u32 %v900_v50, 15  ;;  %v902_v2 = vmul.u32 695872825, %v838_v29  ;;  %v904_v26 = vmul.u32 695872825, %v840_v33 }
 0x163   : > { %v961_v27 = vshrl.u32 %v897_v28, 15  ;;  %v963_v4 = vshrl.u32 %v899_v51, 15  ;;  %v837_v10 = vxor.u32 %v773_v34, %v709_v61  ;;  %v839_v11 = vxor.u32 %v775_v53, %v711_v7  ;;  %v374_v8 = vld [vmem:[%s3983_s13 + $0x160] sm:$0xff]  ;;  %v376_v18 = vld [vmem:[%s3983_s13 + $0x170] sm:$0xff]  ;;  %v381_v7 = vld [vmem:[%s3983_s13 + $0x198] sm:$0xff] }
 0x164   : > { %v1026_v40 = vxor.u32 %v962_v1, %v898_v42  ;;  %v1028_v39 = vxor.u32 %v964_v59, %v900_v50  ;;  %v966_v44 = vshrl.u32 %v902_v2, 15  ;;  %v968_v58 = vshrl.u32 %v904_v26, 15  ;;  %v378_v33 = vld [vmem:[%s3983_s13 + $0x180] sm:$0xff] }
 0x165   : > { %v1025_v48 = vxor.u32 %v961_v27, %v897_v28  ;;  %v1027_v54 = vxor.u32 %v963_v4, %v899_v51  ;;  %v901_v13 = vmul.u32 695872825, %v837_v10  ;;  %v903_v19 = vmul.u32 695872825, %v839_v11 }
 0x166   : > { %vm1090_vm4 = vcmp.ge.u32.totalorder %v1026_v40, 644245094  ;;  %vm1092_vm5 = vcmp.ge.u32.totalorder %v1028_v39, 644245094  ;;  %v1030_v3 = vxor.u32 %v966_v44, %v902_v2  ;;  %v1032_v15 = vxor.u32 %v968_v58, %v904_v26  ;;  %v380_v26 = vld [vmem:[%s3983_s13 + $0x190] sm:$0xff] }
 0x167   : > { %2642 = vmatprep.mubr.msk.f32.mxu0 %vm1090_vm4, %v4392_v63  ;;  %2674 = vmatprep.mubr.msk.f32.mxu1 %vm1092_vm5, %v4396_v60  ;;  %vm1089_vm6 = vcmp.ge.u32.totalorder %v1025_v48, 644245094  ;;  %vm1091_vm7 = vcmp.ge.u32.totalorder %v1027_v54, 644245094  ;;  %v965_v37 = vshrl.u32 %v901_v13, 15  ;;  %v967_v36 = vshrl.u32 %v903_v19, 15 }
 0x168   : > { %2643 = vmatmul.mubr.msk.f32.gmra.mrb[18].mxu0 %vm1089_vm6, %v4398_v6  ;;  %2675 = vmatmul.mubr.msk.f32.gmra.mrb[18].mxu1 %vm1091_vm7, %v4405_v31  ;;  %vm1094_vm8 = vcmp.ge.u32.totalorder %v1030_v3, 644245094  ;;  %vm1096_vm9 = vcmp.ge.u32.totalorder %v1032_v15, 644245094  ;;  %v1159_v32 = vmul.f32 1.1764706, %v372_v14  ;;  %v424_v63 = vadd.s32 %v4018_v5, %v407_v0 }
 0x169   : > { %2644 = vmatprep.mubr.msk.f32.mxu0 %vm1094_vm8, %v4412_v24  ;;  %2676 = vmatprep.mubr.msk.f32.mxu1 %vm1096_vm9, %v4414_v25  ;;  %v1029_v60 = vxor.u32 %v965_v37, %v901_v13  ;;  %v1031_v38 = vxor.u32 %v967_v36, %v903_v19  ;;  %v379_v6 = vld [vmem:[%s3983_s13 + $0x188] sm:$0xff]  ;;  %v408_v31 = vadd.s32 96, %v4027_v16  ;;  %v409_v42 = vadd.s32 104, %v4027_v16 }
 0x16a   : > { %v4443_v61 = vmul.u32 2654435761, %v424_v63  ;;  %v4449_v0 = vmul.f32 1.1764706, %v375_v23  ;;  %v4454_v25 = vmul.f32 1.1764706, %v377_v35 }
 0x16b   : > { %vm1093_vm10 = vcmp.ge.u32.totalorder %v1029_v60, 644245094  ;;  %vm1095_vm11 = vcmp.ge.u32.totalorder %v1031_v38, 644245094  ;;  %v4456_v50 = vmul.f32 1.1764706, %v374_v8  ;;  %v425_v29 = vadd.s32 %v4018_v5, %v408_v31 }
 0x16c   : > { %4911 = vst [vmem:[#allocation31_spill] sm:$0xff] %v4443_v61  ;;  %2645 = vmatmul.mubr.msk.f32.gmra.mrb[20].mxu0 %vm1093_vm10, %v4422_v20  ;;  %2677 = vmatmul.mubr.msk.f32.gmra.mrb[20].mxu1 %vm1095_vm11, %v1159_v32  ;;  %v468_v24 = vadd.s32 %v4034_v22, %v4443_v61  ;;  %v4460_v28 = vmul.f32 1.1764706, %v376_v18  ;;  %v4462_v51 = vmul.f32 1.1764706, %v379_v6  ;;  %v426_v53 = vadd.s32 %v4018_v5, %v409_v42 }
 0x16d   : > { %v4464_v34 = vmul.f32 1.1764706, %v381_v7  ;;  %v4472_v27 = vmul.u32 2654435761, %v425_v29  ;;  %v4474_v4 = vmul.f32 1.1764706, %v378_v33 }
 0x16e   : > { %v522_v20 = vadd.s32 %v4063_v56, %v468_v24  ;;  %v524_v1 = vadd.s32 %v4068_v62, %v468_v24  ;;  %v521_v59 = vadd.s32 %v4056_v49, %v468_v24  ;;  %v523_v2 = vadd.s32 %v4080_v12, %v468_v24 }
 0x16f   : > { %4912 = vst [vmem:[#allocation32_spill] sm:$0xff] %v4472_v27  ;;  %v4476_v10 = vmul.u32 2654435761, %v426_v53  ;;  %v469_v58 = vadd.s32 %v4034_v22, %v4472_v27  ;;  %v4480_v48 = vmul.f32 1.1764706, %v380_v26  ;;  %v4487_v13 = vadd.s32 112, %v4027_v16 }
 0x170   : > { %v586_v11 = vshrl.u32 %v522_v20, 15  ;;  %v588_v40 = vshrl.u32 %v524_v1, 15  ;;  %v585_v39 = vshrl.u32 %v521_v59, 15  ;;  %v587_v44 = vshrl.u32 %v523_v2, 15 }
 0x171   : > { %4913 = vst [vmem:[#allocation33_spill] sm:$0xff] %v4476_v10  ;;  %v4484_v54 = vadd.s32 %v4034_v22, %v4476_v10  ;;  %v526_v23 = vadd.s32 %v4063_v56, %v469_v58  ;;  %v528_v37 = vadd.s32 %v4068_v62, %v469_v58  ;;  %v525_v36 = vadd.s32 %v4056_v49, %v469_v58 }
 0x172   : > { %v650_v14 = vxor.u32 %v586_v11, %v522_v20  ;;  %v652_v19 = vxor.u32 %v588_v40, %v524_v1  ;;  %v649_v3 = vxor.u32 %v585_v39, %v521_v59  ;;  %v651_v15 = vxor.u32 %v587_v44, %v523_v2 }
 0x173   : > { %v527_v32 = vadd.s32 %v4080_v12, %v469_v58  ;;  %v530_v38 = vadd.s32 %v4063_v56, %v4484_v54  ;;  %v532_v35 = vadd.s32 %v4068_v62, %v4484_v54  ;;  %v590_v6 = vshrl.u32 %v526_v23, 15 }
 0x174   : > { %v714_v63 = vmul.u32 739982445, %v650_v14  ;;  %v716_v60 = vmul.u32 739982445, %v652_v19  ;;  %v592_v31 = vshrl.u32 %v528_v37, 15  ;;  %v589_v24 = vshrl.u32 %v525_v36, 15 }
 0x175   : > { %v713_v8 = vmul.u32 739982445, %v649_v3  ;;  %v715_v18 = vmul.u32 739982445, %v651_v15  ;;  %v591_v29 = vshrl.u32 %v527_v32, 15  ;;  %v654_v20 = vxor.u32 %v590_v6, %v526_v23 }
 0x176   : > { %v778_v7 = vshrl.u32 %v714_v63, 12  ;;  %v780_v42 = vshrl.u32 %v716_v60, 12  ;;  %v656_v1 = vxor.u32 %v592_v31, %v528_v37  ;;  %v653_v26 = vxor.u32 %v589_v24, %v525_v36 }
 0x177   : > { %v777_v33 = vshrl.u32 %v713_v8, 12  ;;  %v779_v53 = vshrl.u32 %v715_v18, 12  ;;  %v655_v11 = vxor.u32 %v591_v29, %v527_v32  ;;  %v718_v44 = vmul.u32 739982445, %v654_v20 }
 0x178   : > { %v842_v59 = vxor.u32 %v778_v7, %v714_v63  ;;  %v844_v2 = vxor.u32 %v780_v42, %v716_v60  ;;  %v720_v58 = vmul.u32 739982445, %v656_v1  ;;  %v594_v3 = vshrl.u32 %v530_v38, 15 }
 0x179   : > { %v841_v40 = vxor.u32 %v777_v33, %v713_v8  ;;  %v843_v39 = vxor.u32 %v779_v53, %v715_v18  ;;  %v596_v15 = vshrl.u32 %v532_v35, 15  ;;  %v782_v61 = vshrl.u32 %v718_v44, 12 }
 0x17a   : > { %v906_v14 = vmul.u32 695872825, %v842_v59  ;;  %v908_v19 = vmul.u32 695872825, %v844_v2  ;;  %v784_v47 = vshrl.u32 %v720_v58, 12  ;;  %v529_v59 = vadd.s32 %v4056_v49, %v4484_v54 }
 0x17b   : > { %v905_v10 = vmul.u32 695872825, %v841_v40  ;;  %v907_v27 = vmul.u32 695872825, %v843_v39  ;;  %v846_v36 = vxor.u32 %v782_v61, %v718_v44 }
 0x17c   : > { %v970_v55 = vshrl.u32 %v906_v14, 15  ;;  %v972_v21 = vshrl.u32 %v908_v19, 15  ;;  %v717_v23 = vmul.u32 739982445, %v653_v26  ;;  %v719_v37 = vmul.u32 739982445, %v655_v11 }
 0x17d   : > { %v969_v63 = vshrl.u32 %v905_v10, 15  ;;  %v971_v60 = vshrl.u32 %v907_v27, 15  ;;  %v848_v32 = vxor.u32 %v784_v47, %v720_v58  ;;  %v910_v24 = vmul.u32 695872825, %v846_v36 }
 0x17e   : > { %v1034_v8 = vxor.u32 %v970_v55, %v906_v14  ;;  %v1036_v18 = vxor.u32 %v972_v21, %v908_v19  ;;  %v781_v6 = vshrl.u32 %v717_v23, 12  ;;  %v783_v31 = vshrl.u32 %v719_v37, 12 }
 0x17f   : > { %v1033_v7 = vxor.u32 %v969_v63, %v905_v10  ;;  %v1035_v42 = vxor.u32 %v971_v60, %v907_v27  ;;  %v912_v29 = vmul.u32 695872825, %v848_v32  ;;  %v974_v61 = vshrl.u32 %v910_v24, 15  ;;  %v387_v63 = vld [vmem:[%s3983_s13 + $0x1c8] sm:$0xff] }
 0x180   : > { %vm1098_vm12 = vcmp.ge.u32.totalorder %v1034_v8, 644245094  ;;  %vm1100_vm13 = vcmp.ge.u32.totalorder %v1036_v18, 644245094  ;;  %v845_v33 = vxor.u32 %v781_v6, %v717_v23  ;;  %v847_v53 = vxor.u32 %v783_v31, %v719_v37  ;;  %v384_v23 = vld [vmem:[%s3983_s13 + $0x1b0] sm:$0xff] }
 0x181   : > { %2646 = vmatprep.mubr.msk.f32.mxu0 %vm1098_vm12, %v4449_v0  ;;  %2678 = vmatprep.mubr.msk.f32.mxu1 %vm1100_vm13, %v4454_v25  ;;  %vm1097_vm14 = vcmp.ge.u32.totalorder %v1033_v7, 644245094  ;;  %vm1099_vm15 = vcmp.ge.u32.totalorder %v1035_v42, 644245094  ;;  %v976_v47 = vshrl.u32 %v912_v29, 15  ;;  %v658_v27 = vxor.u32 %v594_v3, %v530_v38  ;;  %v385_v3 = vld [vmem:[%s3983_s13 + $0x1b8] sm:$0xff] }
 0x182   : > { %2647 = vmatmul.mubr.msk.f32.gmra.mrb[22].mxu0 %vm1097_vm14, %v4456_v50  ;;  %2679 = vmatmul.mubr.msk.f32.gmra.mrb[22].mxu1 %vm1099_vm15, %v4460_v28  ;;  %v909_v21 = vmul.u32 695872825, %v845_v33  ;;  %v911_v55 = vmul.u32 695872825, %v847_v53  ;;  %v660_v10 = vxor.u32 %v596_v15, %v532_v35  ;;  %v1038_v20 = vxor.u32 %v974_v61, %v910_v24 }
 0x183   : > { %v1040_v1 = vxor.u32 %v976_v47, %v912_v29  ;;  %v531_v0 = vadd.s32 %v4080_v12, %v4484_v54  ;;  %v722_v26 = vmul.u32 739982445, %v658_v27  ;;  %v593_v50 = vshrl.u32 %v529_v59, 15  ;;  %v383_v54 = vld [vmem:[%s3983_s13 + $0x1a8] sm:$0xff] }
 0x184   : > { %v973_v25 = vshrl.u32 %v909_v21, 15  ;;  %v975_v2 = vshrl.u32 %v911_v55, 15  ;;  %v724_v11 = vmul.u32 739982445, %v660_v10  ;;  %vm1102_vm0 = vcmp.ge.u32.totalorder %v1038_v20, 644245094 }
 0x185   : > { %vm1104_vm1 = vcmp.ge.u32.totalorder %v1040_v1, 644245094  ;;  %v595_v28 = vshrl.u32 %v531_v0, 15  ;;  %2648 = vmatprep.mubr.msk.f32.mxu0 %vm1102_vm0, %v4462_v51  ;;  %v786_v40 = vshrl.u32 %v722_v26, 12  ;;  %v657_v44 = vxor.u32 %v593_v50, %v529_v59  ;;  %v382_v51 = vld [vmem:[%s3983_s13 + $0x1a0] sm:$0xff]  ;;  %v389_v20 = vld [vmem:[%s3983_s13 + $0x1d8] sm:$0xff] }
 0x186   : > { %2680 = vmatprep.mubr.msk.f32.mxu1 %vm1104_vm1, %v4464_v34  ;;  %v1037_v38 = vxor.u32 %v973_v25, %v909_v21  ;;  %v1039_v35 = vxor.u32 %v975_v2, %v911_v55  ;;  %v788_v39 = vshrl.u32 %v724_v11, 12  ;;  %v427_v14 = vadd.s32 %v4018_v5, %v4487_v13 }
 0x187   : > { %v659_v58 = vxor.u32 %v595_v28, %v531_v0  ;;  %v850_v19 = vxor.u32 %v786_v40, %v722_v26  ;;  %v721_v34 = vmul.u32 739982445, %v657_v44  ;;  %v1170_v36 = vmul.f32 1.1764706, %v383_v54  ;;  %v386_v26 = vld [vmem:[%s3983_s13 + $0x1c0] sm:$0xff] }
 0x188   : > { %vm1101_vm2 = vcmp.ge.u32.totalorder %v1037_v38, 644245094  ;;  %vm1103_vm3 = vcmp.ge.u32.totalorder %v1039_v35, 644245094  ;;  %v852_v15 = vxor.u32 %v788_v39, %v724_v11  ;;  %v1172_v8 = vmul.f32 1.1764706, %v385_v3 }
 0x189   : > { %2649 = vmatmul.mubr.msk.f32.gmra.mrb[24].mxu0 %vm1101_vm2, %v4474_v4  ;;  %2681 = vmatmul.mubr.msk.f32.gmra.mrb[24].mxu1 %vm1103_vm3, %v4480_v48  ;;  %v723_v37 = vmul.u32 739982445, %v659_v58  ;;  %v914_v60 = vmul.u32 695872825, %v850_v19  ;;  %v785_v18 = vshrl.u32 %v721_v34, 12  ;;  %v411_v4 = vadd.s32 120, %v4027_v16 }
 0x18a   : > { %v916_v32 = vmul.u32 695872825, %v852_v15  ;;  %v4516_v6 = vmul.u32 2654435761, %v427_v14  ;;  %v1169_v42 = vmul.f32 1.1764706, %v382_v51 }
 0x18b   : > { %v787_v13 = vshrl.u32 %v723_v37, 12  ;;  %v978_v31 = vshrl.u32 %v914_v60, 15  ;;  %v849_v24 = vxor.u32 %v785_v18, %v721_v34  ;;  %v1171_v29 = vmul.f32 1.1764706, %v384_v23 }
 0x18c   : > { %v980_v7 = vshrl.u32 %v916_v32, 15  ;;  %v471_v33 = vadd.s32 %v4034_v22, %v4516_v6  ;;  %v4521_v47 = vmul.f32 1.1764706, %v387_v63  ;;  %v428_v21 = vadd.s32 %v4018_v5, %v411_v4 }
 0x18d   : > { %v851_v48 = vxor.u32 %v787_v13, %v723_v37  ;;  %v1042_v53 = vxor.u32 %v978_v31, %v914_v60  ;;  %v913_v55 = vmul.u32 695872825, %v849_v24  ;;  %v4530_v11 = vmul.f32 1.1764706, %v389_v20  ;;  %v388_v31 = vld [vmem:[%s3983_s13 + $0x1d0] sm:$0xff] }
 0x18e   : > { %v1044_v61 = vxor.u32 %v980_v7, %v916_v32  ;;  %v534_v10 = vadd.s32 %v4063_v56, %v471_v33  ;;  %v536_v16 = vadd.s32 %v4068_v62, %v471_v33  ;;  %v533_v1 = vadd.s32 %v4056_v49, %v471_v33 }
 0x18f   : > { %v915_v27 = vmul.u32 695872825, %v851_v48  ;;  %vm1106_vm4 = vcmp.ge.u32.totalorder %v1042_v53, 644245094  ;;  %v535_v59 = vadd.s32 %v4080_v12, %v471_v33  ;;  %v977_v0 = vshrl.u32 %v913_v55, 15 }
 0x190   : > { %vm1108_vm5 = vcmp.ge.u32.totalorder %v1044_v61, 644245094  ;;  %2650 = vmatprep.mubr.msk.f32.mxu0 %vm1106_vm4, %v1170_v36  ;;  %v598_v2 = vshrl.u32 %v534_v10, 15  ;;  %v600_v5 = vshrl.u32 %v536_v16, 15  ;;  %v597_v50 = vshrl.u32 %v533_v1, 15 }
 0x191   : > { %2682 = vmatprep.mubr.msk.f32.mxu1 %vm1108_vm5, %v1172_v8  ;;  %v979_v25 = vshrl.u32 %v915_v27, 15  ;;  %v599_v28 = vshrl.u32 %v535_v59, 15  ;;  %v4532_v38 = vmul.u32 2654435761, %v428_v21  ;;  %v1041_v35 = vxor.u32 %v977_v0, %v913_v55 }
 0x192   : > { %v662_v39 = vxor.u32 %v598_v2, %v534_v10  ;;  %v664_v54 = vxor.u32 %v600_v5, %v536_v16  ;;  %v661_v44 = vxor.u32 %v597_v50, %v533_v1  ;;  %v1173_v58 = vmul.f32 1.1764706, %v386_v26 }
 0x193   : > { %v1043_v40 = vxor.u32 %v979_v25, %v915_v27  ;;  %v663_v14 = vxor.u32 %v599_v28, %v535_v59  ;;  %v472_v19 = vadd.s32 %v4034_v22, %v4532_v38  ;;  %vm1105_vm6 = vcmp.ge.u32.totalorder %v1041_v35, 644245094 }
 0x194   : > { %v726_v3 = vmul.u32 739982445, %v662_v39  ;;  %2651 = vmatmul.mubr.msk.f32.gmra.mrb[26].mxu0 %vm1105_vm6, %v1169_v42  ;;  %v728_v15 = vmul.u32 739982445, %v664_v54 }
 0x195   : > { %vm1107_vm7 = vcmp.ge.u32.totalorder %v1043_v40, 644245094  ;;  %v725_v51 = vmul.u32 739982445, %v661_v44  ;;  %v538_v34 = vadd.s32 %v4063_v56, %v472_v19  ;;  %v540_v23 = vadd.s32 %v4068_v62, %v472_v19 }
 0x196   : > { %2683 = vmatmul.mubr.msk.f32.gmra.mrb[26].mxu1 %vm1107_vm7, %v1171_v29  ;;  %v790_v37 = vshrl.u32 %v726_v3, 12  ;;  %v727_v63 = vmul.u32 739982445, %v663_v14  ;;  %v537_v60 = vadd.s32 %v4056_v49, %v472_v19  ;;  %v539_v36 = vadd.s32 %v4080_v12, %v472_v19  ;;  %v391_v19 = vld [vmem:[%s3983_s13 + $0x1e8] sm:$0xff] }
 0x197   : > { %v792_v32 = vshrl.u32 %v728_v15, 12  ;;  %v789_v22 = vshrl.u32 %v725_v51, 12  ;;  %v602_v8 = vshrl.u32 %v538_v34, 15  ;;  %v604_v18 = vshrl.u32 %v540_v23, 15 }
 0x198   : > { %v854_v13 = vxor.u32 %v790_v37, %v726_v3  ;;  %v791_v7 = vshrl.u32 %v727_v63, 12  ;;  %v601_v42 = vshrl.u32 %v537_v60, 15  ;;  %v603_v4 = vshrl.u32 %v539_v36, 15 }
 0x199   : > { %v856_v24 = vxor.u32 %v792_v32, %v728_v15  ;;  %v853_v48 = vxor.u32 %v789_v22, %v725_v51  ;;  %v666_v56 = vxor.u32 %v602_v8, %v538_v34  ;;  %v668_v29 = vxor.u32 %v604_v18, %v540_v23  ;;  %v393_v51 = vld [vmem:[%s3983_s13 + $0x1f8] sm:$0xff]  ;;  %v390_v23 = vld [vmem:[%s3983_s13 + $0x1e0] sm:$0xff] }
 0x19a   : > { %v918_v62 = vmul.u32 695872825, %v854_v13  ;;  %v855_v33 = vxor.u32 %v791_v7, %v727_v63  ;;  %v665_v53 = vxor.u32 %v601_v42, %v537_v60  ;;  %v667_v61 = vxor.u32 %v603_v4, %v539_v36  ;;  %v392_v60 = vld [vmem:[%s3983_s13 + $0x1f0] sm:$0xff] }
 0x19b   : > { %v920_v49 = vmul.u32 695872825, %v856_v24  ;;  %v917_v21 = vmul.u32 695872825, %v853_v48  ;;  %v1175_v12 = vmul.f32 1.1764706, %v388_v31 }
 0x19c   : > { %v982_v55 = vshrl.u32 %v918_v62, 15  ;;  %v919_v27 = vmul.u32 695872825, %v855_v33  ;;  %v730_v10 = vmul.u32 739982445, %v666_v56  ;;  %v1245_v33 = vld [vmem:[#allocation2] sm:$0xff] }
 0x19d   : > { %v984_v20 = vshrl.u32 %v920_v49, 15  ;;  %v981_v16 = vshrl.u32 %v917_v21, 15  ;;  %v732_v1 = vmul.u32 739982445, %v668_v29  ;;  %v729_v59 = vmul.u32 739982445, %v665_v53 }
 0x19e   : > { %v1046_v0 = vxor.u32 %v982_v55, %v918_v62  ;;  %v983_v25 = vshrl.u32 %v919_v27, 15  ;;  %v794_v2 = vshrl.u32 %v730_v10, 12  ;;  %v731_v5 = vmul.u32 739982445, %v667_v61 }
 0x19f   : > { %v1048_v26 = vxor.u32 %v984_v20, %v920_v49  ;;  %v1045_v50 = vxor.u32 %v981_v16, %v917_v21  ;;  %v796_v28 = vshrl.u32 %v732_v1, 12  ;;  %v793_v35 = vshrl.u32 %v729_v59, 12  ;;  %v1246_v20 = vld [vmem:[#allocation2 + $0x8] sm:$0xff] }
 0x1a0   : > { %vm1110_vm8 = vcmp.ge.u32.totalorder %v1046_v0, 644245094  ;;  %v1047_v40 = vxor.u32 %v983_v25, %v919_v27  ;;  %v858_v39 = vxor.u32 %v794_v2, %v730_v10  ;;  %v795_v54 = vshrl.u32 %v731_v5, 12 }
 0x1a1   : > { %2652 = vmatprep.mubr.msk.f32.mxu0 %vm1110_vm8, %v4521_v47  ;;  %vm1112_vm9 = vcmp.ge.u32.totalorder %v1048_v26, 644245094  ;;  %vm1109_vm10 = vcmp.ge.u32.totalorder %v1045_v50, 644245094  ;;  %v860_v44 = vxor.u32 %v796_v28, %v732_v1  ;;  %v857_v14 = vxor.u32 %v793_v35, %v729_v59  ;;  %v1247_v50 = vld [vmem:[#allocation2 + $0x10] sm:$0xff] }
 0x1a2   : > { %2684 = vmatprep.mubr.msk.f32.mxu1 %vm1112_vm9, %v4530_v11  ;;  %2653 = vmatmul.mubr.msk.f32.gmra.mrb[28].mxu0 %vm1109_vm10, %v1173_v58  ;;  %vm1111_vm11 = vcmp.ge.u32.totalorder %v1047_v40, 644245094  ;;  %v922_v3 = vmul.u32 695872825, %v858_v39  ;;  %v859_v15 = vxor.u32 %v795_v54, %v731_v5  ;;  %v1178_v36 = vmul.f32 1.1764706, %v391_v19 }
 0x1a3   : > { %2685 = vmatmul.mubr.msk.f32.gmra.mrb[28].mxu1 %vm1111_vm11, %v1175_v12  ;;  %v924_v34 = vmul.u32 695872825, %v860_v44  ;;  %v921_v37 = vmul.u32 695872825, %v857_v14  ;;  %v1180_v18 = vmul.f32 1.1764706, %v393_v51 }
 0x1a4   : > { %v986_v63 = vshrl.u32 %v922_v3, 15  ;;  %v923_v47 = vmul.u32 695872825, %v859_v15  ;;  %v1177_v13 = vmul.f32 1.1764706, %v390_v23 }
 0x1a5   : > { %v988_v32 = vshrl.u32 %v924_v34, 15  ;;  %v985_v22 = vshrl.u32 %v921_v37, 15  ;;  %v1179_v7 = vmul.f32 1.1764706, %v392_v60 }
 0x1a6   : > { %v1050_v8 = vxor.u32 %v986_v63, %v922_v3  ;;  %v987_v11 = vshrl.u32 %v923_v47, 15  ;;  %v1248_v3 = vld [vmem:[#allocation2 + $0x18] sm:$0xff] }
 0x1a7   : > { %v1052_v58 = vxor.u32 %v988_v32, %v924_v34  ;;  %v1049_v31 = vxor.u32 %v985_v22, %v921_v37 }
 0x1a8   : > { %vm1114_vm12 = vcmp.ge.u32.totalorder %v1050_v8, 644245094  ;;  %v1051_v42 = vxor.u32 %v987_v11, %v923_v47 }
 0x1a9   : > { %2654 = vmatprep.mubr.msk.f32.mxu0 %vm1114_vm12, %v1178_v36  ;;  %vm1116_vm13 = vcmp.ge.u32.totalorder %v1052_v58, 644245094  ;;  %vm1113_vm14 = vcmp.ge.u32.totalorder %v1049_v31, 644245094  ;;  %v1249_v36 = vld [vmem:[#allocation2 + $0x20] sm:$0xff] }
 0x1aa   : > { %2686 = vmatprep.mubr.msk.f32.mxu1 %vm1116_vm13, %v1180_v18  ;;  %2655 = vmatmul.mubr.msk.f32.gmra.mrb[30].mxu0 %vm1113_vm14, %v1177_v13  ;;  %vm1115_vm15 = vcmp.ge.u32.totalorder %v1051_v42, 644245094 }
 0x1ab   : > { %2687 = vmatmul.mubr.msk.f32.gmra.mrb[30].mxu1 %vm1115_vm15, %v1179_v7  ;;  %v1250_v7 = vld [vmem:[#allocation2 + $0x28] sm:$0xff] }
 0x1cb   : > { %v2761_v4 = vpop.f32.mrb[0].mxu0 }
 0x1cc   : > { %v2841_v24 = vpop.f32.mrb[0].mxu1  ;;  %v2762_v48 = vpop.f32.mrb[1].mxu0 }
 0x1cd   : > { %v2763_v56 = vadd.f32 %v2762_v48, %v2761_v4  ;;  %v2842_v29 = vpop.f32.mrb[1].mxu1 }
 0x1ce   : > { %v2843_v62 = vadd.f32 %v2842_v29, %v2841_v24 }
 0x1d0   : > { %v1537_v53 = vadd.f32 %v2843_v62, %v2763_v56 }
 0x1d2   : > { %v1615_v61 = vadd.f32 %v1537_v53, %v1245_v33  ;;  %v1251_v53 = vld [vmem:[#allocation2 + $0x30] sm:$0xff] }
 0x1d4   : > { %1631 = vst [vmem:[#allocation2] sm:$0xff] %v1615_v61 }
 0x1d5   : > { %v2764_v49 = vpop.f32.mrb[2].mxu0 }
 0x1d6   : > { %v2765_v21 = vpop.f32.mrb[3].mxu0 }
 0x1d7   : > { %v2766_v12 = vadd.f32 %v2765_v21, %v2764_v49 }
 0x1d9   : > { %v2844_v55 = vpop.f32.mrb[2].mxu1 }
 0x1da   : > { %v2845_v27 = vpop.f32.mrb[3].mxu1 }
 0x1db   : > { %v2846_v10 = vadd.f32 %v2845_v27, %v2844_v55 }
 0x1dd   : > { %v1542_v16 = vadd.f32 %v2846_v10, %v2766_v12 }
 0x1df   : > { %v1616_v1 = vadd.f32 %v1542_v16, %v1246_v20  ;;  %v1252_v16 = vld [vmem:[#allocation2 + $0x38] sm:$0xff] }
 0x1e1   : > { %1632 = vst [vmem:[#allocation2 + $0x8] sm:$0xff] %v1616_v1  ;;  %v2767_v59 = vpop.f32.mrb[4].mxu0 }
 0x1e2   : > { %v2847_v0 = vpop.f32.mrb[4].mxu1  ;;  %v2768_v25 = vpop.f32.mrb[5].mxu0 }
 0x1e3   : > { %v2769_v2 = vadd.f32 %v2768_v25, %v2767_v59  ;;  %v2848_v5 = vpop.f32.mrb[5].mxu1 }
 0x1e4   : > { %v2849_v26 = vadd.f32 %v2848_v5, %v2847_v0 }
 0x1e6   : > { %v1547_v28 = vadd.f32 %v2849_v26, %v2769_v2 }
 0x1e8   : > { %v1617_v35 = vadd.f32 %v1547_v28, %v1247_v50  ;;  %v1253_v28 = vld [vmem:[#allocation2 + $0x40] sm:$0xff] }
 0x1e9   : > { %v2770_v40 = vpop.f32.mrb[6].mxu0 }
 0x1ea   : > { %1633 = vst [vmem:[#allocation2 + $0x10] sm:$0xff] %v1617_v35  ;;  %v2771_v39 = vpop.f32.mrb[7].mxu0 }
 0x1eb   : > { %v2772_v54 = vadd.f32 %v2771_v39, %v2770_v40 }
 0x1ee   : > { %v2850_v44 = vpop.f32.mrb[6].mxu1 }
 0x1ef   : > { %v2851_v14 = vpop.f32.mrb[7].mxu1 }
 0x1f0   : > { %v2852_v19 = vadd.f32 %v2851_v14, %v2850_v44 }
 0x1f2   : > { %v1552_v15 = vadd.f32 %v2852_v19, %v2772_v54 }
 0x1f4   : > { %v1618_v51 = vadd.f32 %v1552_v15, %v1248_v3  ;;  %v1254_v15 = vld [vmem:[#allocation2 + $0x48] sm:$0xff] }
 0x1f6   : > { %1634 = vst [vmem:[#allocation2 + $0x18] sm:$0xff] %v1618_v51 }
 0x1fe   : > { %v2773_v34 = vpop.f32.mrb[8].mxu0  ;;  %v2853_v23 = vpop.f32.mrb[8].mxu1 }
 0x1ff   : > { %v2774_v37 = vpop.f32.mrb[9].mxu0  ;;  %v2854_v63 = vpop.f32.mrb[9].mxu1 }
 0x200   : > { %v2775_v60 = vadd.f32 %v2774_v37, %v2773_v34  ;;  %v2855_v47 = vadd.f32 %v2854_v63, %v2853_v23 }
 0x202   : > { %v1557_v32 = vadd.f32 %v2855_v47, %v2775_v60  ;;  %v2776_v22 = vpop.f32.mrb[10].mxu0 }
 0x203   : > { %v2777_v8 = vpop.f32.mrb[11].mxu0 }
 0x204   : > { %v1619_v18 = vadd.f32 %v1557_v32, %v1249_v36  ;;  %v2778_v13 = vadd.f32 %v2777_v8, %v2776_v22  ;;  %v1255_v32 = vld [vmem:[#allocation2 + $0x50] sm:$0xff] }
 0x206   : > { %1635 = vst [vmem:[#allocation2 + $0x20] sm:$0xff] %v1619_v18  ;;  %v2856_v11 = vpop.f32.mrb[10].mxu1 }
 0x207   : > { %v2857_v58 = vpop.f32.mrb[11].mxu1 }
 0x208   : > { %v2858_v31 = vadd.f32 %v2857_v58, %v2856_v11 }
 0x20a   : > { %v1562_v42 = vadd.f32 %v2858_v31, %v2778_v13 }
 0x20c   : > { %v1620_v4 = vadd.f32 %v1562_v42, %v1250_v7  ;;  %v1256_v42 = vld [vmem:[#allocation2 + $0x58] sm:$0xff] }
 0x20e   : > { %1636 = vst [vmem:[#allocation2 + $0x28] sm:$0xff] %v1620_v4 }
 0x216   : > { %v2779_v24 = vpop.f32.mrb[12].mxu0  ;;  %v2859_v48 = vpop.f32.mrb[12].mxu1 }
 0x217   : > { %v2780_v56 = vpop.f32.mrb[13].mxu0  ;;  %v2860_v29 = vpop.f32.mrb[13].mxu1 }
 0x218   : > { %v2781_v62 = vadd.f32 %v2780_v56, %v2779_v24  ;;  %v2861_v33 = vadd.f32 %v2860_v29, %v2859_v48 }
 0x21a   : > { %v1567_v61 = vadd.f32 %v2861_v33, %v2781_v62 }
 0x21c   : > { %v1621_v49 = vadd.f32 %v1567_v61, %v1251_v53  ;;  %v1257_v61 = vld [vmem:[#allocation2 + $0x60] sm:$0xff] }
 0x21e   : > { %1637 = vst [vmem:[#allocation2 + $0x30] sm:$0xff] %v1621_v49  ;;  %v2782_v21 = vpop.f32.mrb[14].mxu0  ;;  %v2862_v12 = vpop.f32.mrb[14].mxu1 }
 0x21f   : > { %v2783_v55 = vpop.f32.mrb[15].mxu0  ;;  %v2863_v27 = vpop.f32.mrb[15].mxu1 }
 0x220   : > { %v2784_v10 = vadd.f32 %v2783_v55, %v2782_v21  ;;  %v2864_v20 = vadd.f32 %v2863_v27, %v2862_v12 }
 0x222   : > { %v1572_v1 = vadd.f32 %v2864_v20, %v2784_v10 }
 0x224   : > { %v1622_v59 = vadd.f32 %v1572_v1, %v1252_v16  ;;  %v1258_v1 = vld [vmem:[#allocation2 + $0x68] sm:$0xff] }
 0x226   : > { %1638 = vst [vmem:[#allocation2 + $0x38] sm:$0xff] %v1622_v59 }
 0x22a   : > { %v2785_v0 = vpop.f32.mrb[16].mxu0 }
 0x22b   : > { %v2865_v25 = vpop.f32.mrb[16].mxu1  ;;  %v2786_v2 = vpop.f32.mrb[17].mxu0 }
 0x22c   : > { %v2787_v5 = vadd.f32 %v2786_v2, %v2785_v0  ;;  %v2866_v26 = vpop.f32.mrb[17].mxu1 }
 0x22d   : > { %v2867_v50 = vadd.f32 %v2866_v26, %v2865_v25 }
 0x22f   : > { %v1577_v35 = vadd.f32 %v2867_v50, %v2787_v5 }
 0x231   : > { %v1623_v40 = vadd.f32 %v1577_v35, %v1253_v28  ;;  %v1259_v35 = vld [vmem:[#allocation2 + $0x70] sm:$0xff] }
 0x233   : > { %1639 = vst [vmem:[#allocation2 + $0x40] sm:$0xff] %v1623_v40 }
 0x23b   : > { %v2788_v39 = vpop.f32.mrb[18].mxu0  ;;  %v2868_v54 = vpop.f32.mrb[18].mxu1 }
 0x23c   : > { %v2789_v44 = vpop.f32.mrb[19].mxu0  ;;  %v2869_v14 = vpop.f32.mrb[19].mxu1 }
 0x23d   : > { %v2790_v19 = vadd.f32 %v2789_v44, %v2788_v39  ;;  %v2870_v3 = vadd.f32 %v2869_v14, %v2868_v54 }
 0x23f   : > { %v1582_v51 = vadd.f32 %v2870_v3, %v2790_v19  ;;  %v2791_v34 = vpop.f32.mrb[20].mxu0  ;;  %v2871_v23 = vpop.f32.mrb[20].mxu1 }
 0x240   : > { %v2792_v37 = vpop.f32.mrb[21].mxu0  ;;  %v2872_v63 = vpop.f32.mrb[21].mxu1 }
 0x241   : > { %v1624_v60 = vadd.f32 %v1582_v51, %v1254_v15  ;;  %v2793_v47 = vadd.f32 %v2792_v37, %v2791_v34  ;;  %v2873_v36 = vadd.f32 %v2872_v63, %v2871_v23  ;;  %v1260_v51 = vld [vmem:[#allocation2 + $0x78] sm:$0xff]  ;;  %v1894_v37 = vld [vmem:[#allocation10] sm:$0xff] (!%p2688_p10)  ;;  %v1895_v63 = vld [vmem:[#allocation10 + $0x8] sm:$0xff] (!%p2688_p10) }
 0x243   : > { %1640 = vst [vmem:[#allocation2 + $0x48] sm:$0xff] %v1624_v60  ;;  %v1587_v22 = vadd.f32 %v2873_v36, %v2793_v47  ;;  %v1896_v60 = vld [vmem:[#allocation10 + $0x10] sm:$0xff] (!%p2688_p10)  ;;  %v3129_v47 = vpack.c.bf16 (!%p2688_p10), %v1895_v63, %v1894_v37  ;;  %v1897_v36 = vld [vmem:[#allocation10 + $0x18] sm:$0xff] (!%p2688_p10) }
 0x245   : > { %v1625_v8 = vadd.f32 %v1587_v22, %v1255_v32  ;;  %v4549_v32 = vstv (!%p2688_p10), %s1683_s1  ;;  %v4552_v22 = vmul.u32 (!%p2688_p10), 2246822519, %v4029_v17  ;;  %3130 = vmatprep.subr.bf16.mxu0 (!%p2688_p10), %v3129_v47 }
 0x246   : > { %v1689_v17 = vadd.s32 (!%p2688_p10), %v4549_v32, %v4271_v52  ;;  %3132 = vmatpush3.bf16.msra.mxu0 (!%p2688_p10), %v3129_v47  ;;  %v1690_v37 = vadd.s32 (!%p2688_p10), %v4549_v32, %v4278_v57 }
 0x247   : > { %1641 = vst [vmem:[#allocation2 + $0x50] sm:$0xff] %v1625_v8  ;;  %v3133_v8 = vpack.c.bf16 (!%p2688_p10), %v1897_v36, %v1896_v60 }
 0x249   : > { %3134 = vmatprep.subr.bf16.mxu0 (!%p2688_p10), %v3133_v8 }
 0x24a   : > { %3136 = vmatpush3.bf16.msra.mxu0 (!%p2688_p10), %v3133_v8 }
 0x255   : > { %v2794_v18 = vpop.f32.mrb[22].mxu0  ;;  %v2874_v13 = vpop.f32.mrb[22].mxu1 }
 0x256   : > { %v2795_v11 = vpop.f32.mrb[23].mxu0  ;;  %v2875_v58 = vpop.f32.mrb[23].mxu1 }
 0x257   : > { %v2796_v31 = vadd.f32 %v2795_v11, %v2794_v18  ;;  %v2876_v7 = vadd.f32 %v2875_v58, %v2874_v13  ;;  %v1898_v18 = vld [vmem:[#allocation10 + $0x20] sm:$0xff] (!%p2688_p10)  ;;  %v1899_v13 = vld [vmem:[#allocation10 + $0x28] sm:$0xff] (!%p2688_p10)  ;;  %v1685_v11 = vadd.s32 (!%p2688_p10), %v4549_v32, %v4051_v43  ;;  %v1686_v58 = vadd.s32 (!%p2688_p10), %v4549_v32, %v4092_v30 }
 0x259   : > { %v1592_v4 = vadd.f32 %v2876_v7, %v2796_v31  ;;  %v1900_v31 = vld [vmem:[#allocation10 + $0x30] sm:$0xff] (!%p2688_p10)  ;;  %v1687_v7 = vadd.s32 (!%p2688_p10), %v4549_v32, %v4217_v45 }
 0x25b   : > { %v1626_v24 = vadd.f32 %v1592_v4, %v1256_v42  ;;  %v1688_v42 = vadd.s32 (!%p2688_p10), %v4549_v32, %v4235_v9  ;;  %v1901_v4 = vld [vmem:[#allocation10 + $0x38] sm:$0xff] (!%p2688_p10) }
 0x25c   : > { %v2797_v48 = vpop.f32.mrb[24].mxu0  ;;  %v2877_v56 = vpop.f32.mrb[24].mxu1 }
 0x25d   : > { %1642 = vst [vmem:[#allocation2 + $0x58] sm:$0xff] %v1626_v24  ;;  %v2798_v29 = vpop.f32.mrb[25].mxu0  ;;  %v2878_v62 = vpop.f32.mrb[25].mxu1  ;;  %v1902_v24 = vld [vmem:[#allocation10 + $0x40] sm:$0xff] (!%p2688_p10) }
 0x25e   : > { %v2799_v33 = vadd.f32 %v2798_v29, %v2797_v48  ;;  %v2879_v53 = vadd.f32 %v2878_v62, %v2877_v56  ;;  %v1903_v48 = vld [vmem:[#allocation10 + $0x48] sm:$0xff] (!%p2688_p10)  ;;  %v1702_v56 = vadd.s32 (!%p2688_p10), %v4552_v22, %v1685_v11  ;;  %v1703_v29 = vadd.s32 (!%p2688_p10), %v4552_v22, %v1686_v58 }
 0x25f   : > { %v3137_v62 = vpack.c.bf16 (!%p2688_p10), %v1899_v13, %v1898_v18  ;;  %v1707_v11 = vadd.s32 (!%p2688_p10), %v4552_v22, %v1690_v37 }
 0x260   : > { %v1597_v49 = vadd.f32 %v2879_v53, %v2799_v33  ;;  %v1904_v33 = vld [vmem:[#allocation10 + $0x50] sm:$0xff] (!%p2688_p10)  ;;  %v1905_v53 = vld [vmem:[#allocation10 + $0x58] sm:$0xff] (!%p2688_p10) }
 0x261   : > { %3138 = vmatprep.subr.bf16.mxu0 (!%p2688_p10), %v3137_v62 }
 0x262   : > { %v1627_v21 = vadd.f32 %v1597_v49, %v1257_v61  ;;  %v1906_v61 = vld [vmem:[#allocation10 + $0x60] sm:$0xff] (!%p2688_p10)  ;;  %v1704_v49 = vadd.s32 (!%p2688_p10), %v4552_v22, %v1687_v7  ;;  %3140 = vmatpush3.bf16.msra.mxu0 (!%p2688_p10), %v3137_v62 }
 0x264   : > { %1643 = vst [vmem:[#allocation2 + $0x60] sm:$0xff] %v1627_v21  ;;  %v1705_v21 = vadd.s32 (!%p2688_p10), %v4552_v22, %v1688_v42 }
 0x267   : > { %v2800_v12 = vpop.f32.mrb[26].mxu0 }
 0x268   : > { %v2801_v27 = vpop.f32.mrb[27].mxu0 }
 0x269   : > { %v2880_v55 = vpop.f32.mrb[26].mxu1  ;;  %v2802_v20 = vadd.f32 %v2801_v27, %v2800_v12  ;;  %v1907_v12 = vld [vmem:[#allocation10 + $0x68] sm:$0xff] (!%p2688_p10)  ;;  %v1909_v27 = vld [vmem:[#allocation10 + $0x78] sm:$0xff] (!%p2688_p10) }
 0x26a   : > { %v2881_v10 = vpop.f32.mrb[27].mxu1 }
 0x26b   : > { %v2882_v16 = vadd.f32 %v2881_v10, %v2880_v55  ;;  %v1908_v55 = vld [vmem:[#allocation10 + $0x70] sm:$0xff] (!%p2688_p10)  ;;  %v1718_v10 = vshrl.u32 (!%p2688_p10), %v1702_v56, 15 }
 0x26d   : > { %v1602_v59 = vadd.f32 %v2882_v16, %v2802_v20  ;;  %v1706_v20 = vadd.s32 (!%p2688_p10), %v4552_v22, %v1689_v17  ;;  %v3141_v16 = vpack.c.bf16 (!%p2688_p10), %v1901_v4, %v1900_v31 }
 0x26f   : > { %v1628_v0 = vadd.f32 %v1602_v59, %v1258_v1  ;;  %v1651_v1 = vld [vmem:[#allocation2] sm:$0xff] (!%p2688_p10)  ;;  %v1719_v59 = vshrl.u32 (!%p2688_p10), %v1703_v29, 15  ;;  %3142 = vmatprep.subr.bf16.mxu0 (!%p2688_p10), %v3141_v16 }
 0x270   : > { %3144 = vmatpush3.bf16.msra.mxu0 (!%p2688_p10), %v3141_v16 }
 0x271   : > { %1644 = vst [vmem:[#allocation2 + $0x68] sm:$0xff] %v1628_v0  ;;  %v1720_v0 = vshrl.u32 (!%p2688_p10), %v1704_v49, 15 }
 0x275   : > { %v2803_v25 = vpop.f32.mrb[28].mxu0 }
 0x276   : > { %v2883_v2 = vpop.f32.mrb[28].mxu1  ;;  %v2804_v5 = vpop.f32.mrb[29].mxu0 }
 0x277   : > { %v2805_v26 = vadd.f32 %v2804_v5, %v2803_v25  ;;  %v2884_v50 = vpop.f32.mrb[29].mxu1  ;;  %v3145_v25 = vpack.c.bf16 (!%p2688_p10), %v1903_v48, %v1902_v24  ;;  %v1734_v5 = vxor.u32 (!%p2688_p10), %v1718_v10, %v1702_v56  ;;  %v1655_v24 = vld [vmem:[#allocation2 + $0x20] sm:$0xff] (!%p2688_p10)  ;;  %v1723_v48 = vshrl.u32 (!%p2688_p10), %v1707_v11, 15 }
 0x278   : > { %v2885_v28 = vadd.f32 %v2884_v50, %v2883_v2  ;;  %v4569_v2 = vpack.c.bf16 (!%p2688_p10), %v1905_v53, %v1904_v33  ;;  %v1721_v50 = vshrl.u32 (!%p2688_p10), %v1705_v21, 15  ;;  %v1691_v56 = vadd.s32 (!%p2688_p10), %v4549_v32, %v4314_v46 }
 0x279   : > { %3146 = vmatprep.subr.bf16.mxu0 (!%p2688_p10), %v3145_v25 }
 0x27a   : > { %v1607_v40 = vadd.f32 %v2885_v28, %v2805_v26  ;;  %v1652_v26 = vld [vmem:[#allocation2 + $0x8] sm:$0xff] (!%p2688_p10)  ;;  %v4571_v28 = vpack.c.bf16 (!%p2688_p10), %v1907_v12, %v1906_v61  ;;  %v1739_v12 = vxor.u32 (!%p2688_p10), %v1723_v48, %v1707_v11  ;;  %3148 = vmatpush3.bf16.msra.mxu0 (!%p2688_p10), %v3145_v25 }
 0x27b   : > { %v1656_v61 = vld [vmem:[#allocation2 + $0x28] sm:$0xff] (!%p2688_p10)  ;;  %3150 = vmatprep.subr.bf16.mxu0 (!%p2688_p10), %v4569_v2 }
 0x27c   : > { %v1629_v39 = vadd.f32 %v1607_v40, %v1259_v35  ;;  %v4573_v35 = vpack.c.bf16 (!%p2688_p10), %v1909_v27, %v1908_v55  ;;  %v1735_v40 = vxor.u32 (!%p2688_p10), %v1719_v59, %v1703_v29  ;;  %v1708_v55 = vadd.s32 (!%p2688_p10), %v4552_v22, %v1691_v56  ;;  %v1657_v59 = vld [vmem:[#allocation2 + $0x30] sm:$0xff] (!%p2688_p10) }
 0x27d   : > { %v2806_v54 = vpop.f32.mrb[30].mxu0  ;;  %v1755_v16 = vmul.u32 (!%p2688_p10), 739982445, %v1739_v12 }
 0x27e   : > { %1645 = vst [vmem:[#allocation2 + $0x70] sm:$0xff] %v1629_v39  ;;  %v2886_v44 = vpop.f32.mrb[30].mxu1  ;;  %v2807_v14 = vpop.f32.mrb[31].mxu0  ;;  %v1653_v39 = vld [vmem:[#allocation2 + $0x10] sm:$0xff] (!%p2688_p10)  ;;  %3152 = vmatpush3.bf16.msra.mxu0 (!%p2688_p10), %v4569_v2 }
 0x27f   : > { %v2808_v19 = vadd.f32 %v2807_v14, %v2806_v54  ;;  %v2887_v3 = vpop.f32.mrb[31].mxu1  ;;  %v1736_v54 = vxor.u32 (!%p2688_p10), %v1720_v0, %v1704_v49  ;;  %v1750_v14 = vmul.u32 (!%p2688_p10), 739982445, %v1734_v5  ;;  %v1669_v60 = vmax.f32 (!%p2688_p10), %v1653_v39, 0.0  ;;  %3154 = vmatprep.subr.bf16.mxu0 (!%p2688_p10), %v4571_v28 }
 0x280   : > { %v2888_v15 = vadd.f32 %v2887_v3, %v2886_v44  ;;  %1650 = sbr.rel (%p2688_p10) target bundleno = 1130 (0x46a), region = 60  ;;  %v1667_v44 = vmax.f32 (!%p2688_p10), %v1651_v1, 0.0  ;;  %v1737_v3 = vxor.u32 (!%p2688_p10), %v1721_v50, %v1705_v21  ;;  %v1672_v5 = vmax.f32 (!%p2688_p10), %v1656_v61, 0.0 }
 0x281   : > { %v1766_v63 = vshrl.u32 (!%p2688_p10), %v1750_v14, 12 }
 0x282   : > { %v1612_v34 = vadd.f32 %v2888_v15, %v2808_v19  ;;  %v1654_v19 = vld [vmem:[#allocation2 + $0x18] sm:$0xff] (!%p2688_p10)  ;;  %v1722_v15 = vshrl.u32 (!%p2688_p10), %v1706_v20, 15  ;;  %v1753_v47 = vmul.u32 (!%p2688_p10), 739982445, %v1737_v3  ;;  %v1862_v31 = vmul.f32 (!%p2688_p10), 1.1764706, %v1667_v44  ;;  %3156 = vmatpush3.bf16.msra.mxu0 (!%p2688_p10), %v4571_v28 }
 0x283   : > { %v1670_v13 = vmax.f32 (!%p2688_p10), %v1654_v19, 0.0  ;;  %v1782_v58 = vxor.u32 (!%p2688_p10), %v1766_v63, %v1750_v14  ;;  %v1771_v14 = vshrl.u32 (!%p2688_p10), %v1755_v16, 12  ;;  %v1673_v19 = vmax.f32 (!%p2688_p10), %v1657_v59, 0.0  ;;  %3158 = vmatprep.subr.bf16.mxu0 (!%p2688_p10), %v4573_v35 }
 0x284   : > { %v1630_v23 = vadd.f32 %v1612_v34, %v1260_v51  ;;  %v1668_v51 = vmax.f32 (!%p2688_p10), %v1652_v26, 0.0  ;;  %v1751_v34 = vmul.u32 (!%p2688_p10), 739982445, %v1735_v40  ;;  %v1738_v36 = vxor.u32 (!%p2688_p10), %v1722_v15, %v1706_v20 }
 0x285   : > { %v1769_v7 = vshrl.u32 (!%p2688_p10), %v1753_v47, 12  ;;  %v1798_v29 = vmul.u32 (!%p2688_p10), 695872825, %v1782_v58  ;;  %v1671_v20 = vmax.f32 (!%p2688_p10), %v1655_v24, 0.0  ;;  %v1724_v26 = vshrl.u32 (!%p2688_p10), %v1708_v55, 15  ;;  %v4915_v24 = vld [vmem:[#allocation29_spill] sm:$0xff] (!%p2688_p10) }
 0x286   : > { %1646 = vst [vmem:[#allocation2 + $0x78] sm:$0xff] %v1630_v23  ;;  %v1752_v23 = vmul.u32 (!%p2688_p10), 739982445, %v1736_v54  ;;  %v1767_v8 = vshrl.u32 (!%p2688_p10), %v1751_v34, 12  ;;  %v1754_v42 = vmul.u32 (!%p2688_p10), 739982445, %v1738_v36  ;;  %v1692_v54 = vadd.s32 (!%p2688_p10), %v4549_v32, %v4346_v41  ;;  %3160 = vmatpush3.bf16.msra.mxu0 (!%p2688_p10), %v4573_v35 }
 0x287   : > { %v4580_v62 = vmul.f32 1.1764706, %v1668_v51  ;;  %v1785_v33 = vxor.u32 %v1769_v7, %v1753_v47  ;;  %v1814_v27 = vshrl.u32 %v1798_v29, 15  ;;  %v1740_v3 = vxor.u32 %v1724_v26, %v1708_v55  ;;  %v1658_v47 = vld [vmem:[#allocation2 + $0x38] sm:$0xff]  ;;  %v4914_v7 = vld [vmem:[#allocation28_spill] sm:$0xff] }
 0x288   : > { %v1768_v18 = vshrl.u32 %v1752_v23, 12  ;;  %v1783_v17 = vxor.u32 %v1767_v8, %v1751_v34  ;;  %v1770_v53 = vshrl.u32 %v1754_v42, 12  ;;  %v4586_v15 = vmul.f32 1.1764706, %v1669_v60 }
 0x289   : > { %v1801_v10 = vmul.u32 695872825, %v1785_v33  ;;  %v1830_v50 = vxor.u32 %v1814_v27, %v1798_v29  ;;  %v1709_v34 = vadd.s32 %v4552_v22, %v1692_v54  ;;  %v1787_v37 = vxor.u32 %v1771_v14, %v1755_v16  ;;  %v1661_v27 = vld [vmem:[#allocation2 + $0x50] sm:$0xff]  ;;  %v4917_v54 = vld [vmem:[#allocation31_spill] sm:$0xff] }
 0x28a   : > { %v1784_v4 = vxor.u32 %v1768_v18, %v1752_v23  ;;  %v1799_v49 = vmul.u32 695872825, %v1783_v17  ;;  %v1786_v1 = vxor.u32 %v1770_v53, %v1754_v42  ;;  %v4589_v23 = vmul.f32 1.1764706, %v1670_v13  ;;  %v1659_v13 = vld [vmem:[#allocation2 + $0x40] sm:$0xff] }
 0x28b   : > { %v1817_v44 = vshrl.u32 %v1801_v10, 15  ;;  %vm1846_vm0 = vcmp.ge.u32.totalorder %v1830_v50, 644245094  ;;  %v1756_v63 = vmul.u32 739982445, %v1740_v3  ;;  %v1725_v11 = vshrl.u32 %v1709_v34, 15 }
 0x28c   : > { %v1800_v21 = vmul.u32 695872825, %v1784_v4  ;;  %v1815_v0 = vshrl.u32 %v1799_v49, 15  ;;  %v1802_v39 = vmul.u32 695872825, %v1786_v1  ;;  %2985 = vmatprep.mubr.msk.f32.mxu0 %vm1846_vm0, %v1862_v31  ;;  %v1693_v42 = vadd.s32 %v4549_v32, %v4914_v7 }
 0x28d   : > { %v4592_v8 = vmul.f32 1.1764706, %v1671_v20  ;;  %v4594_v18 = vmul.f32 1.1764706, %v1672_v5  ;;  %v4597_v60 = vxor.u32 %v1817_v44, %v1801_v10  ;;  %v1772_v58 = vshrl.u32 %v1756_v63, 12  ;;  %v4916_v10 = vld [vmem:[#allocation30_spill] sm:$0xff] }
 0x28e   : > { %v1816_v40 = vshrl.u32 %v1800_v21, 15  ;;  %v1818_v51 = vshrl.u32 %v1802_v39, 15  ;;  %v1831_v25 = vxor.u32 %v1815_v0, %v1799_v49  ;;  %v4599_v31 = vmul.f32 1.1764706, %v1673_v19  ;;  %v1660_v49 = vld [vmem:[#allocation2 + $0x48] sm:$0xff] }
 0x28f   : > { %v1674_v2 = vmax.f32 %v1658_v47, 0.0  ;;  %v1741_v4 = vxor.u32 %v1725_v11, %v1709_v34  ;;  %v1694_v48 = vadd.s32 %v4549_v32, %v4915_v24  ;;  %v1803_v56 = vmul.u32 695872825, %v1787_v37  ;;  %v4918_v47 = vld [vmem:[#allocation32_spill] sm:$0xff] }
 0x290   : > { %v1832_v36 = vxor.u32 %v1816_v40, %v1800_v21  ;;  %v4603_v17 = vxor.u32 %v1818_v51, %v1802_v39  ;;  %vm1847_vm1 = vcmp.ge.u32.totalorder %v1831_v25, 644245094  ;;  %v1788_v29 = vxor.u32 %v1772_v58, %v1756_v63 }
 0x291   : > { %v1710_v33 = vadd.s32 %v4552_v22, %v1693_v42  ;;  %v1757_v53 = vmul.u32 739982445, %v1741_v4  ;;  %v1675_v61 = vmax.f32 %v1659_v13, 0.0  ;;  %v1711_v21 = vadd.s32 %v4552_v22, %v1694_v48  ;;  %2986 = vmatmul.mubr.msk.f32.vlgmr.msra.gmra.mrb[0].mxu0 %vm1847_vm1, %v4580_v62 }
 0x292   : > { %vm1848_vm2 = vcmp.ge.u32.totalorder %v1832_v36, 644245094  ;;  %vm1849_vm3 = vcmp.ge.u32.totalorder %v4597_v60, 644245094  ;;  %v1804_v12 = vmul.u32 695872825, %v1788_v29  ;;  %v1695_v20 = vadd.s32 %v4549_v32, %v4916_v10 }
 0x293   : > { %v1726_v55 = vshrl.u32 %v1710_v33, 15  ;;  %vm1850_vm4 = vcmp.ge.u32.totalorder %v4603_v17, 644245094  ;;  %v1773_v1 = vshrl.u32 %v1757_v53, 12  ;;  %v4615_v28 = vmul.f32 1.1764706, %v1674_v2  ;;  %2988 = vmatprep.mubr.msk.f32.mxu0 %vm1848_vm2, %v4586_v15 }
 0x294   : > { %v1727_v59 = vshrl.u32 %v1711_v21, 15  ;;  %v1819_v0 = vshrl.u32 %v1803_v56, 15  ;;  %v1676_v16 = vmax.f32 %v1660_v49, 0.0  ;;  %v1712_v26 = vadd.s32 %v4552_v22, %v1695_v20  ;;  %v4919_v49 = vld [vmem:[#allocation33_spill] sm:$0xff]  ;;  %v1662_v60 = vld [vmem:[#allocation2 + $0x58] sm:$0xff] }
 0x295   : > { %v1742_v5 = vxor.u32 %v1726_v55, %v1710_v33  ;;  %v1789_v50 = vxor.u32 %v1773_v1, %v1757_v53  ;;  %v4619_v40 = vmul.f32 1.1764706, %v1675_v61  ;;  %v1696_v44 = vadd.s32 %v4549_v32, %v4917_v54  ;;  %2989 = vmatmul.mubr.msk.f32.gmra.mrb[2].mxu0 %vm1849_vm3, %v4589_v23 }
 0x296   : > { %v1743_v39 = vxor.u32 %v1727_v59, %v1711_v21  ;;  %v1820_v14 = vshrl.u32 %v1804_v12, 15  ;;  %v1677_v3 = vmax.f32 %v1661_v27, 0.0  ;;  %v1728_v51 = vshrl.u32 %v1712_v26, 15  ;;  %2991 = vmatprep.mubr.msk.f32.mxu0 %vm1850_vm4, %v4592_v8 }
 0x297   : > { %v1758_v19 = vmul.u32 739982445, %v1742_v5  ;;  %v1805_v34 = vmul.u32 695872825, %v1789_v50  ;;  %v1713_v63 = vadd.s32 %v4552_v22, %v1696_v44  ;;  %v1697_v11 = vadd.s32 %v4549_v32, %v4918_v47  ;;  %v1663_v44 = vld [vmem:[#allocation2 + $0x60] sm:$0xff] }
 0x298   : > { %v1759_v37 = vmul.u32 739982445, %v1743_v39  ;;  %v1835_v35 = vxor.u32 %v1819_v0, %v1803_v56  ;;  %v4628_v13 = vmul.f32 1.1764706, %v1676_v16  ;;  %v1744_v42 = vxor.u32 %v1728_v51, %v1712_v26 }
 0x299   : > { %v1774_v58 = vshrl.u32 %v1758_v19, 12  ;;  %v1821_v2 = vshrl.u32 %v1805_v34, 15  ;;  %v1729_v48 = vshrl.u32 %v1713_v63, 15  ;;  %v1714_v29 = vadd.s32 %v4552_v22, %v1697_v11 }
 0x29a   : > { %v1775_v4 = vshrl.u32 %v1759_v37, 12  ;;  %v1836_v33 = vxor.u32 %v1820_v14, %v1804_v12  ;;  %v1760_v61 = vmul.u32 739982445, %v1744_v42  ;;  %v1698_v25 = vadd.s32 %v4549_v32, %v4919_v49 }
 0x29b   : > { %v1790_v53 = vxor.u32 %v1774_v58, %v1758_v19  ;;  %v4635_v56 = vmul.f32 1.1764706, %v1677_v3  ;;  %v1745_v21 = vxor.u32 %v1729_v48, %v1713_v63  ;;  %v1730_v55 = vshrl.u32 %v1714_v29, 15  ;;  %v2282_v63 = vld [vmem:[#allocation11 + $0x8] sm:$0xff]  ;;  %v2283_v48 = vld [vmem:[#allocation11 + $0x10] sm:$0xff] }
 0x29c   : > { %v1791_v62 = vxor.u32 %v1775_v4, %v1759_v37  ;;  %v1837_v15 = vxor.u32 %v1821_v2, %v1805_v34  ;;  %v1776_v27 = vshrl.u32 %v1760_v61, 12  ;;  %v1715_v20 = vadd.s32 %v4552_v22, %v1698_v25  ;;  %v2281_v37 = vld [vmem:[#allocation11] sm:$0xff] }
 0x29d   : > { %v1806_v36 = vmul.u32 695872825, %v1790_v53  ;;  %vm1851_vm5 = vcmp.ge.u32.totalorder %v1835_v35, 644245094  ;;  %v1761_v1 = vmul.u32 739982445, %v1745_v21  ;;  %v1746_v59 = vxor.u32 %v1730_v55, %v1714_v29 }
 0x29e   : > { %v1807_v12 = vmul.u32 695872825, %v1791_v62  ;;  %vm1852_vm6 = vcmp.ge.u32.totalorder %v1836_v33, 644245094  ;;  %v1792_v5 = vxor.u32 %v1776_v27, %v1760_v61  ;;  %v1731_v16 = vshrl.u32 %v1715_v20, 15  ;;  %2992 = vmatmul.mubr.msk.f32.gmra.mrb[4].mxu0 %vm1851_vm5, %v4594_v18  ;;  %v2284_v29 = vld [vmem:[#allocation11 + $0x18] sm:$0xff] }
 0x29f   : > { %v1822_v0 = vshrl.u32 %v1806_v36, 15  ;;  %v1777_v23 = vshrl.u32 %v1761_v1, 12  ;;  %v1762_v50 = vmul.u32 739982445, %v1746_v59  ;;  %v1699_v39 = vadd.s32 %v4549_v32, %v4516_v6  ;;  %2994 = vmatprep.mubr.msk.f32.mxu0 %vm1852_vm6, %v4599_v31  ;;  %v1664_v62 = vld [vmem:[#allocation2 + $0x68] sm:$0xff] }
 0x2a0   : > { %v1823_v26 = vshrl.u32 %v1807_v12, 15  ;;  %vm1853_vm7 = vcmp.ge.u32.totalorder %v1837_v15, 644245094  ;;  %v1808_v8 = vmul.u32 695872825, %v1792_v5  ;;  %v1747_v14 = vxor.u32 %v1731_v16, %v1715_v20  ;;  %v2285_v15 = vld [vmem:[#allocation11 + $0x20] sm:$0xff] }
 0x2a1   : > { %v1838_v17 = vxor.u32 %v1822_v0, %v1806_v36  ;;  %v1793_v3 = vxor.u32 %v1777_v23, %v1761_v1  ;;  %v1778_v51 = vshrl.u32 %v1762_v50, 12  ;;  %v1716_v34 = vadd.s32 %v4552_v22, %v1699_v39 }
 0x2a2   : > { %v1839_v19 = vxor.u32 %v1823_v26, %v1807_v12  ;;  %v1824_v11 = vshrl.u32 %v1808_v8, 15  ;;  %v1678_v35 = vmax.f32 %v1662_v60, 0.0  ;;  %v1763_v58 = vmul.u32 739982445, %v1747_v14  ;;  %2995 = vmatmul.mubr.msk.f32.gmra.mrb[6].mxu0 %vm1853_vm7, %v4615_v28  ;;  %v2286_v28 = vld [vmem:[#allocation11 + $0x28] sm:$0xff]  ;;  %v1665_v60 = vld [vmem:[#allocation2 + $0x70] sm:$0xff] }
 0x2a3   : > { %vm1854_vm8 = vcmp.ge.u32.totalorder %v1838_v17, 644245094  ;;  %v1809_v42 = vmul.u32 695872825, %v1793_v3  ;;  %v1679_v18 = vmax.f32 %v1663_v44, 0.0  ;;  %v1794_v2 = vxor.u32 %v1778_v51, %v1762_v50  ;;  %v2288_v44 = vld [vmem:[#allocation11 + $0x38] sm:$0xff] }
 0x2a4   : > { %v1732_v4 = vshrl.u32 %v1716_v34, 15  ;;  %vm1855_vm9 = vcmp.ge.u32.totalorder %v1839_v19, 644245094  ;;  %v1840_v31 = vxor.u32 %v1824_v11, %v1808_v8  ;;  %v1779_v33 = vshrl.u32 %v1763_v58, 12  ;;  %2997 = vmatprep.mubr.msk.f32.mxu0 %vm1854_vm8, %v4619_v40  ;;  %v2287_v8 = vld [vmem:[#allocation11 + $0x30] sm:$0xff]  ;;  %v2289_v11 = vld [vmem:[#allocation11 + $0x40] sm:$0xff] }
 0x2a5   : > { %v1700_v53 = vadd.s32 %v4549_v32, %v4532_v38  ;;  %v1825_v61 = vshrl.u32 %v1809_v42, 15  ;;  %v1810_v25 = vmul.u32 695872825, %v1794_v2  ;;  %v3161_v55 = vpack.c.bf16 %v2282_v63, %v2281_v37  ;;  %v1666_v37 = vld [vmem:[#allocation2 + $0x78] sm:$0xff] }
 0x2a6   : > { %v1748_v21 = vxor.u32 %v1732_v4, %v1716_v34  ;;  %vm1856_vm10 = vcmp.ge.u32.totalorder %v1840_v31, 644245094  ;;  %v1795_v36 = vxor.u32 %v1779_v33, %v1763_v58  ;;  %v3165_v20 = vpack.c.bf16 %v2284_v29, %v2283_v48  ;;  %2998 = vmatmul.mubr.msk.f32.gmra.mrb[8].mxu0 %vm1855_vm9, %v4628_v13  ;;  %v2291_v31 = vld [vmem:[#allocation11 + $0x50] sm:$0xff]  ;;  %v2292_v33 = vld [vmem:[#allocation11 + $0x58] sm:$0xff] }
 0x2a7   : > { %v1717_v27 = vadd.s32 %v4552_v22, %v1700_v53  ;;  %v1841_v12 = vxor.u32 %v1825_v61, %v1809_v42  ;;  %v1873_v1 = vmul.f32 1.1764706, %v1678_v35  ;;  %v1826_v59 = vshrl.u32 %v1810_v25, 15  ;;  %3162 = vmatprep.subr.bf16.mxu1 %v3161_v55  ;;  %3000 = vmatprep.mubr.msk.f32.mxu0 %vm1856_vm10, %v4635_v56  ;;  %v2290_v35 = vld [vmem:[#allocation11 + $0x48] sm:$0xff] }
 0x2a8   : > { %v1764_v0 = vmul.u32 739982445, %v1748_v21  ;;  %v1874_v32 = vmul.f32 1.1764706, %v1679_v18  ;;  %v1680_v40 = vmax.f32 %v1664_v62, 0.0  ;;  %3164 = vmatpush3.bf16.msra.mxu1 %v3161_v55  ;;  %v3169_v50 = vpack.c.bf16 %v2286_v28, %v2285_v15  ;;  %v2293_v21 = vld [vmem:[#allocation11 + $0x60] sm:$0xff] }
 0x2a9   : > { %v1811_v5 = vmul.u32 695872825, %v1795_v36  ;;  %v1733_v16 = vshrl.u32 %v1717_v27, 15  ;;  %vm1857_vm11 = vcmp.ge.u32.totalorder %v1841_v12, 644245094  ;;  %v1842_v26 = vxor.u32 %v1826_v59, %v1810_v25  ;;  %3166 = vmatprep.subr.bf16.mxu1 %v3165_v20  ;;  %v2294_v55 = vld [vmem:[#allocation11 + $0x68] sm:$0xff] }
 0x2aa   : > { %v1780_v23 = vshrl.u32 %v1764_v0, 12  ;;  %3001 = vmatmul.mubr.msk.f32.gmra.mrb[10].mxu0 %vm1857_vm11, %v1873_v1  ;;  %v1875_v19 = vmul.f32 1.1764706, %v1680_v40  ;;  %v1681_v3 = vmax.f32 %v1665_v60, 0.0  ;;  %v3173_v34 = vpack.c.bf16 %v2288_v44, %v2287_v8 }
 0x2ab   : > { %v1827_v39 = vshrl.u32 %v1811_v5, 15  ;;  %v1749_v17 = vxor.u32 %v1733_v16, %v1717_v27  ;;  %vm1858_vm12 = vcmp.ge.u32.totalorder %v1842_v26, 644245094  ;;  %v1682_v4 = vmax.f32 %v1666_v37, 0.0  ;;  %v2295_v27 = vld [vmem:[#allocation11 + $0x70] sm:$0xff] }
 0x2ac   : > { %v1796_v13 = vxor.u32 %v1780_v23, %v1764_v0  ;;  %3168 = vmatpush3.bf16.msra.mxu1 %v3165_v20  ;;  %3003 = vmatprep.mubr.msk.f32.mxu0 %vm1858_vm12, %v1874_v32  ;;  %v1876_v42 = vmul.f32 1.1764706, %v1681_v3  ;;  %v3177_v48 = vpack.c.bf16 %v2290_v35, %v2289_v11  ;;  %v3181_v25 = vpack.c.bf16 %v2292_v33, %v2291_v31  ;;  %v2296_v20 = vld [vmem:[#allocation11 + $0x78] sm:$0xff] }
 0x2ad   : > { %v1843_v14 = vxor.u32 %v1827_v39, %v1811_v5  ;;  %v1765_v51 = vmul.u32 739982445, %v1749_v17  ;;  %3170 = vmatprep.subr.bf16.mxu1 %v3169_v50  ;;  %v1877_v61 = vmul.f32 1.1764706, %v1682_v4  ;;  %v3185_v36 = vpack.c.bf16 %v2294_v55, %v2293_v21 }
 0x2ae   : > { %v1812_v56 = vmul.u32 695872825, %v1796_v13  ;;  %v3189_v15 = vpack.c.bf16 %v2296_v20, %v2295_v27  ;;  %v4660_v28 = vstv %s2071_s3 }
 0x2af   : > { %vm1859_vm13 = vcmp.ge.u32.totalorder %v1843_v14, 644245094  ;;  %v1781_v63 = vshrl.u32 %v1765_v51, 12  ;;  %v2073_v12 = vadd.s32 %v4660_v28, %v4051_v43  ;;  %v2074_v1 = vadd.s32 %v4660_v28, %v4092_v30 }
 0x2b0   : > { %v1828_v58 = vshrl.u32 %v1812_v56, 15  ;;  %3004 = vmatmul.mubr.msk.f32.gmra.mrb[12].mxu0 %vm1859_vm13, %v1875_v19  ;;  %3172 = vmatpush3.bf16.msra.mxu1 %v3169_v50  ;;  %v2075_v59 = vadd.s32 %v4660_v28, %v4217_v45  ;;  %v2076_v32 = vadd.s32 %v4660_v28, %v4235_v9  ;;  %v2077_v30 = vadd.s32 %v4660_v28, %v4271_v52 }
 0x2b1   : > { %v1797_v18 = vxor.u32 %v1781_v63, %v1765_v51  ;;  %3174 = vmatprep.subr.bf16.mxu1 %v3173_v34  ;;  %v2089_v0 = vadd.s32 %v2073_v12, %v4552_v22  ;;  %v2090_v40 = vadd.s32 %v2074_v1, %v4552_v22  ;;  %v2078_v39 = vadd.s32 %v4660_v28, %v4278_v57 }
 0x2b2   : > { %v1844_v2 = vxor.u32 %v1828_v58, %v1812_v56  ;;  %v2091_v5 = vadd.s32 %v2075_v59, %v4552_v22  ;;  %v2092_v26 = vadd.s32 %v2076_v32, %v4552_v22  ;;  %v2093_v44 = vadd.s32 %v2077_v30, %v4552_v22 }
 0x2b3   : > { %v1813_v29 = vmul.u32 695872825, %v1797_v18  ;;  %v2105_v16 = vshrl.u32 %v2089_v0, 15  ;;  %v2106_v60 = vshrl.u32 %v2090_v40, 15  ;;  %v2094_v14 = vadd.s32 %v2078_v39, %v4552_v22 }
 0x2b4   : > { %vm1860_vm14 = vcmp.ge.u32.totalorder %v1844_v2, 644245094  ;;  %3176 = vmatpush3.bf16.msra.mxu1 %v3173_v34  ;;  %v2107_v43 = vshrl.u32 %v2091_v5, 15  ;;  %v2108_v50 = vshrl.u32 %v2092_v26, 15  ;;  %v2079_v19 = vadd.s32 %v4660_v28, %v4314_v46 }
 0x2b5   : > { %3006 = vmatprep.mubr.msk.f32.mxu0 %vm1860_vm14, %v1876_v42  ;;  %v1829_v53 = vshrl.u32 %v1813_v29, 15  ;;  %3178 = vmatprep.subr.bf16.mxu1 %v3177_v48  ;;  %v2121_v23 = vxor.u32 %v2105_v16, %v2089_v0  ;;  %v2122_v45 = vxor.u32 %v2106_v60, %v2090_v40  ;;  %v2080_v3 = vadd.s32 %v4660_v28, %v4346_v41 }
 0x2b6   : > { %v2123_v17 = vxor.u32 %v2107_v43, %v2091_v5  ;;  %v2124_v8 = vxor.u32 %v2108_v50, %v2092_v26  ;;  %v2109_v34 = vshrl.u32 %v2093_v44, 15  ;;  %v2110_v57 = vshrl.u32 %v2094_v14, 15 }
 0x2b7   : > { %v1845_v62 = vxor.u32 %v1829_v53, %v1813_v29  ;;  %v2137_v9 = vmul.u32 739982445, %v2121_v23  ;;  %v2138_v13 = vmul.u32 739982445, %v2122_v45  ;;  %v2095_v63 = vadd.s32 %v2079_v19, %v4552_v22 }
 0x2b8   : > { %3180 = vmatpush3.bf16.msra.mxu1 %v3177_v48  ;;  %v2139_v51 = vmul.u32 739982445, %v2123_v17  ;;  %v2140_v56 = vmul.u32 739982445, %v2124_v8  ;;  %v2096_v11 = vadd.s32 %v2080_v3, %v4552_v22  ;;  %v2081_v35 = vadd.s32 %v4660_v28, %v4914_v7 }
 0x2b9   : > { %vm1861_vm15 = vcmp.ge.u32.totalorder %v1845_v62, 644245094  ;;  %3182 = vmatprep.subr.bf16.mxu1 %v3181_v25  ;;  %v2153_v52 = vshrl.u32 %v2137_v9, 12  ;;  %v2154_v37 = vshrl.u32 %v2138_v13, 12  ;;  %v2082_v46 = vadd.s32 %v4660_v28, %v4915_v24 }
 0x2ba   : > { %3007 = vmatmul.mubr.msk.f32.gmra.mrb[14].mxu0 %vm1861_vm15, %v1877_v61  ;;  %v2155_v58 = vshrl.u32 %v2139_v51, 12  ;;  %v2156_v18 = vshrl.u32 %v2140_v56, 12  ;;  %v2125_v41 = vxor.u32 %v2109_v34, %v2093_v44  ;;  %v2126_v4 = vxor.u32 %v2110_v57, %v2094_v14 }
 0x2bb   : > { %v2169_v42 = vxor.u32 %v2153_v52, %v2137_v9  ;;  %v2170_v2 = vxor.u32 %v2154_v37, %v2138_v13  ;;  %v2111_v48 = vshrl.u32 %v2095_v63, 15  ;;  %v2112_v29 = vshrl.u32 %v2096_v11, 15 }
 0x2bc   : > { %3184 = vmatpush3.bf16.msra.mxu1 %v3181_v25  ;;  %v2097_v31 = vadd.s32 %v2081_v35, %v4552_v22  ;;  %v2083_v33 = vadd.s32 %v4660_v28, %v4916_v10  ;;  %v2084_v53 = vadd.s32 %v4660_v28, %v4917_v54  ;;  %v2171_v7 = vxor.u32 %v2155_v58, %v2139_v51 }
 0x2bd   : > { %3186 = vmatprep.subr.bf16.mxu1 %v3185_v36  ;;  %v2098_v61 = vadd.s32 %v2082_v46, %v4552_v22  ;;  %v2185_v25 = vmul.u32 695872825, %v2169_v42  ;;  %v2172_v24 = vxor.u32 %v2156_v18, %v2140_v56  ;;  %v2141_v62 = vmul.u32 739982445, %v2125_v41 }
 0x2be   : > { %v2186_v21 = vmul.u32 695872825, %v2170_v2  ;;  %v2142_v55 = vmul.u32 739982445, %v2126_v4  ;;  %v2128_v27 = vxor.u32 %v2112_v29, %v2096_v11  ;;  %v2113_v20 = vshrl.u32 %v2097_v31, 15 }
 0x2bf   : > { %v2100_v12 = vadd.s32 %v2084_v53, %v4552_v22  ;;  %v2085_v10 = vadd.s32 %v4660_v28, %v4918_v47  ;;  %v2187_v1 = vmul.u32 695872825, %v2171_v7  ;;  %v2114_v54 = vshrl.u32 %v2098_v61, 15 }
 0x2c0   : > { %3188 = vmatpush3.bf16.msra.mxu1 %v3185_v36  ;;  %v2127_v36 = vxor.u32 %v2111_v48, %v2095_v63  ;;  %v2086_v59 = vadd.s32 %v4660_v28, %v4919_v49  ;;  %v2201_v0 = vshrl.u32 %v2185_v25, 15  ;;  %v2188_v32 = vmul.u32 695872825, %v2172_v24 }
 0x2c1   : > { %3190 = vmatprep.subr.bf16.mxu1 %v3189_v15  ;;  %v2157_v40 = vshrl.u32 %v2141_v62, 12  ;;  %v2202_v5 = vshrl.u32 %v2186_v21, 15  ;;  %v2158_v16 = vshrl.u32 %v2142_v55, 12  ;;  %v2144_v60 = vmul.u32 739982445, %v2128_v27 }
 0x2c2   : > { %v2143_v26 = vmul.u32 739982445, %v2127_v36  ;;  %v2129_v43 = vxor.u32 %v2113_v20, %v2097_v31  ;;  %v2116_v50 = vshrl.u32 %v2100_v12, 15  ;;  %v2101_v30 = vadd.s32 %v2085_v10, %v4552_v22 }
 0x2c3   : > { %v2203_v45 = vshrl.u32 %v2187_v1, 15  ;;  %v2130_v39 = vxor.u32 %v2114_v54, %v2098_v61  ;;  %v2102_v47 = vadd.s32 %v2086_v59, %v4552_v22  ;;  %v2217_v17 = vxor.u32 %v2201_v0, %v2185_v25 }
 0x2c4   : > { %3192 = vmatpush3.bf16.msra.mxu1 %v3189_v15  ;;  %v2099_v15 = vadd.s32 %v2083_v33, %v4552_v22  ;;  %v2204_v9 = vshrl.u32 %v2188_v32, 15  ;;  %v2173_v8 = vxor.u32 %v2157_v40, %v2141_v62  ;;  %v2218_v49 = vxor.u32 %v2202_v5, %v2186_v21 }
 0x2c5   : > { %v2174_v44 = vxor.u32 %v2158_v16, %v2142_v55  ;;  %v2159_v13 = vshrl.u32 %v2143_v26, 12  ;;  %v2160_v14 = vshrl.u32 %v2144_v60, 12  ;;  %v2145_v19 = vmul.u32 739982445, %v2129_v43 }
 0x2c6   : > { %v2115_v23 = vshrl.u32 %v2099_v15, 15  ;;  %v2132_v51 = vxor.u32 %v2116_v50, %v2100_v12  ;;  %v2117_v52 = vshrl.u32 %v2101_v30, 15  ;;  %v4704_v56 = vxor.u32 %v2203_v45, %v2187_v1 }
 0x2c7   : > { %v2146_v34 = vmul.u32 739982445, %v2130_v39  ;;  %v2118_v37 = vshrl.u32 %v2102_v47, 15  ;;  %v2087_v57 = vadd.s32 %v4660_v28, %v4516_v6  ;;  %vm2233_vm0 = vcmp.ge.u32.totalorder %v2217_v17, 644245094 }
 0x2c8   : > { %v2131_v3 = vxor.u32 %v2115_v23, %v2099_v15  ;;  %v4708_v63 = vxor.u32 %v2204_v9, %v2188_v32  ;;  %v2189_v11 = vmul.u32 695872825, %v2173_v8  ;;  %v2088_v35 = vadd.s32 %v4660_v28, %v4532_v38 }
 0x2c9   : > { %vm2234_vm1 = vcmp.ge.u32.totalorder %v2218_v49, 644245094  ;;  %v2190_v58 = vmul.u32 695872825, %v2174_v44  ;;  %v2175_v46 = vxor.u32 %v2159_v13, %v2143_v26  ;;  %v2176_v42 = vxor.u32 %v2160_v14, %v2144_v60 }
 0x2ca   : > { %v2161_v18 = vshrl.u32 %v2145_v19, 12  ;;  %v2147_v41 = vmul.u32 739982445, %v2131_v3  ;;  %v2148_v2 = vmul.u32 739982445, %v2132_v51  ;;  %v2133_v4 = vxor.u32 %v2117_v52, %v2101_v30 }
 0x2cb   : > { %vm2235_vm2 = vcmp.ge.u32.totalorder %v4704_v56, 644245094  ;;  %v2162_v29 = vshrl.u32 %v2146_v34, 12  ;;  %v2134_v6 = vxor.u32 %v2118_v37, %v2102_v47  ;;  %v2103_v31 = vadd.s32 %v2087_v57, %v4552_v22 }
 0x2cc   : > { %vm2236_vm3 = vcmp.ge.u32.totalorder %v4708_v63, 644245094  ;;  %v2205_v38 = vshrl.u32 %v2189_v11, 15  ;;  %v2104_v28 = vadd.s32 %v2088_v35, %v4552_v22  ;;  %v2206_v61 = vshrl.u32 %v2190_v58, 15 }
 0x2cd   : > { %v2191_v25 = vmul.u32 695872825, %v2175_v46  ;;  %v2192_v24 = vmul.u32 695872825, %v2176_v42  ;;  %v2177_v62 = vxor.u32 %v2161_v18, %v2145_v19  ;;  %v2163_v21 = vshrl.u32 %v2147_v41, 12 }
 0x2ce   : > { %v2164_v55 = vshrl.u32 %v2148_v2, 12  ;;  %v2149_v36 = vmul.u32 739982445, %v2133_v4  ;;  %v2178_v15 = vxor.u32 %v2162_v29, %v2146_v34  ;;  %v2150_v12 = vmul.u32 739982445, %v2134_v6 }
 0x2cf   : > { %v2119_v10 = vshrl.u32 %v2103_v31, 15  ;;  %v2221_v0 = vxor.u32 %v2205_v38, %v2189_v11  ;;  %v2120_v32 = vshrl.u32 %v2104_v28, 15  ;;  %v2222_v22 = vxor.u32 %v2206_v61, %v2190_v58 }
 0x2d0   : > { %v2207_v5 = vshrl.u32 %v2191_v25, 15  ;;  %v2208_v16 = vshrl.u32 %v2192_v24, 15  ;;  %v2193_v26 = vmul.u32 695872825, %v2177_v62  ;;  %v2179_v60 = vxor.u32 %v2163_v21, %v2147_v41 }
 0x2d1   : > { %v2180_v43 = vxor.u32 %v2164_v55, %v2148_v2  ;;  %v2165_v23 = vshrl.u32 %v2149_v36, 12  ;;  %v2194_v45 = vmul.u32 695872825, %v2178_v15  ;;  %v2166_v39 = vshrl.u32 %v2150_v12, 12 }
 0x2d2   : > { %v2135_v47 = vxor.u32 %v2119_v10, %v2103_v31  ;;  %vm2237_vm4 = vcmp.ge.u32.totalorder %v2221_v0, 644245094  ;;  %v2136_v17 = vxor.u32 %v2120_v32, %v2104_v28  ;;  %vm2238_vm5 = vcmp.ge.u32.totalorder %v2222_v22, 644245094 }
 0x2d3   : > { %v2223_v49 = vxor.u32 %v2207_v5, %v2191_v25  ;;  %v2224_v14 = vxor.u32 %v2208_v16, %v2192_v24  ;;  %v2209_v19 = vshrl.u32 %v2193_v26, 15  ;;  %v2195_v3 = vmul.u32 695872825, %v2179_v60 }
 0x2d4   : > { %v2196_v51 = vmul.u32 695872825, %v2180_v43  ;;  %v2181_v52 = vxor.u32 %v2165_v23, %v2149_v36  ;;  %v2210_v57 = vshrl.u32 %v2194_v45, 15  ;;  %v2182_v11 = vxor.u32 %v2166_v39, %v2150_v12 }
 0x2d5   : > { %v2151_v35 = vmul.u32 739982445, %v2135_v47  ;;  %v2152_v56 = vmul.u32 739982445, %v2136_v17  ;;  %vm2239_vm6 = vcmp.ge.u32.totalorder %v2223_v49, 644245094  ;;  %v2225_v63 = vxor.u32 %v2209_v19, %v2193_v26 }
 0x2d6   : > { %vm2240_vm7 = vcmp.ge.u32.totalorder %v2224_v14, 644245094  ;;  %v2211_v41 = vshrl.u32 %v2195_v3, 15  ;;  %v2212_v2 = vshrl.u32 %v2196_v51, 15  ;;  %v2197_v4 = vmul.u32 695872825, %v2181_v52 }
 0x2d7   : > { %v2226_v6 = vxor.u32 %v2210_v57, %v2194_v45  ;;  %v2198_v31 = vmul.u32 695872825, %v2182_v11  ;;  %vm2241_vm8 = vcmp.ge.u32.totalorder %v2225_v63, 644245094 }
 0x2d8   : > { %v2227_v25 = vxor.u32 %v2211_v41, %v2195_v3  ;;  %v2228_v24 = vxor.u32 %v2212_v2, %v2196_v51  ;;  %v2213_v62 = vshrl.u32 %v2197_v4, 15 }
 0x2d9   : > { %vm2242_vm9 = vcmp.ge.u32.totalorder %v2226_v6, 644245094  ;;  %v2214_v36 = vshrl.u32 %v2198_v31, 15 }
 0x2da   : > { %vm2243_vm10 = vcmp.ge.u32.totalorder %v2227_v25, 644245094  ;;  %vm2244_vm11 = vcmp.ge.u32.totalorder %v2228_v24, 644245094 }
 0x2db   : > { %v2230_v32 = vxor.u32 %v2214_v36, %v2198_v31 }
 0x2dd   : > { %vm2246_vm13 = vcmp.ge.u32.totalorder %v2230_v32, 644245094 }
 0x364   : > { %v2987_v48 = vpop.f32.mrb[0].mxu0 }
 0x365   : > { %v2056_v33 = vmax.f32 %v2987_v48, 0.0  ;;  %v1976_v53 = vpop.f32.mrb[1].mxu0 }
 0x366   : > { %v2055_v7 = vmax.f32 %v1976_v53, 0.0 }
 0x367   : > { %v2250_v1 = vmul.f32 1.1764706, %v2056_v33  ;;  %v2167_v33 = vshrl.u32 %v2151_v35, 12 }
 0x368   : > { %v2249_v27 = vmul.f32 1.1764706, %v2055_v7  ;;  %v2990_v20 = vpop.f32.mrb[2].mxu0  ;;  %v2168_v7 = vshrl.u32 %v2152_v56, 12 }
 0x369   : > { %v2058_v54 = vmax.f32 %v2990_v20, 0.0  ;;  %v1986_v59 = vpop.f32.mrb[3].mxu0 }
 0x36a   : > { %v2057_v40 = vmax.f32 %v1986_v59, 0.0  ;;  %3041 = vmatprep.mubr.msk.f32.mxu1 %vm2233_vm0, %v2249_v27  ;;  %v2183_v27 = vxor.u32 %v2167_v33, %v2151_v35  ;;  %v2184_v10 = vxor.u32 %v2168_v7, %v2152_v56 }
 0x36b   : > { %3042 = vmatmul.mubr.msk.f32.vlgmr.msra.gmra.mrb[0].mxu1 %vm2234_vm1, %v2250_v1  ;;  %v2252_v9 = vmul.f32 1.1764706, %v2058_v54  ;;  %v2229_v54 = vxor.u32 %v2213_v62, %v2197_v4 }
 0x36c   : > { %v2251_v50 = vmul.f32 1.1764706, %v2057_v40  ;;  %v2199_v40 = vmul.u32 695872825, %v2183_v27  ;;  %v2200_v26 = vmul.u32 695872825, %v2184_v10 }
 0x36d   : > { %vm2245_vm12 = vcmp.ge.u32.totalorder %v2229_v54, 644245094 }
 0x36e   : > { %3044 = vmatprep.mubr.msk.f32.mxu1 %vm2235_vm2, %v2251_v50  ;;  %v2215_v23 = vshrl.u32 %v2199_v40, 15 }
 0x36f   : > { %3045 = vmatmul.mubr.msk.f32.gmra.mrb[2].mxu1 %vm2236_vm3, %v2252_v9 }
 0x370   : > { %v2231_v45 = vxor.u32 %v2215_v23, %v2199_v40 }
 0x371   : > { %v2993_v30 = vpop.f32.mrb[4].mxu0 }
 0x372   : > { %v2060_v8 = vmax.f32 %v2993_v30, 0.0  ;;  %v1996_v44 = vpop.f32.mrb[5].mxu0  ;;  %v2216_v30 = vshrl.u32 %v2200_v26, 15  ;;  %vm2247_vm14 = vcmp.ge.u32.totalorder %v2231_v45, 644245094 }
 0x373   : > { %v2059_v13 = vmax.f32 %v1996_v44, 0.0 }
 0x374   : > { %v2254_v58 = vmul.f32 1.1764706, %v2060_v8  ;;  %v2232_v47 = vxor.u32 %v2216_v30, %v2200_v26 }
 0x375   : > { %v2253_v34 = vmul.f32 1.1764706, %v2059_v13  ;;  %v2996_v37 = vpop.f32.mrb[6].mxu0 }
 0x376   : > { %v2062_v46 = vmax.f32 %v2996_v37, 0.0  ;;  %v2006_v42 = vpop.f32.mrb[7].mxu0  ;;  %vm2248_vm15 = vcmp.ge.u32.totalorder %v2232_v47, 644245094 }
 0x377   : > { %v2061_v18 = vmax.f32 %v2006_v42, 0.0  ;;  %3047 = vmatprep.mubr.msk.f32.mxu1 %vm2237_vm4, %v2253_v34 }
 0x378   : > { %3048 = vmatmul.mubr.msk.f32.gmra.mrb[4].mxu1 %vm2238_vm5, %v2254_v58  ;;  %v2256_v53 = vmul.f32 1.1764706, %v2062_v46 }
 0x379   : > { %v2255_v48 = vmul.f32 1.1764706, %v2061_v18  ;;  %v2999_v29 = vpop.f32.mrb[8].mxu0 }
 0x37a   : > { %v2064_v38 = vmax.f32 %v2999_v29, 0.0  ;;  %v2016_v28 = vpop.f32.mrb[9].mxu0 }
 0x37b   : > { %v2063_v61 = vmax.f32 %v2016_v28, 0.0  ;;  %3050 = vmatprep.mubr.msk.f32.mxu1 %vm2239_vm6, %v2255_v48 }
 0x37c   : > { %3051 = vmatmul.mubr.msk.f32.gmra.mrb[6].mxu1 %vm2240_vm7, %v2256_v53  ;;  %v2258_v20 = vmul.f32 1.1764706, %v2064_v38 }
 0x37d   : > { %v2257_v21 = vmul.f32 1.1764706, %v2063_v61  ;;  %v3002_v55 = vpop.f32.mrb[10].mxu0 }
 0x37e   : > { %v2066_v15 = vmax.f32 %v3002_v55, 0.0  ;;  %v2026_v12 = vpop.f32.mrb[11].mxu0 }
 0x37f   : > { %v2065_v1 = vmax.f32 %v2026_v12, 0.0  ;;  %3053 = vmatprep.mubr.msk.f32.mxu1 %vm2241_vm8, %v2257_v21 }
 0x380   : > { %3054 = vmatmul.mubr.msk.f32.gmra.mrb[8].mxu1 %vm2242_vm9, %v2258_v20  ;;  %v2260_v22 = vmul.f32 1.1764706, %v2066_v15 }
 0x381   : > { %v2259_v59 = vmul.f32 1.1764706, %v2065_v1 }
 0x383   : > { %v3005_v0 = vpop.f32.mrb[12].mxu0  ;;  %3056 = vmatprep.mubr.msk.f32.mxu1 %vm2243_vm10, %v2259_v59 }
 0x384   : > { %v2068_v5 = vmax.f32 %v3005_v0, 0.0  ;;  %v2036_v16 = vpop.f32.mrb[13].mxu0  ;;  %3057 = vmatmul.mubr.msk.f32.gmra.mrb[10].mxu1 %vm2244_vm11, %v2260_v22 }
 0x385   : > { %v2067_v60 = vmax.f32 %v2036_v16, 0.0 }
 0x386   : > { %v2262_v50 = vmul.f32 1.1764706, %v2068_v5 }
 0x387   : > { %v2261_v43 = vmul.f32 1.1764706, %v2067_v60 }
 0x389   : > { %3059 = vmatprep.mubr.msk.f32.mxu1 %vm2245_vm12, %v2261_v43 }
 0x38a   : > { %3060 = vmatmul.mubr.msk.f32.gmra.mrb[12].mxu1 %vm2246_vm13, %v2262_v50 }
 0x38d   : > { %v3008_v39 = vpop.f32.mrb[14].mxu0 }
 0x38e   : > { %v2070_v9 = vmax.f32 %v3008_v39, 0.0  ;;  %v2046_v8 = vpop.f32.mrb[15].mxu0 }
 0x38f   : > { %v2069_v44 = vmax.f32 %v2046_v8, 0.0 }
 0x390   : > { %v2264_v13 = vmul.f32 1.1764706, %v2070_v9 }
 0x391   : > { %v2263_v17 = vmul.f32 1.1764706, %v2069_v44 }
 0x393   : > { %3062 = vmatprep.mubr.msk.f32.mxu1 %vm2247_vm14, %v2263_v17 }
 0x394   : > { %3063 = vmatmul.mubr.msk.f32.gmra.mrb[14].mxu1 %vm2248_vm15, %v2264_v13 }
 0x43e   : > { %v3043_v49 = vpop.f32.mrb[0].mxu1 }
 0x43f   : > { %2443 = vst [vmem:[%s4011_s28 + $0x8] sm:$0xff] %v3043_v49  ;;  %v2363_v14 = vpop.f32.mrb[1].mxu1 }
 0x440   : > { %2442 = vst [vmem:[%s4011_s28] sm:$0xff] %v2363_v14 }
 0x442   : > { %v3046_v19 = vpop.f32.mrb[2].mxu1 }
 0x443   : > { %2445 = vst [vmem:[%s4011_s28 + $0x18] sm:$0xff] %v3046_v19  ;;  %v2373_v3 = vpop.f32.mrb[3].mxu1 }
 0x444   : > { %2444 = vst [vmem:[%s4011_s28 + $0x10] sm:$0xff] %v2373_v3 }
 0x44b   : > { %v3049_v51 = vpop.f32.mrb[4].mxu1 }
 0x44c   : > { %2447 = vst [vmem:[%s4011_s28 + $0x28] sm:$0xff] %v3049_v51  ;;  %v2383_v52 = vpop.f32.mrb[5].mxu1 }
 0x44d   : > { %2446 = vst [vmem:[%s4011_s28 + $0x20] sm:$0xff] %v2383_v52 }
 0x44f   : > { %v3052_v34 = vpop.f32.mrb[6].mxu1 }
 0x450   : > { %2449 = vst [vmem:[%s4011_s28 + $0x38] sm:$0xff] %v3052_v34  ;;  %v2393_v37 = vpop.f32.mrb[7].mxu1 }
 0x451   : > { %2448 = vst [vmem:[%s4011_s28 + $0x30] sm:$0xff] %v2393_v37 }
 0x453   : > { %v3055_v57 = vpop.f32.mrb[8].mxu1 }
 0x454   : > { %2451 = vst [vmem:[%s4011_s28 + $0x48] sm:$0xff] %v3055_v57  ;;  %v2403_v11 = vpop.f32.mrb[9].mxu1 }
 0x455   : > { %2450 = vst [vmem:[%s4011_s28 + $0x40] sm:$0xff] %v2403_v11 }
 0x457   : > { %v3058_v35 = vpop.f32.mrb[10].mxu1 }
 0x458   : > { %2453 = vst [vmem:[%s4011_s28 + $0x58] sm:$0xff] %v3058_v35  ;;  %v2413_v58 = vpop.f32.mrb[11].mxu1 }
 0x459   : > { %2452 = vst [vmem:[%s4011_s28 + $0x50] sm:$0xff] %v2413_v58 }
 0x45d   : > { %v3061_v46 = vpop.f32.mrb[12].mxu1 }
 0x45e   : > { %2455 = vst [vmem:[%s4011_s28 + $0x68] sm:$0xff] %v3061_v46  ;;  %v2423_v42 = vpop.f32.mrb[13].mxu1 }
 0x45f   : > { %2454 = vst [vmem:[%s4011_s28 + $0x60] sm:$0xff] %v2423_v42 }
 0x467   : > { %v3064_v56 = vpop.f32.mrb[14].mxu1 }
 0x468   : > { %2457 = vst [vmem:[%s4011_s28 + $0x78] sm:$0xff] %v3064_v56  ;;  %v2433_v18 = vpop.f32.mrb[15].mxu1 }
 0x469   : > { %2456 = vst [vmem:[%s4011_s28 + $0x70] sm:$0xff] %v2433_v18 }
 0x46a PF: > { %s4920_s0 = sld [smem:[#allocation22_spill]]  ;;  %s4922_s4 = sld [smem:[#allocation24_spill]] }
 0x46b   : > { %s4923_s5 = sld [smem:[#allocation37_spill]]  ;;  %s2472_s23 = sshll.u32 %s4011_s28, 4  ;;  %s4749_s23 = int_to_ptr.vmem [resolvable:$true] %s2472_s23 }
 0x46c   : > { %s4753_s9 = scalar_lea.sflag [#allocation7], %s301_s21  ;;  %s3469_s10 = scalar_lea.vmem %s4749_s23, 2048 }
 0x46d   : > { %p3470_p0 = scmp.ne.s32.totalorder %s4749_s23, %s3469_s10  ;;  %s3639_s12 = smov [#allocation13]  }
 0x46e   : > { %s3473_s16 = sshll.u32 %s3639_s12, 4  ;;  %s3474_s16 = int_to_ptr.vmem [resolvable:$false] %s3473_s16 }
 0x46f   : > { %s3475_s8 = scalar_lea.vmem %s3474_s16, 4096  ;;  %p3476_p12 = scmp.lt.s32.totalorder %s4749_s23, %s3474_s16 }
 0x470   : > { %s2728_s6 = sshll.u32 %s4920_s0, 11  ;;  %p4924_p9 = scmp.ne.s32.totalorder %s4922_s4, 0 }
 0x471   : > { %s4746_s11 = scalar_lea.hbm %s4923_s5, %s2728_s6  ;;  %p3477_p5 = scmp.lt.s32.totalorder %s3475_s8, %s3469_s10 }
 0x472   : > { %p3471_p13 = pnand %p3470_p0, %p4924_p9 }
 0x473   : > { %p3478_p4 = por %p3477_p5, %p3476_p12 }
 0x474   : > { %p3472_p8 = pneg %p3471_p13 }
 0x476   : > { %p3479_p7 = pnand %p3478_p4, %p3472_p8 }
 0x478   : > { %3482 = shalt.err (!%p3479_p7)
}
 0x479   : > { %s3483_s21 = scalar_lea.hbm %s4746_s11, 2048  ;;  %s3487_s18 = scalar_lea.hbm %s4923_s5, 4096 }
 0x47a   : > { %p3484_p6 = scmp.ne.s32.totalorder %s4746_s11, %s3483_s21  ;;  %p3488_p3 = scmp.lt.u32.totalorder %s4746_s11, %s4923_s5 }
 0x47b   : > { %p3489_p11 = scmp.lt.u32.totalorder %s3487_s18, %s3483_s21  ;;  %p3491_p0 = scmp.lt.u32.totalorder %s3483_s21, %s4746_s11 }
 0x47c   : > { %p3485_p1 = pnand %p3484_p6, %p4924_p9 }
 0x47d   : > { %p3490_p10 = por %p3489_p11, %p3488_p3 }
 0x47e   : > { %p3486_p2 = pneg %p3485_p1 }
 0x47f   : > { %p3492_p13 = por %p3491_p0, %p3490_p10 }
 0x481   : > { %p3493_p8 = pnand %p3492_p13, %p3486_p2 }
 0x483   : > { %3496 = shalt.err (!%p3493_p8)
}
 0x484   : > { %s3640_s0 = smov 128   ;;  %s3641_s13 = smov 8  }
 0x485   : > { %3205 = dma.vmem_to_hbm [thread:$0]  (%p4924_p9), %s4749_s23, 2048, %s4746_s11, %s4753_s9, %s3640_s0, %s3640_s0, %s3641_s13  }
 0x486 PF: > { %s4925_s6 = sld [smem:[#allocation19_spill]]  ;;  %s4926_s20 = sld [smem:[#allocation25_spill]] }
 0x487   : > { %p3230_p12 = scmp.ge.s32.totalorder %s3627_s7, 2 }
 0x48c   : > { %s2487_s15 = sand.u32 1, %s4925_s6   ;;  %p4927_p5 = scmp.ne.s32.totalorder %s4926_s20, 0 }
 0x48d   : > { %s2488_s10 = scalar_lea.sflag [#allocation7], %s2487_s15 }
 0x48e   : > { %p3222_p4 = pnand %p3230_p12, %p4927_p5 }
 0x490   : > { %3570 = dma.done.wait (!%p3222_p4), %s2488_s10, 2048  }
 0x491   : > { %3572 = vsyncadd (!%p3222_p4), %s2488_s10, 4294965248  ;;  %s26_s7 = sadd.s32 1, %s3627_s7   ;;  %s4929_s20 = sld [smem:[#allocation20_spill]] }
 0x492   : > { %p4782_p7 = scmp.ge.s32.totalorder %s26_s7, 6   ;;  %s4930_s4 = sld [smem:[#allocation23_spill]] }
 0x493   : > { %s4931_s11 = sld [smem:[#allocation26_spill]]  ;;  %s4932_s6 = sld [smem:[#allocation27_spill]] }
 0x494   : > { %s4933_s21 = smov %s3583_s22  ;;  %s4934_s22 = smov %s3874_s29 }
 0x495   : > { %s4935_s23 = smov %s3591_s24  ;;  %s4936_s24 = smov %s3595_s25 }
 0x496   : > { %s4937_s25 = smov %s3930_s17  ;;  %s4938_s0 = smov %s3603_s26 }
 0x497   : > { %s4939_s26 = smov %s3607_s27  ;;  %s4940_s27 = smov %s3877_s14 }
 0x498   : > { %s4941_s28 = smov %s3619_s30  ;;  %s4942_s29 = smov %s4930_s4 }
 0x499   : > { %s4943_s30 = smov %s4931_s11  ;;  %25 = sbr.rel (!%p4782_p7) target bundleno = 19 (0x13), region = 110 }
 0x4a0   :  { %2493 = vsyncpa [#allocation6], 1 }
 0x4a1   :  { %2495 = vsyncpa [#allocation6 + $0x1], 1 }
 0x4a2   :  { %2496 = vsyncpa [#allocation9], 1 }
 0x4a3   :  { %2498 = vsyncpa [#allocation9 + $0x1], 1 }
 0x4a4   :  { %2499 = vsyncpa [#allocation12], 1 }
 0x4a5   :  { %2500 = vsyncpa [#allocation7], 1 }
 0x4a6   :  { %2502 = vsyncpa [#allocation7 + $0x1], 1 }

</bundles_post_ra>
